<compile_context>
chip_gen: v5e
topology: v5e:2x2
jax: 0.10.0
libtpu: 0.0.40
codegen_flags: <defaults>
</compile_context>

<pallas_src>
import functools

import numpy as np
import jax
import jax.numpy as jnp
from jax.experimental import pallas as pl
from jax.experimental.pallas import tpu as pltpu

EPS = 1e-5
LANES = 128
PAD_W = 8        # left zero-pad columns in the stride-1 out1 scratch
PADC = 8         # left zero-pad column-pairs in the stride>1 out1 scratch
CHUNK_ROWS = 256  # target flattened rows per conv2/conv3 register chunk


def _round_up(x, m):
    return (x + m - 1) // m * m


# ------------------------------------------------------------------ kernel ---
def _make_bottleneck_kernel(H, W, Ho, Wo, stride, has_proj):
    """Fused Bottleneck kernel body; all shape params are static."""
    s = stride

    def kernel(*refs):
        if has_proj:
            (x_ref, w1_ref, b1_ref, w2_ref, b2_ref, w3_ref, b3_ref,
             wsc_ref, bsc_ref, o_ref, out1p_ref) = refs
        else:
            (x_ref, w1_ref, b1_ref, w2_ref, b2_ref, w3_ref, b3_ref,
             o_ref, out1p_ref) = refs
            wsc_ref = bsc_ref = None

        pp = w2_ref.shape[-1]          # padded planes
        coutp = w3_ref.shape[-1]       # padded output channels
        cin_l = x_ref.shape[-1]        # padded Cin (s==1) or s*Cin (s>1)

        # ---------------- stage 1: 1x1 conv + BN + ReLU -------------------
        rows1 = H * W if s == 1 else Ho * s * Wo
        x_all = x_ref[0]
        h1 = jnp.dot(x_all.reshape(rows1, cin_l), w1_ref[...],
                     preferred_element_type=jnp.float32)
        h1 = jnp.maximum(h1 + b1_ref[...], 0.0).astype(jnp.bfloat16)

        # --------- write out1 into the padded bf16 VMEM scratch -----------
        if s == 1:
            # zero only the halo actually read by the 3x3 taps
            zr = jnp.zeros((1, W + 2, pp), jnp.bfloat16)
            out1p_ref[0:1, PAD_W - 1:PAD_W + W + 1, :] = zr
            out1p_ref[H + 1:H + 2, PAD_W - 1:PAD_W + W + 1, :] = zr
            zc = jnp.zeros((H, 1, pp), jnp.bfloat16)
            out1p_ref[1:H + 1, PAD_W - 1:PAD_W, :] = zc
            out1p_ref[1:H + 1, PAD_W + W:PAD_W + W + 1, :] = zc
            out1p_ref[1:H + 1, PAD_W:PAD_W + W, :] = h1.reshape(H, W, pp)
        else:
            # deinterleaved layout: axis0 = row//s (+1 top halo), axis1 = row%s,
            # axis2 = col//s (+PADC left halo), lanes = (col%s, channel)
            out1p_ref[0:1, :, PADC - 1:PADC + Wo, :] = jnp.zeros(
                (1, s, Wo + 1, s * pp), jnp.bfloat16)
            out1p_ref[:, :, PADC - 1:PADC, :] = jnp.zeros(
                (Ho + 1, s, 1, s * pp), jnp.bfloat16)
            out1p_ref[1:Ho + 1, :, PADC:PADC + Wo, :] = h1.reshape(
                Ho, s, Wo, s * pp)

        # ----------- stages 2+3 fused, per output-row chunk ---------------
        n_taps = 9 if s == 1 else 6
        TR = max(1, min(Ho, CHUNK_ROWS // Wo))
        for r0 in range(0, Ho, TR):
            tr = min(TR, Ho - r0)
            rows = tr * Wo

            # conv2: accumulate all taps for this chunk in registers
            acc = None
            for t in range(n_taps):
                if s == 1:
                    kh, kw = divmod(t, 3)
                    patch = out1p_ref[r0 + kh:r0 + kh + tr,
                                      PAD_W - 1 + kw:PAD_W - 1 + kw + W, :]
                else:
                    kh, which = divmod(t, 2)
                    a0 = r0 if kh == 0 else r0 + 1
                    b_idx = (s - 1) if kh == 0 else (kh - 1)
                    c0 = PADC if which == 0 else PADC - 1
                    patch = out1p_ref[a0:a0 + tr, b_idx, c0:c0 + Wo, :]
                d = jnp.dot(patch.reshape(rows, patch.shape[-1]), w2_ref[t],
                            preferred_element_type=jnp.float32)
                acc = d if acc is None else acc + d
            o2 = jnp.maximum(acc + b2_ref[...], 0.0).astype(jnp.bfloat16)

            # conv3 + BN + shortcut + ReLU for the same chunk
            m = jnp.dot(o2, w3_ref[...],
                        preferred_element_type=jnp.float32) + b3_ref[...]
            if has_proj:
                if s == 1:
                    xs = x_ref[0, r0:r0 + tr, :, :]
                else:
                    xs = x_ref[0, r0:r0 + tr, 0, :, :]   # rows s*r, cols packed
                m = (m + jnp.dot(xs.reshape(rows, cin_l), wsc_ref[...],
                                 preferred_element_type=jnp.float32)
                     + bsc_ref[...])
            else:
                xs = x_ref[0, r0:r0 + tr, :, :]
                m = m + xs.reshape(rows, cin_l).astype(jnp.float32)
            o_ref[0, r0:r0 + tr, :, :] = jnp.maximum(m, 0.0).reshape(
                tr, Wo, coutp).astype(o_ref.dtype)

    return kernel


# --------------------------------------------------------------- wrappers ---
def bottleneck_fused_nhwc(x, params, *, stride, has_proj):
    """x: (N, H, W, Cinp) bf16, channels already padded to a multiple of 128.
    Returns (N, Ho, Wo, Coutp) bf16 (padded output channels are zero)."""
    N, H, W, cinp = x.shape
    s = stride
    pp = params["w3"].shape[0]
    coutp = params["w3"].shape[1]

    if s == 1:
        Ho, Wo = H, W
        x_in = x
        x_spec = pl.BlockSpec((1, H, W, cinp), lambda b: (b, 0, 0, 0))
        scratch = pltpu.VMEM((H + 2, PAD_W + W + 1, pp), jnp.bfloat16)
    else:
        assert H % s == 0 and W % s == 0, "stride must divide H and W"
        Ho, Wo = H // s, W // s
        # free reshape: deinterleave rows/cols of x into (row%s, col%s) blocks
        x_in = x.reshape(N, Ho, s, Wo, s * cinp)
        x_spec = pl.BlockSpec((1, Ho, s, Wo, s * cinp),
                              lambda b: (b, 0, 0, 0, 0))
        scratch = pltpu.VMEM((Ho + 1, s, PADC + Wo, s * pp), jnp.bfloat16)

    kernel = _make_bottleneck_kernel(H, W, Ho, Wo, s, has_proj)

    def _w(shape):
        return pl.BlockSpec(shape, lambda b: (0,) * len(shape))

    in_specs = [x_spec,
                _w(params["w1"].shape), _w(params["b1"].shape),
                _w(params["w2"].shape), _w(params["b2"].shape),
                _w(params["w3"].shape), _w(params["b3"].shape)]
    args = [x_in, params["w1"], params["b1"], params["w2"], params["b2"],
            params["w3"], params["b3"]]
    if has_proj:
        in_specs += [_w(params["wsc"].shape), _w(params["bsc"].shape)]
        args += [params["wsc"], params["bsc"]]

    # advisory cost estimate
    k1, n1 = params["w1"].shape
    n_taps, k2, _ = params["w2"].shape
    macs = ((H * W * cinp // k1) * k1 * n1
            + Ho * Wo * n_taps * k2 * pp
            + Ho * Wo * pp * coutp
            + (Ho * Wo * params["wsc"].shape[0] * coutp if has_proj else 0))
    flops = int(2 * N * macs)
    bytes_accessed = int(sum(int(a.size) * a.dtype.itemsize for a in args)
                         + N * Ho * Wo * coutp * 2)

    return pl.pallas_call(
        kernel,
        out_shape=jax.ShapeDtypeStruct((N, Ho, Wo, coutp), jnp.bfloat16),
        grid=(N,),
        in_specs=in_specs,
        out_specs=pl.BlockSpec((1, Ho, Wo, coutp), lambda b: (b, 0, 0, 0)),
        scratch_shapes=[scratch],
        compiler_params=pltpu.CompilerParams(
            dimension_semantics=("parallel",)),
        cost_estimate=pl.CostEstimate(flops=flops, transcendentals=0,
                                      bytes_accessed=bytes_accessed),
    )(*args)


def bottleneck_pallas_nchw(x_nchw, params, *, stride, has_proj, cin, cout):
    """PyTorch-layout entry: NCHW f32 in -> NCHW f32 out."""
    cinp = _round_up(cin, LANES)
    x = jnp.transpose(x_nchw, (0, 2, 3, 1))                  # NHWC
    if cinp != cin:
        x = jnp.pad(x, ((0, 0), (0, 0), (0, 0), (0, cinp - cin)))
    out = bottleneck_fused_nhwc(x.astype(jnp.bfloat16), params,
                                stride=stride, has_proj=has_proj)
    out = out[..., :cout].astype(jnp.float32)
    return jnp.transpose(out, (0, 3, 1, 2))                  # back to NCHW


# ---------------------------------------------------- BN folding / packing ---
def fold_bn(gamma, beta, mean, var):
    scale = gamma / jnp.sqrt(var + EPS)
    return scale, beta - mean * scale


def _pad_to(a, shape):
    return jnp.pad(a, [(0, t - s) for s, t in zip(a.shape, shape)])


def prepare_params(raw, *, stride, has_proj):
    """Fold BN (eval running stats) into weights/bias, pad channels to
    multiples of 128, pack weights for the stride layout, cast to bf16."""
    s = stride
    planes, cin = raw["w1"].shape[0], raw["w1"].shape[1]
    cout = raw["w3"].shape[0]
    cinp, pp, coutp = (_round_up(c, LANES) for c in (cin, planes, cout))

    sc1, bi1 = fold_bn(*raw["bn1"])
    w1 = _pad_to(jnp.transpose(raw["w1"][:, :, 0, 0], (1, 0)) * sc1[None, :],
                 (cinp, pp))
    b1 = _pad_to(bi1[None, :], (1, pp))

    sc2, bi2 = fold_bn(*raw["bn2"])
    w2 = _pad_to(jnp.transpose(raw["w2"], (2, 3, 1, 0))
                 * sc2[None, None, None, :], (3, 3, pp, pp))
    b2 = _pad_to(bi2[None, :], (1, pp))

    sc3, bi3 = fold_bn(*raw["bn3"])
    w3 = _pad_to(jnp.transpose(raw["w3"][:, :, 0, 0], (1, 0)) * sc3[None, :],
                 (pp, coutp))
    b3 = _pad_to(bi3[None, :], (1, coutp))

    params = {"b2": b2, "w3": w3.astype(jnp.bfloat16), "b3": b3}
    if s == 1:
        params["w1"] = w1.astype(jnp.bfloat16)
        params["b1"] = b1
        params["w2"] = w2.reshape(9, pp, pp).astype(jnp.bfloat16)
    else:
        # conv1 on (col%s)-packed lanes: block-diagonal weight
        w1p = jnp.zeros((s * cinp, s * pp), w1.dtype)
        for j in range(s):
            w1p = w1p.at[j * cinp:(j + 1) * cinp, j * pp:(j + 1) * pp].set(w1)
        params["w1"] = w1p.astype(jnp.bfloat16)
        params["b1"] = jnp.tile(b1, (1, s))
        # conv2: 2 packed taps per kh: [kw=1 (lane block 0), kw=2 (block 1)]
        # and [kw=0 in lane block s-1] reading the left-shifted column pair.
        w2p = jnp.zeros((6, s * pp, pp), w2.dtype)
        for kh in range(3):
            w2p = w2p.at[2 * kh, 0:pp, :].set(w2[kh, 1])
            w2p = w2p.at[2 * kh, pp:2 * pp, :].set(w2[kh, 2])
            w2p = w2p.at[2 * kh + 1, (s - 1) * pp:s * pp, :].set(w2[kh, 0])
        params["w2"] = w2p.astype(jnp.bfloat16)

    if has_proj:
        scs, bis = fold_bn(*raw["bnsc"])
        wsc = _pad_to(jnp.transpose(raw["wsc"][:, :, 0, 0], (1, 0))
                      * scs[None, :], (cinp, coutp))
        if s != 1:
            wscp = jnp.zeros((s * cinp, coutp), wsc.dtype)
            wsc = wscp.at[0:cinp, :].set(wsc)
        params["wsc"] = wsc.astype(jnp.bfloat16)
        params["bsc"] = _pad_to(bis[None, :], (1, coutp))
    return params


# ------------------------------------------------------ pure-JAX reference ---
def _conv(x_nhwc, w_oihw, stride, pad):
    w = jnp.transpose(w_oihw, (2, 3, 1, 0))  # HWIO
    return jax.lax.conv_general_dilated(
        x_nhwc, w, (stride, stride), [(pad, pad), (pad, pad)],
        dimension_numbers=("NHWC", "HWIO", "NHWC"))


def _bn(x, gamma, beta, mean, var):
    return (x - mean) / jnp.sqrt(var + EPS) * gamma + beta


def bottleneck_ref(x_nchw, raw, stride, has_proj):
    x = jnp.transpose(x_nchw, (0, 2, 3, 1))
    o = jax.nn.relu(_bn(_conv(x, raw["w1"], 1, 0), *raw["bn1"]))
    o = jax.nn.relu(_bn(_conv(o, raw["w2"], stride, 1), *raw["bn2"]))
    o = _bn(_conv(o, raw["w3"], 1, 0), *raw["bn3"])
    sc = (_bn(_conv(x, raw["wsc"], stride, 0), *raw["bnsc"])
          if has_proj else x[:, ::stride, ::stride, :])
    return jnp.transpose(jax.nn.relu(o + sc), (0, 3, 1, 2))


# ------------------------------------------------------------------- main ---
def _bn_params(key, c):
    k1, k2, k3, k4 = jax.random.split(key, 4)
    gamma = 0.5 + jax.random.uniform(k1, (c,), jnp.float32)
    beta = 0.1 * jax.random.normal(k2, (c,), jnp.float32)
    mean = 0.1 * jax.random.normal(k3, (c,), jnp.float32)
    var = 0.5 + jax.random.uniform(k4, (c,), jnp.float32)
    return gamma, beta, mean, var


def _make_raw(key, in_planes, planes, expansion, has_proj):
    cout = expansion * planes
    ks = jax.random.split(key, 8)
    raw = {
        "w1": 0.2 * jax.random.normal(ks[0], (planes, in_planes, 1, 1), jnp.float32),
        "bn1": _bn_params(ks[1], planes),
        "w2": 0.2 * jax.random.normal(ks[2], (planes, planes, 3, 3), jnp.float32),
        "bn2": _bn_params(ks[3], planes),
        "w3": 0.2 * jax.random.normal(ks[4], (cout, planes, 1, 1), jnp.float32),
        "bn3": _bn_params(ks[5], cout),
    }
    if has_proj:
        raw["wsc"] = 0.2 * jax.random.normal(ks[6], (cout, in_planes, 1, 1),
                                             jnp.float32)
        raw["bnsc"] = _bn_params(ks[7], cout)
    return raw


if __name__ == "__main__":
    key = jax.random.PRNGKey(0)
    expansion = 4
    configs = [
        # (N, in_planes, planes, H, W, stride)
        (2, 4, 4, 16, 16, 1),    # projection shortcut, stride 1
        (2, 16, 4, 16, 16, 1),   # identity shortcut (in_planes == 4*planes)
        (2, 8, 4, 16, 16, 2),    # projection shortcut + spatial downsample
    ]
    for idx, (N, in_planes, planes, H, W, stride) in enumerate(configs):
        cfg_key = jax.random.fold_in(key, idx)
        cout = expansion * planes
        has_proj = (stride != 1) or (in_planes != cout)

        kp, kx = jax.random.split(cfg_key)
        raw = _make_raw(kp, in_planes, planes, expansion, has_proj)
        params = prepare_params(raw, stride=stride, has_proj=has_proj)

        x = jax.random.normal(kx, (N, in_planes, H, W), jnp.float32)
        # bf16-rounded input fed to both paths so the check isolates the
        # kernel's bf16-weight/activation + f32-accumulation error.
        x = x.astype(jnp.bfloat16).astype(jnp.float32)

        fwd = jax.jit(functools.partial(bottleneck_pallas_nchw,
                                        stride=stride, has_proj=has_proj,
                                        cin=in_planes, cout=cout))
        out = jax.block_until_ready(fwd(x, params))
        ref = jax.block_until_ready(bottleneck_ref(x, raw, stride, has_proj))
        np.testing.assert_allclose(np.asarray(out), np.asarray(ref),
                                   rtol=5e-2, atol=7e-2)
    print("KERNEL_OK")
</pallas_src>

<mosaic_0001>
module attributes {stable_mosaic.version = 11 : i64} {
  func.func @kernel(%arg0: i32, %arg1: memref<1x16x16x128xbf16, #tpu.memory_space<vmem>>, %arg2: memref<128x128xbf16, #tpu.memory_space<vmem>>, %arg3: memref<1x128xf32, #tpu.memory_space<vmem>>, %arg4: memref<9x128x128xbf16, #tpu.memory_space<vmem>>, %arg5: memref<1x128xf32, #tpu.memory_space<vmem>>, %arg6: memref<128x128xbf16, #tpu.memory_space<vmem>>, %arg7: memref<1x128xf32, #tpu.memory_space<vmem>>, %arg8: memref<128x128xbf16, #tpu.memory_space<vmem>>, %arg9: memref<1x128xf32, #tpu.memory_space<vmem>>, %arg10: memref<1x16x16x128xbf16, #tpu.memory_space<vmem>>, %arg11: memref<18x25x128xbf16, #tpu.memory_space<vmem>>) attributes {dimension_semantics = [#tpu.dimension_semantics<parallel>], iteration_bounds = array<i64: 2>, scalar_prefetch = 0 : i64, scratch_operands = 1 : i64, tpu.core_type = #tpu.core_type<tc>, window_params = [{transform_indices = @transform_0, window_bounds = array<i64: 1, 16, 16, 128>}, {pipeline_mode = #tpu.pipeline_mode<synchronous>, transform_indices = @transform_1, window_bounds = array<i64: 128, 128>}, {pipeline_mode = #tpu.pipeline_mode<synchronous>, transform_indices = @transform_2, window_bounds = array<i64: 1, 128>}, {pipeline_mode = #tpu.pipeline_mode<synchronous>, transform_indices = @transform_3, window_bounds = array<i64: 9, 128, 128>}, {pipeline_mode = #tpu.pipeline_mode<synchronous>, transform_indices = @transform_4, window_bounds = array<i64: 1, 128>}, {pipeline_mode = #tpu.pipeline_mode<synchronous>, transform_indices = @transform_5, window_bounds = array<i64: 128, 128>}, {pipeline_mode = #tpu.pipeline_mode<synchronous>, transform_indices = @transform_6, window_bounds = array<i64: 1, 128>}, {pipeline_mode = #tpu.pipeline_mode<synchronous>, transform_indices = @transform_7, window_bounds = array<i64: 128, 128>}, {pipeline_mode = #tpu.pipeline_mode<synchronous>, transform_indices = @transform_8, window_bounds = array<i64: 1, 128>}, {transform_indices = @transform_9, window_bounds = array<i64: 1, 16, 16, 128>}]} {
    %c0 = arith.constant 0 : index
    %c0_0 = arith.constant 0 : index
    %c0_1 = arith.constant 0 : index
    %c0_2 = arith.constant 0 : index
    %0 = vector.load %arg1[%c0, %c0_0, %c0_1, %c0_2] : memref<1x16x16x128xbf16, #tpu.memory_space<vmem>>, vector<1x16x16x128xbf16>
    %1 = vector.shape_cast %0 : vector<1x16x16x128xbf16> to vector<16x16x128xbf16>
    %2 = vector.shape_cast %1 : vector<16x16x128xbf16> to vector<256x128xbf16>
    %c0_3 = arith.constant 0 : index
    %c0_4 = arith.constant 0 : index
    %3 = vector.load %arg2[%c0_3, %c0_4] : memref<128x128xbf16, #tpu.memory_space<vmem>>, vector<128x128xbf16>
    %cst = arith.constant dense<0.000000e+00> : vector<256x128xf32>
    %4 = tpu.matmul %2, %3, %cst {dimension_numbers = #tpu.dot_dimension_numbers<[1], [0], [0], [1], [0, 0, 1, 1], [], []>} : vector<256x128xbf16>, vector<128x128xbf16>, vector<256x128xf32> -> vector<256x128xf32>
    %c0_5 = arith.constant 0 : index
    %c0_6 = arith.constant 0 : index
    %5 = vector.load %arg3[%c0_5, %c0_6] : memref<1x128xf32, #tpu.memory_space<vmem>>, vector<1x128xf32>
    %6 = vector.broadcast %5 : vector<1x128xf32> to vector<256x128xf32>
    %7 = arith.addf %4, %6 : vector<256x128xf32>
    %cst_7 = arith.constant 0.000000e+00 : f32
    %8 = vector.broadcast %cst_7 : f32 to vector<256x128xf32>
    %9 = arith.maximumf %7, %8 : vector<256x128xf32>
    %10 = arith.truncf %9 : vector<256x128xf32> to vector<256x128xbf16>
    %cst_8 = arith.constant 0.000000e+00 : bf16
    %11 = vector.broadcast %cst_8 : bf16 to vector<1x18x128xbf16>
    %c0_9 = arith.constant 0 : index
    %c7 = arith.constant 7 : index
    %c0_10 = arith.constant 0 : index
    %12 = vector.load %arg11[%c0_9, %c7, %c0_10] : memref<18x25x128xbf16, #tpu.memory_space<vmem>>, vector<1x18x128xbf16>
    tpu.vector_store %arg11[%c0_9, %c7, %c0_10], %11 {strides = array<i32>} : memref<18x25x128xbf16, #tpu.memory_space<vmem>>, vector<1x18x128xbf16>,
    %c17 = arith.constant 17 : index
    %c7_11 = arith.constant 7 : index
    %c0_12 = arith.constant 0 : index
    %13 = vector.load %arg11[%c17, %c7_11, %c0_12] : memref<18x25x128xbf16, #tpu.memory_space<vmem>>, vector<1x18x128xbf16>
    tpu.vector_store %arg11[%c17, %c7_11, %c0_12], %11 {strides = array<i32>} : memref<18x25x128xbf16, #tpu.memory_space<vmem>>, vector<1x18x128xbf16>,
    %cst_13 = arith.constant 0.000000e+00 : bf16
    %14 = vector.broadcast %cst_13 : bf16 to vector<16x1x128xbf16>
    %c1 = arith.constant 1 : index
    %c7_14 = arith.constant 7 : index
    %c0_15 = arith.constant 0 : index
    %15 = vector.load %arg11[%c1, %c7_14, %c0_15] : memref<18x25x128xbf16, #tpu.memory_space<vmem>>, vector<16x1x128xbf16>
    tpu.vector_store %arg11[%c1, %c7_14, %c0_15], %14 {strides = array<i32>} : memref<18x25x128xbf16, #tpu.memory_space<vmem>>, vector<16x1x128xbf16>,
    %c1_16 = arith.constant 1 : index
    %c24 = arith.constant 24 : index
    %c0_17 = arith.constant 0 : index
    %16 = vector.load %arg11[%c1_16, %c24, %c0_17] : memref<18x25x128xbf16, #tpu.memory_space<vmem>>, vector<16x1x128xbf16>
    tpu.vector_store %arg11[%c1_16, %c24, %c0_17], %14 {strides = array<i32>} : memref<18x25x128xbf16, #tpu.memory_space<vmem>>, vector<16x1x128xbf16>,
    %17 = vector.shape_cast %10 : vector<256x128xbf16> to vector<16x16x128xbf16>
    %c1_18 = arith.constant 1 : index
    %c8 = arith.constant 8 : index
    %c0_19 = arith.constant 0 : index
    %18 = vector.load %arg11[%c1_18, %c8, %c0_19] : memref<18x25x128xbf16, #tpu.memory_space<vmem>>, vector<16x16x128xbf16>
    tpu.vector_store %arg11[%c1_18, %c8, %c0_19], %17 {strides = array<i32>} : memref<18x25x128xbf16, #tpu.memory_space<vmem>>, vector<16x16x128xbf16>,
    %c0_20 = arith.constant 0 : index
    %c7_21 = arith.constant 7 : index
    %c0_22 = arith.constant 0 : index
    %19 = vector.load %arg11[%c0_20, %c7_21, %c0_22] : memref<18x25x128xbf16, #tpu.memory_space<vmem>>, vector<16x16x128xbf16>
    %20 = vector.shape_cast %19 : vector<16x16x128xbf16> to vector<256x128xbf16>
    %c0_23 = arith.constant 0 : index
    %c0_24 = arith.constant 0 : index
    %c0_25 = arith.constant 0 : index
    %21 = vector.load %arg4[%c0_23, %c0_24, %c0_25] : memref<9x128x128xbf16, #tpu.memory_space<vmem>>, vector<1x128x128xbf16>
    %22 = vector.shape_cast %21 : vector<1x128x128xbf16> to vector<128x128xbf16>
    %cst_26 = arith.constant dense<0.000000e+00> : vector<256x128xf32>
    %23 = tpu.matmul %20, %22, %cst_26 {dimension_numbers = #tpu.dot_dimension_numbers<[1], [0], [0], [1], [0, 0, 1, 1], [], []>} : vector<256x128xbf16>, vector<128x128xbf16>, vector<256x128xf32> -> vector<256x128xf32>
    %c0_27 = arith.constant 0 : index
    %c8_28 = arith.constant 8 : index
    %c0_29 = arith.constant 0 : index
    %24 = vector.load %arg11[%c0_27, %c8_28, %c0_29] : memref<18x25x128xbf16, #tpu.memory_space<vmem>>, vector<16x16x128xbf16>
    %25 = vector.shape_cast %24 : vector<16x16x128xbf16> to vector<256x128xbf16>
    %c1_30 = arith.constant 1 : index
    %c0_31 = arith.constant 0 : index
    %c0_32 = arith.constant 0 : index
    %26 = vector.load %arg4[%c1_30, %c0_31, %c0_32] : memref<9x128x128xbf16, #tpu.memory_space<vmem>>, vector<1x128x128xbf16>
    %27 = vector.shape_cast %26 : vector<1x128x128xbf16> to vector<128x128xbf16>
    %cst_33 = arith.constant dense<0.000000e+00> : vector<256x128xf32>
    %28 = tpu.matmul %25, %27, %cst_33 {dimension_numbers = #tpu.dot_dimension_numbers<[1], [0], [0], [1], [0, 0, 1, 1], [], []>} : vector<256x128xbf16>, vector<128x128xbf16>, vector<256x128xf32> -> vector<256x128xf32>
    %29 = arith.addf %23, %28 : vector<256x128xf32>
    %c0_34 = arith.constant 0 : index
    %c9 = arith.constant 9 : index
    %c0_35 = arith.constant 0 : index
    %30 = vector.load %arg11[%c0_34, %c9, %c0_35] : memref<18x25x128xbf16, #tpu.memory_space<vmem>>, vector<16x16x128xbf16>
    %31 = vector.shape_cast %30 : vector<16x16x128xbf16> to vector<256x128xbf16>
    %c2 = arith.constant 2 : index
    %c0_36 = arith.constant 0 : index
    %c0_37 = arith.constant 0 : index
    %32 = vector.load %arg4[%c2, %c0_36, %c0_37] : memref<9x128x128xbf16, #tpu.memory_space<vmem>>, vector<1x128x128xbf16>
    %33 = vector.shape_cast %32 : vector<1x128x128xbf16> to vector<128x128xbf16>
    %cst_38 = arith.constant dense<0.000000e+00> : vector<256x128xf32>
    %34 = tpu.matmul %31, %33, %cst_38 {dimension_numbers = #tpu.dot_dimension_numbers<[1], [0], [0], [1], [0, 0, 1, 1], [], []>} : vector<256x128xbf16>, vector<128x128xbf16>, vector<256x128xf32> -> vector<256x128xf32>
    %35 = arith.addf %29, %34 : vector<256x128xf32>
    %c1_39 = arith.constant 1 : index
    %c7_40 = arith.constant 7 : index
    %c0_41 = arith.constant 0 : index
    %36 = vector.load %arg11[%c1_39, %c7_40, %c0_41] : memref<18x25x128xbf16, #tpu.memory_space<vmem>>, vector<16x16x128xbf16>
    %37 = vector.shape_cast %36 : vector<16x16x128xbf16> to vector<256x128xbf16>
    %c3 = arith.constant 3 : index
    %c0_42 = arith.constant 0 : index
    %c0_43 = arith.constant 0 : index
    %38 = vector.load %arg4[%c3, %c0_42, %c0_43] : memref<9x128x128xbf16, #tpu.memory_space<vmem>>, vector<1x128x128xbf16>
    %39 = vector.shape_cast %38 : vector<1x128x128xbf16> to vector<128x128xbf16>
    %cst_44 = arith.constant dense<0.000000e+00> : vector<256x128xf32>
    %40 = tpu.matmul %37, %39, %cst_44 {dimension_numbers = #tpu.dot_dimension_numbers<[1], [0], [0], [1], [0, 0, 1, 1], [], []>} : vector<256x128xbf16>, vector<128x128xbf16>, vector<256x128xf32> -> vector<256x128xf32>
    %41 = arith.addf %35, %40 : vector<256x128xf32>
    %c1_45 = arith.constant 1 : index
    %c8_46 = arith.constant 8 : index
    %c0_47 = arith.constant 0 : index
    %42 = vector.load %arg11[%c1_45, %c8_46, %c0_47] : memref<18x25x128xbf16, #tpu.memory_space<vmem>>, vector<16x16x128xbf16>
    %43 = vector.shape_cast %42 : vector<16x16x128xbf16> to vector<256x128xbf16>
    %c4 = arith.constant 4 : index
    %c0_48 = arith.constant 0 : index
    %c0_49 = arith.constant 0 : index
    %44 = vector.load %arg4[%c4, %c0_48, %c0_49] : memref<9x128x128xbf16, #tpu.memory_space<vmem>>, vector<1x128x128xbf16>
    %45 = vector.shape_cast %44 : vector<1x128x128xbf16> to vector<128x128xbf16>
    %cst_50 = arith.constant dense<0.000000e+00> : vector<256x128xf32>
    %46 = tpu.matmul %43, %45, %cst_50 {dimension_numbers = #tpu.dot_dimension_numbers<[1], [0], [0], [1], [0, 0, 1, 1], [], []>} : vector<256x128xbf16>, vector<128x128xbf16>, vector<256x128xf32> -> vector<256x128xf32>
    %47 = arith.addf %41, %46 : vector<256x128xf32>
    %c1_51 = arith.constant 1 : index
    %c9_52 = arith.constant 9 : index
    %c0_53 = arith.constant 0 : index
    %48 = vector.load %arg11[%c1_51, %c9_52, %c0_53] : memref<18x25x128xbf16, #tpu.memory_space<vmem>>, vector<16x16x128xbf16>
    %49 = vector.shape_cast %48 : vector<16x16x128xbf16> to vector<256x128xbf16>
    %c5 = arith.constant 5 : index
    %c0_54 = arith.constant 0 : index
    %c0_55 = arith.constant 0 : index
    %50 = vector.load %arg4[%c5, %c0_54, %c0_55] : memref<9x128x128xbf16, #tpu.memory_space<vmem>>, vector<1x128x128xbf16>
    %51 = vector.shape_cast %50 : vector<1x128x128xbf16> to vector<128x128xbf16>
    %cst_56 = arith.constant dense<0.000000e+00> : vector<256x128xf32>
    %52 = tpu.matmul %49, %51, %cst_56 {dimension_numbers = #tpu.dot_dimension_numbers<[1], [0], [0], [1], [0, 0, 1, 1], [], []>} : vector<256x128xbf16>, vector<128x128xbf16>, vector<256x128xf32> -> vector<256x128xf32>
    %53 = arith.addf %47, %52 : vector<256x128xf32>
    %c2_57 = arith.constant 2 : index
    %c7_58 = arith.constant 7 : index
    %c0_59 = arith.constant 0 : index
    %54 = vector.load %arg11[%c2_57, %c7_58, %c0_59] : memref<18x25x128xbf16, #tpu.memory_space<vmem>>, vector<16x16x128xbf16>
    %55 = vector.shape_cast %54 : vector<16x16x128xbf16> to vector<256x128xbf16>
    %c6 = arith.constant 6 : index
    %c0_60 = arith.constant 0 : index
    %c0_61 = arith.constant 0 : index
    %56 = vector.load %arg4[%c6, %c0_60, %c0_61] : memref<9x128x128xbf16, #tpu.memory_space<vmem>>, vector<1x128x128xbf16>
    %57 = vector.shape_cast %56 : vector<1x128x128xbf16> to vector<128x128xbf16>
    %cst_62 = arith.constant dense<0.000000e+00> : vector<256x128xf32>
    %58 = tpu.matmul %55, %57, %cst_62 {dimension_numbers = #tpu.dot_dimension_numbers<[1], [0], [0], [1], [0, 0, 1, 1], [], []>} : vector<256x128xbf16>, vector<128x128xbf16>, vector<256x128xf32> -> vector<256x128xf32>
    %59 = arith.addf %53, %58 : vector<256x128xf32>
    %c2_63 = arith.constant 2 : index
    %c8_64 = arith.constant 8 : index
    %c0_65 = arith.constant 0 : index
    %60 = vector.load %arg11[%c2_63, %c8_64, %c0_65] : memref<18x25x128xbf16, #tpu.memory_space<vmem>>, vector<16x16x128xbf16>
    %61 = vector.shape_cast %60 : vector<16x16x128xbf16> to vector<256x128xbf16>
    %c7_66 = arith.constant 7 : index
    %c0_67 = arith.constant 0 : index
    %c0_68 = arith.constant 0 : index
    %62 = vector.load %arg4[%c7_66, %c0_67, %c0_68] : memref<9x128x128xbf16, #tpu.memory_space<vmem>>, vector<1x128x128xbf16>
    %63 = vector.shape_cast %62 : vector<1x128x128xbf16> to vector<128x128xbf16>
    %cst_69 = arith.constant dense<0.000000e+00> : vector<256x128xf32>
    %64 = tpu.matmul %61, %63, %cst_69 {dimension_numbers = #tpu.dot_dimension_numbers<[1], [0], [0], [1], [0, 0, 1, 1], [], []>} : vector<256x128xbf16>, vector<128x128xbf16>, vector<256x128xf32> -> vector<256x128xf32>
    %65 = arith.addf %59, %64 : vector<256x128xf32>
    %c2_70 = arith.constant 2 : index
    %c9_71 = arith.constant 9 : index
    %c0_72 = arith.constant 0 : index
    %66 = vector.load %arg11[%c2_70, %c9_71, %c0_72] : memref<18x25x128xbf16, #tpu.memory_space<vmem>>, vector<16x16x128xbf16>
    %67 = vector.shape_cast %66 : vector<16x16x128xbf16> to vector<256x128xbf16>
    %c8_73 = arith.constant 8 : index
    %c0_74 = arith.constant 0 : index
    %c0_75 = arith.constant 0 : index
    %68 = vector.load %arg4[%c8_73, %c0_74, %c0_75] : memref<9x128x128xbf16, #tpu.memory_space<vmem>>, vector<1x128x128xbf16>
    %69 = vector.shape_cast %68 : vector<1x128x128xbf16> to vector<128x128xbf16>
    %cst_76 = arith.constant dense<0.000000e+00> : vector<256x128xf32>
    %70 = tpu.matmul %67, %69, %cst_76 {dimension_numbers = #tpu.dot_dimension_numbers<[1], [0], [0], [1], [0, 0, 1, 1], [], []>} : vector<256x128xbf16>, vector<128x128xbf16>, vector<256x128xf32> -> vector<256x128xf32>
    %71 = arith.addf %65, %70 : vector<256x128xf32>
    %c0_77 = arith.constant 0 : index
    %c0_78 = arith.constant 0 : index
    %72 = vector.load %arg5[%c0_77, %c0_78] : memref<1x128xf32, #tpu.memory_space<vmem>>, vector<1x128xf32>
    %73 = vector.broadcast %72 : vector<1x128xf32> to vector<256x128xf32>
    %74 = arith.addf %71, %73 : vector<256x128xf32>
    %cst_79 = arith.constant 0.000000e+00 : f32
    %75 = vector.broadcast %cst_79 : f32 to vector<256x128xf32>
    %76 = arith.maximumf %74, %75 : vector<256x128xf32>
    %77 = arith.truncf %76 : vector<256x128xf32> to vector<256x128xbf16>
    %c0_80 = arith.constant 0 : index
    %c0_81 = arith.constant 0 : index
    %78 = vector.load %arg6[%c0_80, %c0_81] : memref<128x128xbf16, #tpu.memory_space<vmem>>, vector<128x128xbf16>
    %cst_82 = arith.constant dense<0.000000e+00> : vector<256x128xf32>
    %79 = tpu.matmul %77, %78, %cst_82 {dimension_numbers = #tpu.dot_dimension_numbers<[1], [0], [0], [1], [0, 0, 1, 1], [], []>} : vector<256x128xbf16>, vector<128x128xbf16>, vector<256x128xf32> -> vector<256x128xf32>
    %c0_83 = arith.constant 0 : index
    %c0_84 = arith.constant 0 : index
    %80 = vector.load %arg7[%c0_83, %c0_84] : memref<1x128xf32, #tpu.memory_space<vmem>>, vector<1x128xf32>
    %81 = vector.broadcast %80 : vector<1x128xf32> to vector<256x128xf32>
    %82 = arith.addf %79, %81 : vector<256x128xf32>
    %c0_85 = arith.constant 0 : index
    %c0_86 = arith.constant 0 : index
    %c0_87 = arith.constant 0 : index
    %c0_88 = arith.constant 0 : index
    %83 = vector.load %arg1[%c0_85, %c0_86, %c0_87, %c0_88] : memref<1x16x16x128xbf16, #tpu.memory_space<vmem>>, vector<1x16x16x128xbf16>
    %84 = vector.shape_cast %83 : vector<1x16x16x128xbf16> to vector<16x16x128xbf16>
    %85 = vector.shape_cast %84 : vector<16x16x128xbf16> to vector<256x128xbf16>
    %c0_89 = arith.constant 0 : index
    %c0_90 = arith.constant 0 : index
    %86 = vector.load %arg8[%c0_89, %c0_90] : memref<128x128xbf16, #tpu.memory_space<vmem>>, vector<128x128xbf16>
    %cst_91 = arith.constant dense<0.000000e+00> : vector<256x128xf32>
    %87 = tpu.matmul %85, %86, %cst_91 {dimension_numbers = #tpu.dot_dimension_numbers<[1], [0], [0], [1], [0, 0, 1, 1], [], []>} : vector<256x128xbf16>, vector<128x128xbf16>, vector<256x128xf32> -> vector<256x128xf32>
    %88 = arith.addf %82, %87 : vector<256x128xf32>
    %c0_92 = arith.constant 0 : index
    %c0_93 = arith.constant 0 : index
    %89 = vector.load %arg9[%c0_92, %c0_93] : memref<1x128xf32, #tpu.memory_space<vmem>>, vector<1x128xf32>
    %90 = vector.broadcast %89 : vector<1x128xf32> to vector<256x128xf32>
    %91 = arith.addf %88, %90 : vector<256x128xf32>
    %cst_94 = arith.constant 0.000000e+00 : f32
    %92 = vector.broadcast %cst_94 : f32 to vector<256x128xf32>
    %93 = arith.maximumf %91, %92 : vector<256x128xf32>
    %94 = vector.shape_cast %93 : vector<256x128xf32> to vector<16x16x128xf32>
    %95 = arith.truncf %94 : vector<16x16x128xf32> to vector<16x16x128xbf16>
    %c0_95 = arith.constant 0 : index
    %c0_96 = arith.constant 0 : index
    %c0_97 = arith.constant 0 : index
    %c0_98 = arith.constant 0 : index
    %96 = vector.load %arg10[%c0_95, %c0_96, %c0_97, %c0_98] : memref<1x16x16x128xbf16, #tpu.memory_space<vmem>>, vector<1x16x16x128xbf16>
    %97 = vector.shape_cast %96 : vector<1x16x16x128xbf16> to vector<16x16x128xbf16>
    %98 = vector.shape_cast %95 : vector<16x16x128xbf16> to vector<1x16x16x128xbf16>
    tpu.vector_store %arg10[%c0_95, %c0_96, %c0_97, %c0_98], %98 {strides = array<i32>} : memref<1x16x16x128xbf16, #tpu.memory_space<vmem>>, vector<1x16x16x128xbf16>,
    return
  }
  func.func @transform_0(%arg0: i32) -> (i32, i32, i32, i32) {
    %c0_i32 = arith.constant 0 : i32
    %c0_i32_0 = arith.constant 0 : i32
    %c0_i32_1 = arith.constant 0 : i32
    %c0_i32_2 = arith.constant 0 : i32
    return %arg0, %c0_i32, %c0_i32_0, %c0_i32_1 : i32, i32, i32, i32
  }
  func.func @transform_1(%arg0: i32) -> (i32, i32) {
    %c0_i32 = arith.constant 0 : i32
    %c0_i32_0 = arith.constant 0 : i32
    %c0_i32_1 = arith.constant 0 : i32
    return %c0_i32, %c0_i32_0 : i32, i32
  }
  func.func @transform_2(%arg0: i32) -> (i32, i32) {
    %c0_i32 = arith.constant 0 : i32
    %c0_i32_0 = arith.constant 0 : i32
    %c0_i32_1 = arith.constant 0 : i32
    return %c0_i32, %c0_i32_0 : i32, i32
  }
  func.func @transform_3(%arg0: i32) -> (i32, i32, i32) {
    %c0_i32 = arith.constant 0 : i32
    %c0_i32_0 = arith.constant 0 : i32
    %c0_i32_1 = arith.constant 0 : i32
    %c0_i32_2 = arith.constant 0 : i32
    return %c0_i32, %c0_i32_0, %c0_i32_1 : i32, i32, i32
  }
  func.func @transform_4(%arg0: i32) -> (i32, i32) {
    %c0_i32 = arith.constant 0 : i32
    %c0_i32_0 = arith.constant 0 : i32
    %c0_i32_1 = arith.constant 0 : i32
    return %c0_i32, %c0_i32_0 : i32, i32
  }
  func.func @transform_5(%arg0: i32) -> (i32, i32) {
    %c0_i32 = arith.constant 0 : i32
    %c0_i32_0 = arith.constant 0 : i32
    %c0_i32_1 = arith.constant 0 : i32
    return %c0_i32, %c0_i32_0 : i32, i32
  }
  func.func @transform_6(%arg0: i32) -> (i32, i32) {
    %c0_i32 = arith.constant 0 : i32
    %c0_i32_0 = arith.constant 0 : i32
    %c0_i32_1 = arith.constant 0 : i32
    return %c0_i32, %c0_i32_0 : i32, i32
  }
  func.func @transform_7(%arg0: i32) -> (i32, i32) {
    %c0_i32 = arith.constant 0 : i32
    %c0_i32_0 = arith.constant 0 : i32
    %c0_i32_1 = arith.constant 0 : i32
    return %c0_i32, %c0_i32_0 : i32, i32
  }
  func.func @transform_8(%arg0: i32) -> (i32, i32) {
    %c0_i32 = arith.constant 0 : i32
    %c0_i32_0 = arith.constant 0 : i32
    %c0_i32_1 = arith.constant 0 : i32
    return %c0_i32, %c0_i32_0 : i32, i32
  }
  func.func @transform_9(%arg0: i32) -> (i32, i32, i32, i32) {
    %c0_i32 = arith.constant 0 : i32
    %c0_i32_0 = arith.constant 0 : i32
    %c0_i32_1 = arith.constant 0 : i32
    %c0_i32_2 = arith.constant 0 : i32
    return %arg0, %c0_i32, %c0_i32_0, %c0_i32_1 : i32, i32, i32, i32
  }
}

</mosaic_0001>

<bundles_post_ra>
// kernel: bottleneck_pallas_nchw.1
= control target key start
LH: loop header
LB: loop body
LE: loop exit
PB: predicated region body
PF: predicated region fallthrough
CT: control target
= control target key end

     0   :  { %s7597_s30 = smov 0   ;;  %s9408_s0 = inlined_call_operand.vmem [shape: bf16[2,16,16,128], index: 0, kind: input, shape index: {}]   ;;  %s9409_s1 = inlined_call_operand.vmem [shape: bf16[128,128], index: 1, kind: input, shape index: {}]   ;;  %s9410_s2 = inlined_call_operand.vmem [shape: f32[1,128], index: 2, kind: input, shape index: {}]   ;;  %s9411_s3 = inlined_call_operand.vmem [shape: bf16[9,128,128], index: 3, kind: input, shape index: {}]   ;;  %s9412_s4 = inlined_call_operand.vmem [shape: f32[1,128], index: 4, kind: input, shape index: {}]   ;;  %s9413_s5 = inlined_call_operand.vmem [shape: bf16[128,128], index: 5, kind: input, shape index: {}]   ;;  %s9414_s6 = inlined_call_operand.vmem [shape: f32[1,128], index: 6, kind: input, shape index: {}]   ;;  %s9415_s7 = inlined_call_operand.vmem [shape: bf16[128,128], index: 7, kind: input, shape index: {}]   ;;  %s9416_s8 = inlined_call_operand.vmem [shape: f32[1,128], index: 8, kind: input, shape index: {}]   ;;  %s9417_s9 = inlined_call_operand.vmem [shape: bf16[2,16,16,128], index: 9, kind: output, shape index: {}]  }
   0x1 LB: > { %s6359_s10 = sadd.s32 4294967295, %s7544_s30   ;;  %p6363_p0 = scmp.ge.s32.totalorder %s7544_s30, 1  ;;  %s7544_s30 = sphi %s7597_s30, %s19_s30  }
   0x2   : > { %p287_p1 = scmp.lt.s32.totalorder %s7544_s30, 3 }
   0x4   : > { %p288_p2 = pnand %p6363_p0, %p287_p1 }
   0x6   : > { %291 = sbr.rel (%p288_p2) target bundleno = 1220 (0x4c4), region = 56 }
   0xb   : > { %v7275_v0 = vld [vmem:[%s9409_s1 + $0x38] sm:$0xff]  ;;  %v7274_v1 = vld [vmem:[%s9409_s1 + $0x30] sm:$0xff]  ;;  %v7273_v2 = vld [vmem:[%s9409_s1 + $0x28] sm:$0xff]  ;;  %p323_p3 = scmp.lt.s32.totalorder %s6359_s10, 1  ;;  %vm683_vm0 = vcmask 1043459   ;;  %v9421_v26 = vmov 0 }
   0xc   : > { %530 = vmatpush.bf16.msra.mxu0 %v7275_v0  ;;  %v7272_v3 = vld [vmem:[%s9409_s1 + $0x20] sm:$0xff]  ;;  %v7271_v4 = vld [vmem:[%s9409_s1 + $0x18] sm:$0xff]  ;;  %v7270_v5 = vld [vmem:[%s9409_s1 + $0x10] sm:$0xff]  ;;  %vm684_vm1 = vsmask.f32 7950  ;;  %v7546_v29 = vmov 0  }
   0xd   : > { %s9475_s10 = smov (!%p323_p3, %s6359_s10), 1  ;;  %v7269_v6 = vld [vmem:[%s9409_s1 + $0x8] sm:$0xff]  ;;  %v7268_v7 = vld [vmem:[%s9409_s1] sm:$0xff]  ;;  %v7299_v12 = vld [vmem:[%s9411_s3 + $0x38] sm:$0xff]  ;;  %689 = vst [vmem:[#allocation2 + $0x4] sm:$0xf] %v7546_v29 }
   0xe   : > { %s7250_s25 = sshll.u32 %s9475_s10, 7  ;;  %v7315_v13 = vld [vmem:[%s9411_s3 + $0xb8] sm:$0xff]  ;;  %1615 = vmatpush.bf16.msra.mxu2 %v7299_v12  ;;  %v7298_v15 = vld [vmem:[%s9411_s3 + $0x30] sm:$0xff]  ;;  %v7297_v18 = vld [vmem:[%s9411_s3 + $0x28] sm:$0xff]  ;;  %vm692_vm3 = vsmask.f32 256 }
   0xf   : > { %s7637_s11 = scalar_lea.vmem %s9408_s0, %s7250_s25  ;;  %v7307_v14 = vld [vmem:[%s9411_s3 + $0x78] sm:$0xff]  ;;  %2268 = vmatpush.bf16.msra.mxu3 %v7315_v13  ;;  %v7314_v16 = vld [vmem:[%s9411_s3 + $0xb0] sm:$0xff]  ;;  %v7313_v20 = vld [vmem:[%s9411_s3 + $0xa8] sm:$0xff]  ;;  %vm691_vm4 = vcmask 1040384   ;;  %v9424_v31 = vmov 0  ;;  %s9277_s15 = scalar_lea.vmem %s9417_s9, %s7250_s25 }
  0x10   : > { %531 = vmatpush.bf16.msra.mxu0 %v7274_v1  ;;  %v7252_v8 = vld [vmem:[%s7637_s11] sm:$0xff]  ;;  %v7253_v9 = vld [vmem:[%s7637_s11 + $0x8] sm:$0xff]  ;;  %v7254_v10 = vld [vmem:[%s7637_s11 + $0x10] sm:$0xff]  ;;  %1414 = vmatpush.bf16.msra.mxu1 %v7307_v14  ;;  %690 = vst [vmem:[#allocation2 + $0x8] sm:$0xf] %v7546_v29 }
  0x11   : > { %v7255_v11 = vld [vmem:[%s7637_s11 + $0x18] sm:$0xff]  ;;  %v7256_v17 = vld [vmem:[%s7637_s11 + $0x20] sm:$0xff]  ;;  %v7306_v19 = vld [vmem:[%s9411_s3 + $0x70] sm:$0xff]  ;;  %701 = vst [vmem:[#allocation2 + $0x114] sm:$0xf] %v7546_v29 }
  0x12   : > { %1616 = vmatpush.bf16.msra.mxu2 %v7298_v15  ;;  %v7296_v21 = vld [vmem:[%s9411_s3 + $0x20] sm:$0xff]  ;;  %v7305_v22 = vld [vmem:[%s9411_s3 + $0x68] sm:$0xff]  ;;  %v7295_v24 = vld [vmem:[%s9411_s3 + $0x18] sm:$0xff]  ;;  %702 = vst [vmem:[#allocation2 + $0x118] sm:$0xf] %v7546_v29 }
  0x13   : > { %2269 = vmatpush.bf16.msra.mxu3 %v7314_v16  ;;  %v7312_v23 = vld [vmem:[%s9411_s3 + $0xa0] sm:$0xff]  ;;  %vm7683_vm2 = vmand %vm683_vm0, %vm684_vm1  ;;  %v7311_v30 = vld [vmem:[%s9411_s3 + $0x98] sm:$0xff]  ;;  %vm883_vm6 = vsmask.f32 4368  ;;  %vm1752_vm8 = vsmask.f32 3328 }
  0x14   : > { %532 = vmatpush.bf16.msra.mxu0 %v7273_v2  ;;  %1415 = vmatpush.bf16.msra.mxu1 %v7306_v19  ;;  %v7304_v25 = vld [vmem:[%s9411_s3 + $0x60] sm:$0xff]  ;;  %v9422_v26 = vsel %vm7683_vm2, 4294967295, %v9421_v26  ;;  %vm7693_vm5 = vmand %vm691_vm4, %vm692_vm3  ;;  %v694_v32 = vld [vmem:[#allocation2 + $0xc] sm:$0x1]  ;;  %vm1753_vm9 = vsmask.f32 7440 }
  0x15   : > { %9423 = vst [vmem:[#allocation3_spill] sm:$0xff] %v9422_v26  ;;  %v686_v27 = vld [vmem:[#allocation2] sm:$0x8]  ;;  %v9425_v31 = vsel %vm7693_vm5, 4294967295, %v9424_v31  ;;  %v695_v33 = vsel %vm7693_vm5, 0, %v694_v32  ;;  %v7294_v34 = vld [vmem:[%s9411_s3 + $0x10] sm:$0xff]  ;;  %vm7728_vm7 = vmor %vm692_vm3, %vm883_vm6 }
  0x16   : > { %1617 = vmatpush.bf16.msra.mxu2 %v7297_v18  ;;  %v687_v28 = vsel %vm7683_vm2, 0, %v686_v27  ;;  %9426 = vst [vmem:[#allocation4_spill] sm:$0xff] %v9425_v31  ;;  %v7303_v35 = vld [vmem:[%s9411_s3 + $0x58] sm:$0xff]  ;;  %v7310_v36 = vld [vmem:[%s9411_s3 + $0x90] sm:$0xff]  ;;  %v7257_v37 = vld [vmem:[%s7637_s11 + $0x28] sm:$0xff] }
  0x17   : > { %2270 = vmatpush.bf16.msra.mxu3 %v7313_v20  ;;  %688 = vst [vmem:[#allocation2] sm:$0x8] %v687_v28  ;;  %v836_v38 = vld [vmem:[#allocation2 + $0x4] sm:$0xf]  ;;  %v7293_v43 = vld [vmem:[%s9411_s3 + $0x8] sm:$0xff]  ;;  %v7302_v53 = vld [vmem:[%s9411_s3 + $0x50] sm:$0xff] }
  0x18   : > { %533 = vmatpush.bf16.msra.mxu0 %v7272_v3  ;;  %1416 = vmatpush.bf16.msra.mxu1 %v7305_v22  ;;  %696 = vst [vmem:[#allocation2 + $0xc] sm:$0x1] %v695_v33  ;;  %v1704_v39 = vld [vmem:[#allocation2 + $0x4] sm:$0xf]  ;;  %v891_v41 = vshrl.u32 %v836_v38, 16  ;;  %v894_v46 = vshll.u32 %v836_v38, 16  ;;  %vm7737_vm10 = vmor %vm1752_vm8, %vm1753_vm9 }
  0x19   : > { %v1756_v42 = vshrl.u32 %v1704_v39, 16  ;;  %v837_v44 = vld [vmem:[#allocation2 + $0x8] sm:$0xf]  ;;  %v1759_v47 = vshll.u32 %v1704_v39, 16  ;;  %v7292_v55 = vld [vmem:[%s9411_s3] sm:$0xff]  ;;  %v7339_v27 = vld [vmem:[%s9411_s3 + $0xf8] sm:$0xff] }
  0x1a   : > { %1618 = vmatpush.bf16.msra.mxu2 %v7296_v21  ;;  %v893_v48 = vrot.slane %v891_v41, 7  ;;  %v900_v49 = vshrl.u32 %v837_v44, 16  ;;  %v903_v50 = vshll.u32 %v837_v44, 16  ;;  %v1705_v51 = vld [vmem:[#allocation2 + $0x8] sm:$0xf]  ;;  %v7308_v58 = vld [vmem:[%s9411_s3 + $0x80] sm:$0xff] }
  0x1b   : > { %2271 = vmatpush.bf16.msra.mxu3 %v7312_v23  ;;  %v1758_v52 = vrot.slane %v1756_v42, 4  ;;  %v7309_v54 = vld [vmem:[%s9411_s3 + $0x88] sm:$0xff]  ;;  %v1761_v0 = vrot.slane %v1759_v47, 5  ;;  %v1765_v1 = vshll.u32 %v1705_v51, 16  ;;  %v7300_v14 = vld [vmem:[%s9411_s3 + $0x40] sm:$0xff]  ;;  %v7258_v23 = vld [vmem:[%s7637_s11 + $0x30] sm:$0xff] }
  0x1c   : > { %534 = vmatpush.bf16.msra.mxu0 %v7271_v4  ;;  %1417 = vmatpush.bf16.msra.mxu1 %v7304_v25  ;;  %v7301_v57 = vld [vmem:[%s9411_s3 + $0x48] sm:$0xff]  ;;  %v896_v60 = vor.u32 %v894_v46, %v893_v48  ;;  %v898_v61 = vrot.slane %v893_v48, 4  ;;  %v902_v62 = vrot.slane %v900_v49, 7  ;;  %v1769_v4 = vshrl.u32 %v1705_v51, 16  ;;  %v707_v28 = vld [vmem:[#allocation2 + $0x10] sm:$0x8] }
  0x1d   : > { %v7276_v22 = vld [vmem:[#allocation2 + $0x4] sm:$0xff]  ;;  %v708_v29 = vsel %vm7683_vm2, 0, %v707_v28  ;;  %v7347_v32 = vld [vmem:[%s9411_s3 + $0x138] sm:$0xff]  ;;  %v758_v41 = vld [vmem:[#allocation2 + $0x2c] sm:$0x1] }
  0x1e   : > { %1619 = vmatpush.bf16.msra.mxu2 %v7295_v24  ;;  %v835_v40 = vld [vmem:[#allocation2] sm:$0x8]  ;;  %v905_v3 = vor.u32 %v903_v50, %v902_v62  ;;  %709 = vst [vmem:[#allocation2 + $0x10] sm:$0x8] %v708_v29  ;;  %v755_v33 = vld [vmem:[#allocation2 + $0x1c] sm:$0x1] }
  0x1f   : > { %2272 = vmatpush.bf16.msra.mxu3 %v7311_v30  ;;  %v886_v45 = vshrl.u32 %v835_v40, 16  ;;  %v1706_v63 = vld [vmem:[#allocation2 + $0xc] sm:$0x1]  ;;  %v7259_v30 = vld [vmem:[%s7637_s11 + $0x38] sm:$0xff]  ;;  %v7260_v38 = vld [vmem:[%s7637_s11 + $0x40] sm:$0xff]  ;;  %v759_v42 = vsel %vm7693_vm5, 0, %v758_v41 }
  0x20   : > { %535 = vmatpush.bf16.msra.mxu0 %v7270_v5  ;;  %1418 = vmatpush.bf16.msra.mxu1 %v7303_v35  ;;  %v1775_v5 = vshll.u32 %v1706_v63, 16  ;;  %v710_v35 = vld [vmem:[#allocation2 + $0x20] sm:$0x8]  ;;  %760 = vst [vmem:[#allocation2 + $0x2c] sm:$0x1] %v759_v42 }
  0x21   : > { %v6464_v56 = vrot.slane %v886_v45, 11  ;;  %v7338_v45 = vld [vmem:[%s9411_s3 + $0xf0] sm:$0xff] }
  0x22   : > { %1620 = vmatpush.bf16.msra.mxu2 %v7294_v34  ;;  %v1777_v16 = vrot.slane %v1775_v5, 5  ;;  %v756_v34 = vsel %vm7693_vm5, 0, %v755_v33  ;;  %v713_v47 = vld [vmem:[#allocation2 + $0x30] sm:$0x8] }
  0x23   : > { %2273 = vmatpush.bf16.msra.mxu3 %v7310_v36  ;;  %v897_v2 = vsel %vm7728_vm7, %v6464_v56, %v896_v60  ;;  %757 = vst [vmem:[#allocation2 + $0x1c] sm:$0x1] %v756_v34  ;;  %v711_v36 = vsel %vm7683_vm2, 0, %v710_v35  ;;  %v714_v49 = vsel %vm7683_vm2, 0, %v713_v47  ;;  %v7262_v47 = vld [vmem:[%s7637_s11 + $0x50] sm:$0xff] }
  0x24   : > { %536 = vmatpush.bf16.msra.mxu0 %v7269_v6  ;;  %1419 = vmatpush.bf16.msra.mxu1 %v7302_v53  ;;  %v1503_v6 = vunpack.c.l.b16 %v897_v2  ;;  %712 = vst [vmem:[#allocation2 + $0x20] sm:$0x8] %v711_v36 }
  0x25   : > { %715 = vst [vmem:[#allocation2 + $0x30] sm:$0x8] %v714_v49 }
  0x26   : > { %1621 = vmatpush.bf16.msra.mxu2 %v7293_v43 }
  0x27   : > { %2274 = vmatpush.bf16.msra.mxu3 %v7309_v54 }
  0x28   : > { %537 = vmatpush.bf16.msra.mxu0 %v7268_v7  ;;  %v1762_v7 = vor.u32 %v1761_v0, %v1758_v52  ;;  %1420 = vmatpush.bf16.msra.mxu1 %v7301_v57  ;;  %v838_v52 = vld [vmem:[#allocation2 + $0x10] sm:$0x8] }
  0x29   : > { %v908_v63 = vshrl.u32 %v838_v52, 16 }
  0x2a   : > { %1622 = vmatpush.bf16.msra.mxu2 %v7292_v55  ;;  %v1763_v13 = vrot.slane %v1762_v7, 4  ;;  %v7261_v55 = vld [vmem:[%s7637_s11 + $0x48] sm:$0xff] }
  0x2b   : > { %538 = vmatmul.bf16.vlgmr.msra.gmra.mxu0 %v7252_v8  ;;  %v1767_v8 = vrot.slane %v1765_v1, 5  ;;  %2275 = vmatpush.bf16.msra.mxu3 %v7308_v58  ;;  %v761_v1 = vld [vmem:[#allocation2 + $0x3c] sm:$0x1] }
  0x2c   : > { %1421 = vmatpush.bf16.msra.mxu1 %v7300_v14  ;;  %2918 = vmatpush.bf16.msrb.mxu0 %v7339_v27  ;;  %v762_v7 = vsel %vm7693_vm5, 0, %v761_v1 }
  0x2d   : > { %v1768_v18 = vsel %vm7737_vm10, %v1763_v13, %v1767_v8  ;;  %763 = vst [vmem:[#allocation2 + $0x3c] sm:$0x1] %v762_v7 }
  0x2e   : > { %v2156_v20 = vunpack.c.l.b16 %v1768_v18 }
  0x2f   : > { %1422 = vmatmul.bf16.vlgmr.msra.gmra.mxu1 %v7276_v22  ;;  %v716_v22 = vld [vmem:[#allocation2 + $0x40] sm:$0x8] }
  0x30   : > { %3200 = vmatpush.bf16.msrb.mxu1 %v7347_v32  ;;  %2919 = vmatpush.bf16.msrb.mxu0 %v7338_v45  ;;  %v717_v32 = vsel %vm7683_vm2, 0, %v716_v22 }
  0x31   : > { %718 = vst [vmem:[#allocation2 + $0x40] sm:$0x8] %v717_v32 }
  0x3b   : > { %543 = vmatmul.bf16.gmra.mxu0 %v7253_v9  ;;  %v906_v9 = vsel %vm7728_vm7, %v898_v61, %v905_v3  ;;  %v7346_v61 = vld [vmem:[%s9411_s3 + $0x130] sm:$0xff]  ;;  %v1709_v3 = vld [vmem:[#allocation2 + $0x1c] sm:$0x1] }
  0x3c   : > { %v1504_v12 = vunpack.c.l.b16 %v906_v9  ;;  %3201 = vmatpush.bf16.msrb.mxu1 %v7346_v61  ;;  %v6465_v9 = vrot.slane %v908_v63, 11  ;;  %v764_v61 = vld [vmem:[#allocation2 + $0x4c] sm:$0x1] }
  0x3d   : > { %v1712_v63 = vld [vmem:[#allocation2 + $0x2c] sm:$0x1] }
  0x4b   : > { %548 = vmatmul.bf16.gmra.mxu0 %v7254_v10 }
  0x5b   : > { %553 = vmatmul.bf16.gmra.mxu0 %v7255_v11  ;;  %v1771_v11 = vrot.slane %v1769_v4, 4 }
  0x5d   : > { %v1772_v15 = vor.u32 %v1771_v11, %v1767_v8 }
  0x5f   : > { %v1773_v19 = vrot.slane %v1772_v15, 4  ;;  %v1799_v15 = vshll.u32 %v1709_v3, 16  ;;  %v765_v3 = vsel %vm7693_vm5, 0, %v764_v61  ;;  %v1715_v61 = vld [vmem:[#allocation2 + $0x3c] sm:$0x1] }
  0x60   : > { %766 = vst [vmem:[#allocation2 + $0x4c] sm:$0x1] %v765_v3 }
  0x61   : > { %v1778_v21 = vsel %vm7737_vm10, %v1773_v19, %v1777_v16 }
  0x62   : > { %v2157_v24 = vunpack.c.l.b16 %v1778_v21 }
  0x64   : > { %v2188_v25 = vpack.c.b16 %v2157_v24, %v2156_v20 }
  0x66   : > { %2276 = vmatmul.bf16.vlgmr.msra.gmra.mxu3 %v2188_v25 }
  0x6b   : > { %558 = vmatmul.bf16.gmra.mxu0 %v7256_v17  ;;  %v1535_v17 = vpack.c.b16 %v1504_v12, %v1503_v6 }
  0x6d   : > { %1623 = vmatmul.bf16.vlgmr.msra.gmra.mxu2 %v1535_v17 }
  0x7b   : > { %563 = vmatmul.bf16.gmra.mxu0 %v7257_v37  ;;  %v7765_v37 = vld [vmem:[%s9410_s2] ss:$0 sm:$0xff] }
  0x8b   : > { %568 = vmatmul.bf16.gmra.mxu0 %v7258_v23 }
  0x9b   : > { %573 = vmatmul.bf16.gmra.mxu0 %v7259_v30  ;;  %v1801_v30 = vrot.slane %v1799_v15, 5 }
  0xa8   : > { %v539_v39 = vpop.f32.mrf.mxu0 }
  0xa9   : > { %v540_v40 = vadd.f32 %v7765_v37, %v539_v39 }
  0xab   : > { %v619_v43 = vmax.f32 %v540_v40, 0.0  ;;  %578 = vmatmul.bf16.gmra.mxu0 %v7260_v38 }
  0xad   : > { %v651_v44 = vpack.c.bf16 %v619_v43, %v619_v43 }
  0xaf   : > { %803 = vst [vmem:[#allocation2 + $0x14] sm:$0xf] %v651_v44  ;;  %v841_v44 = vld [vmem:[#allocation2 + $0x20] sm:$0x8] }
  0xb0   : > { %v541_v46 = vpop.f32.mrf.mxu0 }
  0xb1   : > { %v542_v48 = vadd.f32 %v7765_v37, %v541_v46 }
  0xb3   : > { %v620_v50 = vmax.f32 %v542_v48, 0.0 }
  0xb5   : > { %v652_v51 = vpack.c.bf16 %v620_v50, %v620_v50 }
  0xb6   : > { %v839_v53 = vld [vmem:[#allocation2 + $0x14] sm:$0xf] }
  0xb7   : > { %v1707_v54 = vld [vmem:[#allocation2 + $0x14] sm:$0xf]  ;;  %804 = vst [vmem:[#allocation2 + $0x18] sm:$0xf] %v652_v51  ;;  %v913_v56 = vshrl.u32 %v839_v53, 16  ;;  %v916_v6 = vshll.u32 %v839_v53, 16 }
  0xb8   : > { %v1780_v57 = vshrl.u32 %v1707_v54, 16  ;;  %v1783_v58 = vshll.u32 %v1707_v54, 16  ;;  %v544_v60 = vpop.f32.mrf.mxu0 }
  0xb9   : > { %v545_v62 = vadd.f32 %v7765_v37, %v544_v60  ;;  %v915_v0 = vrot.slane %v913_v56, 7 }
  0xba   : > { %v1782_v4 = vrot.slane %v1780_v57, 4  ;;  %v1785_v5 = vrot.slane %v1783_v58, 5  ;;  %v930_v57 = vshrl.u32 %v841_v44, 16  ;;  %v7263_v44 = vld [vmem:[%s7637_s11 + $0x58] sm:$0xff] }
  0xbb   : > { %v621_v2 = vmax.f32 %v545_v62, 0.0  ;;  %583 = vmatmul.bf16.gmra.mxu0 %v7261_v55  ;;  %v918_v13 = vor.u32 %v916_v6, %v915_v0  ;;  %v920_v29 = vrot.slane %v915_v0, 4 }
  0xbc   : > { %v1786_v17 = vor.u32 %v1785_v5, %v1782_v4  ;;  %v6466_v5 = vrot.slane %v930_v57, 11 }
  0xbd   : > { %v653_v8 = vpack.c.bf16 %v621_v2, %v621_v2  ;;  %v919_v28 = vsel %vm7728_vm7, %v6465_v9, %v918_v13 }
  0xbe   : > { %v7277_v11 = vld [vmem:[#allocation2 + $0x14] sm:$0xff]  ;;  %v1787_v35 = vrot.slane %v1786_v17, 4  ;;  %v1505_v42 = vunpack.c.l.b16 %v919_v28 }
  0xbf   : > { %v840_v12 = vld [vmem:[#allocation2 + $0x18] sm:$0xf]  ;;  %805 = vst [vmem:[#allocation2 + $0x24] sm:$0xf] %v653_v8  ;;  %1427 = vmatmul.bf16.gmra.mxu1 %v7277_v11  ;;  %v1823_v11 = vshll.u32 %v1712_v63, 16 }
  0xc0   : > { %v1708_v14 = vld [vmem:[#allocation2 + $0x18] sm:$0xf]  ;;  %v922_v16 = vshrl.u32 %v840_v12, 16  ;;  %v546_v20 = vpop.f32.mrf.mxu0  ;;  %v925_v21 = vshll.u32 %v840_v12, 16 }
  0xc1   : > { %v1789_v18 = vshll.u32 %v1708_v14, 16  ;;  %v1793_v19 = vshrl.u32 %v1708_v14, 16  ;;  %v547_v23 = vadd.f32 %v7765_v37, %v546_v20 }
  0xc2   : > { %v924_v24 = vrot.slane %v922_v16, 7 }
  0xc3   : > { %v1791_v25 = vrot.slane %v1789_v18, 5  ;;  %v1795_v27 = vrot.slane %v1793_v19, 4  ;;  %v622_v33 = vmax.f32 %v547_v23, 0.0  ;;  %v7337_v18 = vld [vmem:[%s9411_s3 + $0xe8] sm:$0xff]  ;;  %v719_v19 = vld [vmem:[#allocation2 + $0x50] sm:$0x8] }
  0xc4   : > { %v927_v34 = vor.u32 %v925_v21, %v924_v24  ;;  %2920 = vmatpush.bf16.msrb.mxu0 %v7337_v18  ;;  %v720_v28 = vsel %vm7683_vm2, 0, %v719_v19 }
  0xc5   : > { %v1796_v36 = vor.u32 %v1795_v27, %v1791_v25  ;;  %v654_v38 = vpack.c.bf16 %v622_v33, %v622_v33  ;;  %v1792_v40 = vsel %vm7737_vm10, %v1787_v35, %v1791_v25  ;;  %v1825_v27 = vrot.slane %v1823_v11, 5  ;;  %721 = vst [vmem:[#allocation2 + $0x50] sm:$0x8] %v720_v28 }
  0xc6   : > { %v928_v39 = vsel %vm7728_vm7, %v920_v29, %v927_v34  ;;  %v842_v45 = vld [vmem:[#allocation2 + $0x24] sm:$0xf]  ;;  %v2158_v53 = vunpack.c.l.b16 %v1792_v40 }
  0xc7   : > { %v1797_v41 = vrot.slane %v1796_v36, 4  ;;  %v1506_v43 = vunpack.c.l.b16 %v928_v39  ;;  %v1710_v46 = vld [vmem:[#allocation2 + $0x24] sm:$0xf]  ;;  %806 = vst [vmem:[#allocation2 + $0x28] sm:$0xf] %v654_v38  ;;  %v935_v49 = vshrl.u32 %v842_v45, 16 }
  0xc8   : > { %v1804_v50 = vshrl.u32 %v1710_v46, 16  ;;  %v549_v51 = vpop.f32.mrf.mxu0  ;;  %v1807_v55 = vshll.u32 %v1710_v46, 16  ;;  %v938_v2 = vshll.u32 %v842_v45, 16 }
  0xc9   : > { %v1802_v48 = vsel %vm7737_vm10, %v1797_v41, %v1801_v30  ;;  %v1536_v52 = vpack.c.b16 %v1506_v43, %v1505_v42  ;;  %v550_v56 = vadd.f32 %v7765_v37, %v549_v51  ;;  %v937_v60 = vrot.slane %v935_v49, 7  ;;  %v844_v41 = vld [vmem:[#allocation2 + $0x30] sm:$0x8] }
  0xca   : > { %v2159_v54 = vunpack.c.l.b16 %v1802_v48  ;;  %v1806_v0 = vrot.slane %v1804_v50, 4  ;;  %v1809_v1 = vrot.slane %v1807_v55, 5  ;;  %v7345_v48 = vld [vmem:[%s9411_s3 + $0x128] sm:$0xff]  ;;  %v952_v55 = vshrl.u32 %v844_v41, 16  ;;  %v7264_v41 = vld [vmem:[%s7637_s11 + $0x60] sm:$0xff] }
  0xcb   : > { %1628 = vmatmul.bf16.gmra.mxu2 %v1536_v52  ;;  %v623_v62 = vmax.f32 %v550_v56, 0.0  ;;  %588 = vmatmul.bf16.gmra.mxu0 %v7262_v47  ;;  %v940_v8 = vor.u32 %v938_v2, %v937_v60  ;;  %v942_v25 = vrot.slane %v937_v60, 4 }
  0xcc   : > { %v2189_v58 = vpack.c.b16 %v2159_v54, %v2158_v53  ;;  %v1810_v13 = vor.u32 %v1809_v1, %v1806_v0  ;;  %3202 = vmatpush.bf16.msrb.mxu1 %v7345_v48  ;;  %v6467_v3 = vrot.slane %v952_v55, 11 }
  0xcd   : > { %v655_v4 = vpack.c.bf16 %v623_v62, %v623_v62  ;;  %v941_v24 = vsel %vm7728_vm7, %v6466_v5, %v940_v8  ;;  %v1847_v8 = vshll.u32 %v1715_v61, 16 }
  0xce   : > { %2281 = vmatmul.bf16.gmra.mxu3 %v2189_v58  ;;  %v7278_v6 = vld [vmem:[#allocation2 + $0x24] sm:$0xff]  ;;  %v1811_v32 = vrot.slane %v1810_v13, 4  ;;  %v1507_v39 = vunpack.c.l.b16 %v941_v24  ;;  %v767_v58 = vld [vmem:[#allocation2 + $0x5c] sm:$0x1] }
  0xcf   : > { %v843_v7 = vld [vmem:[#allocation2 + $0x28] sm:$0xf]  ;;  %807 = vst [vmem:[#allocation2 + $0x34] sm:$0xf] %v655_v4  ;;  %1432 = vmatmul.bf16.gmra.mxu1 %v7278_v6  ;;  %v768_v1 = vsel %vm7693_vm5, 0, %v767_v58 }
  0xd0   : > { %v1711_v9 = vld [vmem:[#allocation2 + $0x28] sm:$0xf]  ;;  %v944_v12 = vshrl.u32 %v843_v7, 16  ;;  %v551_v16 = vpop.f32.mrf.mxu0  ;;  %v947_v17 = vshll.u32 %v843_v7, 16  ;;  %769 = vst [vmem:[#allocation2 + $0x5c] sm:$0x1] %v768_v1 }
  0xd1   : > { %v1813_v14 = vshll.u32 %v1711_v9, 16  ;;  %v1817_v15 = vshrl.u32 %v1711_v9, 16  ;;  %v552_v20 = vadd.f32 %v7765_v37, %v551_v16  ;;  %v722_v16 = vld [vmem:[#allocation2 + $0x60] sm:$0x8] }
  0xd2   : > { %v946_v21 = vrot.slane %v944_v12, 7  ;;  %v723_v24 = vsel %vm7683_vm2, 0, %v722_v16 }
  0xd3   : > { %v1815_v22 = vrot.slane %v1813_v14, 5  ;;  %v1819_v23 = vrot.slane %v1817_v15, 4  ;;  %v624_v29 = vmax.f32 %v552_v20, 0.0  ;;  %724 = vst [vmem:[#allocation2 + $0x60] sm:$0x8] %v723_v24 }
  0xd4   : > { %v949_v30 = vor.u32 %v947_v17, %v946_v21 }
  0xd5   : > { %v1820_v33 = vor.u32 %v1819_v23, %v1815_v22  ;;  %v656_v34 = vpack.c.bf16 %v624_v29, %v624_v29  ;;  %v1816_v36 = vsel %vm7737_vm10, %v1811_v32, %v1815_v22  ;;  %v1849_v23 = vrot.slane %v1847_v8, 5 }
  0xd6   : > { %v950_v35 = vsel %vm7728_vm7, %v942_v25, %v949_v30  ;;  %v845_v42 = vld [vmem:[#allocation2 + $0x34] sm:$0xf]  ;;  %v2160_v51 = vunpack.c.l.b16 %v1816_v36 }
  0xd7   : > { %v1821_v38 = vrot.slane %v1820_v33, 4  ;;  %v1508_v40 = vunpack.c.l.b16 %v950_v35  ;;  %v1713_v43 = vld [vmem:[#allocation2 + $0x34] sm:$0xf]  ;;  %808 = vst [vmem:[#allocation2 + $0x38] sm:$0xf] %v656_v34  ;;  %v957_v46 = vshrl.u32 %v845_v42, 16 }
  0xd8   : > { %v1828_v47 = vshrl.u32 %v1713_v43, 16  ;;  %v554_v49 = vpop.f32.mrf.mxu0  ;;  %v1831_v53 = vshll.u32 %v1713_v43, 16  ;;  %v960_v0 = vshll.u32 %v845_v42, 16 }
  0xd9   : > { %v1826_v45 = vsel %vm7737_vm10, %v1821_v38, %v1825_v27  ;;  %v1537_v50 = vpack.c.b16 %v1508_v40, %v1507_v39  ;;  %v555_v54 = vadd.f32 %v7765_v37, %v554_v49  ;;  %v959_v57 = vrot.slane %v957_v46, 7  ;;  %v847_v38 = vld [vmem:[#allocation2 + $0x40] sm:$0x8] }
  0xda   : > { %v2161_v52 = vunpack.c.l.b16 %v1826_v45  ;;  %v1830_v62 = vrot.slane %v1828_v47, 4  ;;  %v1833_v63 = vrot.slane %v1831_v53, 5 }
  0xdb   : > { %1633 = vmatmul.bf16.gmra.mxu2 %v1537_v50  ;;  %v625_v60 = vmax.f32 %v555_v54, 0.0  ;;  %593 = vmatmul.bf16.gmra.mxu0 %v7263_v44  ;;  %v962_v6 = vor.u32 %v960_v0, %v959_v57  ;;  %v964_v22 = vrot.slane %v959_v57, 4  ;;  %v770_v54 = vld [vmem:[#allocation2 + $0x6c] sm:$0x1] }
  0xdc   : > { %v2190_v56 = vpack.c.b16 %v2161_v52, %v2160_v51  ;;  %v1834_v11 = vor.u32 %v1833_v63, %v1830_v62  ;;  %v974_v51 = vshrl.u32 %v847_v38, 16  ;;  %v771_v61 = vsel %vm7693_vm5, 0, %v770_v54  ;;  %v7265_v38 = vld [vmem:[%s7637_s11 + $0x68] sm:$0xff] }
  0xdd   : > { %v657_v2 = vpack.c.bf16 %v625_v60, %v625_v60  ;;  %v963_v21 = vsel %vm7728_vm7, %v6467_v3, %v962_v6  ;;  %772 = vst [vmem:[#allocation2 + $0x6c] sm:$0x1] %v771_v61  ;;  %v773_v61 = vld [vmem:[#allocation2 + $0x7c] sm:$0x1] }
  0xde   : > { %2286 = vmatmul.bf16.gmra.mxu3 %v2190_v56  ;;  %v7279_v4 = vld [vmem:[#allocation2 + $0x34] sm:$0xff]  ;;  %v1835_v28 = vrot.slane %v1834_v11, 4  ;;  %v1509_v35 = vunpack.c.l.b16 %v963_v21  ;;  %v1718_v56 = vld [vmem:[#allocation2 + $0x4c] sm:$0x1]  ;;  %v6468_v63 = vrot.slane %v974_v51, 11 }
  0xdf   : > { %v846_v5 = vld [vmem:[#allocation2 + $0x38] sm:$0xf]  ;;  %809 = vst [vmem:[#allocation2 + $0x44] sm:$0xf] %v657_v2  ;;  %1437 = vmatmul.bf16.gmra.mxu1 %v7279_v4  ;;  %v1871_v4 = vshll.u32 %v1718_v56, 16 }
  0xe0   : > { %v1714_v7 = vld [vmem:[#allocation2 + $0x38] sm:$0xf]  ;;  %v966_v9 = vshrl.u32 %v846_v5, 16  ;;  %v556_v14 = vpop.f32.mrf.mxu0  ;;  %v969_v15 = vshll.u32 %v846_v5, 16 }
  0xe1   : > { %v1837_v12 = vshll.u32 %v1714_v7, 16  ;;  %v1841_v13 = vshrl.u32 %v1714_v7, 16  ;;  %v557_v17 = vadd.f32 %v7765_v37, %v556_v14  ;;  %v7335_v56 = vld [vmem:[%s9411_s3 + $0xd8] sm:$0xff] }
  0xe2   : > { %v968_v18 = vrot.slane %v966_v9, 7 }
  0xe3   : > { %v1839_v19 = vrot.slane %v1837_v12, 5  ;;  %v1843_v20 = vrot.slane %v1841_v13, 4  ;;  %v626_v25 = vmax.f32 %v557_v17, 0.0  ;;  %v7336_v12 = vld [vmem:[%s9411_s3 + $0xe0] sm:$0xff]  ;;  %v725_v13 = vld [vmem:[#allocation2 + $0x70] sm:$0x8] }
  0xe4   : > { %v971_v27 = vor.u32 %v969_v15, %v968_v18  ;;  %2921 = vmatpush.bf16.msrb.mxu0 %v7336_v12  ;;  %v726_v21 = vsel %vm7683_vm2, 0, %v725_v13 }
  0xe5   : > { %v1844_v29 = vor.u32 %v1843_v20, %v1839_v19  ;;  %v658_v30 = vpack.c.bf16 %v626_v25, %v626_v25  ;;  %v1840_v33 = vsel %vm7737_vm10, %v1835_v28, %v1839_v19  ;;  %v1873_v20 = vrot.slane %v1871_v4, 5  ;;  %727 = vst [vmem:[#allocation2 + $0x70] sm:$0x8] %v726_v21 }
  0xe6   : > { %v972_v32 = vsel %vm7728_vm7, %v964_v22, %v971_v27  ;;  %v848_v39 = vld [vmem:[#allocation2 + $0x44] sm:$0xf]  ;;  %v2162_v47 = vunpack.c.l.b16 %v1840_v33 }
  0xe7   : > { %v1845_v34 = vrot.slane %v1844_v29, 4  ;;  %v1510_v36 = vunpack.c.l.b16 %v972_v32  ;;  %v1716_v40 = vld [vmem:[#allocation2 + $0x44] sm:$0xf]  ;;  %810 = vst [vmem:[#allocation2 + $0x48] sm:$0xf] %v658_v30  ;;  %v979_v43 = vshrl.u32 %v848_v39, 16 }
  0xe8   : > { %v1852_v44 = vshrl.u32 %v1716_v40, 16  ;;  %v559_v45 = vpop.f32.mrf.mxu0  ;;  %v1855_v49 = vshll.u32 %v1716_v40, 16  ;;  %v982_v60 = vshll.u32 %v848_v39, 16  ;;  %2922 = vmatpush.bf16.msrb.mxu0 %v7335_v56  ;;  %v1724_v56 = vld [vmem:[#allocation2 + $0x6c] sm:$0x1] }
  0xe9   : > { %v1850_v42 = vsel %vm7737_vm10, %v1845_v34, %v1849_v23  ;;  %v1538_v46 = vpack.c.b16 %v1510_v36, %v1509_v35  ;;  %v560_v50 = vadd.f32 %v7765_v37, %v559_v45  ;;  %v981_v53 = vrot.slane %v979_v43, 7  ;;  %v850_v34 = vld [vmem:[#allocation2 + $0x50] sm:$0x8] }
  0xea   : > { %v2163_v48 = vunpack.c.l.b16 %v1850_v42  ;;  %v1854_v57 = vrot.slane %v1852_v44, 4  ;;  %v1857_v58 = vrot.slane %v1855_v49, 5  ;;  %v7344_v42 = vld [vmem:[%s9411_s3 + $0x120] sm:$0xff]  ;;  %v996_v49 = vshrl.u32 %v850_v34, 16 }
  0xeb   : > { %1638 = vmatmul.bf16.gmra.mxu2 %v1538_v46  ;;  %v627_v55 = vmax.f32 %v560_v50, 0.0  ;;  %598 = vmatmul.bf16.gmra.mxu0 %v7264_v41  ;;  %v984_v2 = vor.u32 %v982_v60, %v981_v53  ;;  %v986_v19 = vrot.slane %v981_v53, 4  ;;  %v1721_v53 = vld [vmem:[#allocation2 + $0x5c] sm:$0x1]  ;;  %v853_v34 = vld [vmem:[#allocation2 + $0x60] sm:$0x8] }
  0xec   : > { %v2191_v52 = vpack.c.b16 %v2163_v48, %v2162_v47  ;;  %v1858_v6 = vor.u32 %v1857_v58, %v1854_v57  ;;  %3203 = vmatpush.bf16.msrb.mxu1 %v7344_v42  ;;  %v6469_v60 = vrot.slane %v996_v49, 11  ;;  %v1423_v42 = vpop.f32.mrf.mxu1 }
  0xed   : > { %v659_v62 = vpack.c.bf16 %v627_v55, %v627_v55  ;;  %v985_v18 = vsel %vm7728_vm7, %v6468_v63, %v984_v2  ;;  %v1895_v2 = vshll.u32 %v1721_v53, 16 }
  0xee   : > { %2291 = vmatmul.bf16.gmra.mxu3 %v2191_v52  ;;  %v7280_v0 = vld [vmem:[#allocation2 + $0x44] sm:$0xff]  ;;  %v1859_v24 = vrot.slane %v1858_v6, 4  ;;  %v1511_v32 = vunpack.c.l.b16 %v985_v18 }
  0xef   : > { %v849_v1 = vld [vmem:[#allocation2 + $0x48] sm:$0xf]  ;;  %811 = vst [vmem:[#allocation2 + $0x54] sm:$0xf] %v659_v62  ;;  %1442 = vmatmul.bf16.gmra.mxu1 %v7280_v0  ;;  %v1897_v18 = vrot.slane %v1895_v2, 5 }
  0xf0   : > { %v1717_v3 = vld [vmem:[#allocation2 + $0x48] sm:$0xf]  ;;  %v988_v5 = vshrl.u32 %v849_v1, 16  ;;  %v561_v9 = vpop.f32.mrf.mxu0  ;;  %v991_v11 = vshll.u32 %v849_v1, 16  ;;  %v1624_v49 = vpop.f32.mrf.mxu2 }
  0xf1   : > { %v1861_v7 = vshll.u32 %v1717_v3, 16  ;;  %v1865_v8 = vshrl.u32 %v1717_v3, 16  ;;  %v562_v14 = vadd.f32 %v7765_v37, %v561_v9  ;;  %v7334_v9 = vld [vmem:[%s9411_s3 + $0xd0] sm:$0xff] }
  0xf2   : > { %v990_v15 = vrot.slane %v988_v5, 7  ;;  %2923 = vmatpush.bf16.msrb.mxu0 %v7334_v9 }
  0xf3   : > { %v1863_v16 = vrot.slane %v1861_v7, 5  ;;  %v1867_v17 = vrot.slane %v1865_v8, 4  ;;  %v628_v22 = vmax.f32 %v562_v14, 0.0 }
  0xf4   : > { %v993_v23 = vor.u32 %v991_v11, %v990_v15  ;;  %v774_v11 = vsel %vm7693_vm5, 0, %v773_v61 }
  0xf5   : > { %v1868_v25 = vor.u32 %v1867_v17, %v1863_v16  ;;  %v660_v27 = vpack.c.bf16 %v628_v22, %v628_v22  ;;  %v1864_v29 = vsel %vm7737_vm10, %v1859_v24, %v1863_v16  ;;  %775 = vst [vmem:[#allocation2 + $0x7c] sm:$0x1] %v774_v11  ;;  %v728_v24 = vld [vmem:[#allocation2 + $0x80] sm:$0x8]  ;;  %v2277_v11 = vpop.f32.mrf.mxu3 }
  0xf6   : > { %v994_v28 = vsel %vm7728_vm7, %v986_v19, %v993_v23  ;;  %v851_v35 = vld [vmem:[#allocation2 + $0x54] sm:$0xf]  ;;  %v2164_v45 = vunpack.c.l.b16 %v1864_v29  ;;  %v7333_v23 = vld [vmem:[%s9411_s3 + $0xc8] sm:$0xff] }
  0xf7   : > { %v1869_v30 = vrot.slane %v1868_v25, 4  ;;  %v1512_v33 = vunpack.c.l.b16 %v994_v28  ;;  %v1719_v36 = vld [vmem:[#allocation2 + $0x54] sm:$0xf]  ;;  %812 = vst [vmem:[#allocation2 + $0x58] sm:$0xf] %v660_v27  ;;  %v1001_v40 = vshrl.u32 %v851_v35, 16  ;;  %2924 = vmatpush.bf16.msrb.mxu0 %v7333_v23 }
  0xf8   : > { %v1876_v41 = vshrl.u32 %v1719_v36, 16  ;;  %v564_v43 = vpop.f32.mrf.mxu0  ;;  %v1879_v47 = vshll.u32 %v1719_v36, 16  ;;  %v1004_v57 = vshll.u32 %v851_v35, 16  ;;  %v729_v25 = vsel %vm7683_vm2, 0, %v728_v24  ;;  %v776_v23 = vld [vmem:[#allocation2 + $0x8c] sm:$0x1] }
  0xf9   : > { %v1874_v39 = vsel %vm7737_vm10, %v1869_v30, %v1873_v20  ;;  %v1539_v44 = vpack.c.b16 %v1512_v33, %v1511_v32  ;;  %v565_v48 = vadd.f32 %v7765_v37, %v564_v43  ;;  %v1003_v51 = vrot.slane %v1001_v40, 7  ;;  %730 = vst [vmem:[#allocation2 + $0x80] sm:$0x8] %v729_v25  ;;  %v7332_v43 = vld [vmem:[%s9411_s3 + $0xc0] sm:$0xff] }
  0xfa   : > { %v2165_v46 = vunpack.c.l.b16 %v1874_v39  ;;  %v1878_v54 = vrot.slane %v1876_v41, 4  ;;  %v1881_v55 = vrot.slane %v1879_v47, 5 }
  0xfb   : > { %1643 = vmatmul.bf16.gmra.mxu2 %v1539_v44  ;;  %v629_v52 = vmax.f32 %v565_v48, 0.0  ;;  %603 = vmatmul.bf16.gmra.mxu0 %v7265_v38  ;;  %v1006_v0 = vor.u32 %v1004_v57, %v1003_v51  ;;  %v1008_v17 = vrot.slane %v1003_v51, 4  ;;  %v7266_v38 = vld [vmem:[%s7637_s11 + $0x70] sm:$0xff]  ;;  %v1018_v51 = vshrl.u32 %v853_v34, 16 }
  0xfc   : > { %v2192_v50 = vpack.c.b16 %v2165_v46, %v2164_v45  ;;  %v1882_v4 = vor.u32 %v1881_v55, %v1878_v54  ;;  %2925 = vmatpush.bf16.msrb.mxu0 %v7332_v43 }
  0xfd   : > { %v661_v58 = vpack.c.bf16 %v629_v52, %v629_v52  ;;  %v1007_v16 = vsel %vm7728_vm7, %v6469_v60, %v1006_v0  ;;  %v1625_v52 = vadd.f32 %v1624_v49, %v1423_v42  ;;  %v7883_v0 = vld [vmem:[#allocation2 + $0x18] sm:$0xf] }
  0xfe   : > { %2296 = vmatmul.bf16.gmra.mxu3 %v2192_v50  ;;  %v7281_v62 = vld [vmem:[#allocation2 + $0x54] sm:$0xff]  ;;  %v1883_v21 = vrot.slane %v1882_v4, 4  ;;  %v1513_v32 = vunpack.c.l.b16 %v1007_v16 }
  0xff   : > { %v852_v63 = vld [vmem:[#allocation2 + $0x58] sm:$0xf]  ;;  %813 = vst [vmem:[#allocation2 + $0x64] sm:$0xf] %v661_v58  ;;  %1447 = vmatmul.bf16.gmra.mxu1 %v7281_v62  ;;  %v6470_v62 = vrot.slane %v1018_v51, 11 }
 0x100   : > { %v1720_v1 = vld [vmem:[#allocation2 + $0x58] sm:$0xf]  ;;  %v1010_v3 = vshrl.u32 %v852_v63, 16  ;;  %v566_v7 = vpop.f32.mrf.mxu0  ;;  %v1013_v8 = vshll.u32 %v852_v63, 16  ;;  %v7881_v63 = vld [vmem:[#allocation2 + $0x14] sm:$0xf] }
 0x101   : > { %v1885_v5 = vshll.u32 %v1720_v1, 16  ;;  %v1889_v6 = vshrl.u32 %v1720_v1, 16  ;;  %v567_v12 = vadd.f32 %v7765_v37, %v566_v7  ;;  %v2443_v16 = vshrl.u32 %v7881_v63, 16 }
 0x102   : > { %v1012_v13 = vrot.slane %v1010_v3, 7 }
 0x103   : > { %v1887_v14 = vrot.slane %v1885_v5, 5  ;;  %v1891_v15 = vrot.slane %v1889_v6, 4  ;;  %v630_v19 = vmax.f32 %v567_v12, 0.0  ;;  %v1919_v5 = vshll.u32 %v1724_v56, 16  ;;  %v2389_v12 = vld [vmem:[#allocation2 + $0x10] sm:$0x8] }
 0x104   : > { %v1015_v20 = vor.u32 %v1013_v8, %v1012_v13  ;;  %v2438_v34 = vshrl.u32 %v2389_v12, 16 }
 0x105   : > { %v1892_v22 = vor.u32 %v1891_v15, %v1887_v14  ;;  %v662_v27 = vpack.c.bf16 %v630_v19, %v630_v19  ;;  %v1888_v29 = vsel %vm7737_vm10, %v1883_v21, %v1887_v14  ;;  %v7885_v15 = vadd.f32 %v2277_v11, %v1625_v52  ;;  %v7343_v52 = vld [vmem:[%s9411_s3 + $0x118] sm:$0xff] }
 0x106   : > { %v1016_v28 = vsel %vm7728_vm7, %v1008_v17, %v1015_v20  ;;  %v854_v35 = vld [vmem:[#allocation2 + $0x64] sm:$0xf]  ;;  %v2166_v46 = vunpack.c.l.b16 %v1888_v29  ;;  %v2452_v17 = vshrl.u32 %v7883_v0, 16  ;;  %3204 = vmatpush.bf16.msrb.mxu1 %v7343_v52 }
 0x107   : > { %v1893_v30 = vrot.slane %v1892_v22, 4  ;;  %v1514_v33 = vunpack.c.l.b16 %v1016_v28  ;;  %v1722_v36 = vld [vmem:[#allocation2 + $0x64] sm:$0xf]  ;;  %814 = vst [vmem:[#allocation2 + $0x68] sm:$0xf] %v662_v27  ;;  %v1023_v40 = vshrl.u32 %v854_v35, 16 }
 0x108   : > { %v1900_v41 = vshrl.u32 %v1722_v36, 16  ;;  %v569_v44 = vpop.f32.mrf.mxu0  ;;  %v1903_v48 = vshll.u32 %v1722_v36, 16  ;;  %v1026_v60 = vshll.u32 %v854_v35, 16  ;;  %v1921_v27 = vrot.slane %v1919_v5, 5 }
 0x109   : > { %v1898_v39 = vsel %vm7737_vm10, %v1893_v30, %v1897_v18  ;;  %v1540_v45 = vpack.c.b16 %v1514_v33, %v1513_v32  ;;  %v570_v50 = vadd.f32 %v7765_v37, %v569_v44  ;;  %v1025_v54 = vrot.slane %v1023_v40, 7  ;;  %v2392_v18 = vld [vmem:[#allocation2 + $0x20] sm:$0x8] }
 0x10a   : > { %v2167_v47 = vunpack.c.l.b16 %v1898_v39  ;;  %v1902_v57 = vrot.slane %v1900_v41, 4  ;;  %v1905_v58 = vrot.slane %v1903_v48, 5  ;;  %v777_v28 = vsel %vm7693_vm5, 0, %v776_v23  ;;  %v7267_v48 = vld [vmem:[%s7637_s11 + $0x78] sm:$0xff] }
 0x10b   : > { %1648 = vmatmul.bf16.gmra.mxu2 %v1540_v45  ;;  %v631_v55 = vmax.f32 %v570_v50, 0.0  ;;  %608 = vmatmul.bf16.gmra.mxu0 %v7266_v38  ;;  %v1028_v3 = vor.u32 %v1026_v60, %v1025_v54  ;;  %v1030_v25 = vrot.slane %v1025_v54, 4  ;;  %778 = vst [vmem:[#allocation2 + $0x8c] sm:$0x1] %v777_v28  ;;  %v7894_v35 = vrot.slane %v2443_v16, 7 }
 0x10c   : > { %v2193_v53 = vpack.c.b16 %v2167_v47, %v2166_v46  ;;  %v1906_v7 = vor.u32 %v1905_v58, %v1902_v57  ;;  %v2454_v36 = vrot.slane %v2452_v17, 7  ;;  %v2460_v38 = vshrl.u32 %v2392_v18, 16  ;;  %v856_v45 = vld [vmem:[#allocation2 + $0x70] sm:$0x8]  ;;  %v7915_v18 = vld [vmem:[#allocation2 + $0x24] sm:$0xf] }
 0x10d   : > { %v663_v61 = vpack.c.bf16 %v631_v55, %v631_v55  ;;  %v1029_v24 = vsel %vm7728_vm7, %v6470_v62, %v1028_v3  ;;  %v731_v58 = vld [vmem:[#allocation2 + $0x90] sm:$0x8]  ;;  %v2446_v3 = vshll.u32 %v7881_v63, 16  ;;  %v2450_v63 = vrot.slane %v7894_v35, 4 }
 0x10e   : > { %2301 = vmatmul.bf16.gmra.mxu3 %v2193_v53  ;;  %v7282_v1 = vld [vmem:[#allocation2 + $0x64] sm:$0xff]  ;;  %v1907_v32 = vrot.slane %v1906_v7, 4  ;;  %v1515_v43 = vunpack.c.l.b16 %v1029_v24  ;;  %v732_v62 = vsel %vm7683_vm2, 0, %v731_v58  ;;  %v1727_v7 = vld [vmem:[#allocation2 + $0x7c] sm:$0x1] }
 0x10f   : > { %v855_v2 = vld [vmem:[#allocation2 + $0x68] sm:$0xf]  ;;  %815 = vst [vmem:[#allocation2 + $0x74] sm:$0xf] %v663_v61  ;;  %1452 = vmatmul.bf16.gmra.mxu1 %v7282_v1  ;;  %v1040_v61 = vshrl.u32 %v856_v45, 16  ;;  %v2448_v12 = vor.u32 %v2446_v3, %v7894_v35  ;;  %v1943_v23 = vshll.u32 %v1727_v7, 16 }
 0x110   : > { %v1723_v4 = vld [vmem:[#allocation2 + $0x68] sm:$0xf]  ;;  %v1032_v6 = vshrl.u32 %v855_v2, 16  ;;  %v571_v13 = vpop.f32.mrf.mxu0  ;;  %v1035_v14 = vshll.u32 %v855_v2, 16  ;;  %733 = vst [vmem:[#allocation2 + $0x90] sm:$0x8] %v732_v62 }
 0x111   : > { %v1909_v8 = vshll.u32 %v1723_v4, 16  ;;  %v1913_v9 = vshrl.u32 %v1723_v4, 16  ;;  %v572_v19 = vadd.f32 %v7765_v37, %v571_v13  ;;  %v2455_v4 = vshll.u32 %v7883_v0, 16  ;;  %v7917_v0 = vld [vmem:[#allocation2 + $0x28] sm:$0xf]  ;;  %v7355_v35 = vld [vmem:[%s9411_s3 + $0x178] sm:$0xff] }
 0x112   : > { %v1034_v20 = vrot.slane %v1032_v6, 7  ;;  %v6672_v6 = vrot.slane %v2438_v34, 11  ;;  %v6471_v17 = vrot.slane %v1040_v61, 11  ;;  %v2465_v34 = vshrl.u32 %v7915_v18, 16  ;;  %3882 = vmatpush.bf16.msrb.mxu2 %v7355_v35  ;;  %v779_v45 = vld [vmem:[#allocation2 + $0x9c] sm:$0x1] }
 0x113   : > { %v1911_v21 = vrot.slane %v1909_v8, 5  ;;  %v1915_v22 = vrot.slane %v1913_v9, 4  ;;  %v632_v29 = vmax.f32 %v572_v19, 0.0  ;;  %v2457_v13 = vor.u32 %v2455_v4, %v2454_v36  ;;  %v859_v61 = vld [vmem:[#allocation2 + $0x80] sm:$0x8] }
 0x114   : > { %v1037_v30 = vor.u32 %v1035_v14, %v1034_v20  ;;  %v7912_v14 = vrot.slane %v2460_v38, 11  ;;  %v780_v52 = vsel %vm7693_vm5, 0, %v779_v45 }
 0x115   : > { %v1916_v33 = vor.u32 %v1915_v22, %v1911_v21  ;;  %v664_v39 = vpack.c.bf16 %v632_v29, %v632_v29  ;;  %v1912_v41 = vsel %vm7737_vm10, %v1907_v32, %v1911_v21  ;;  %v2449_v32 = vsel %vm7728_vm7, %v6672_v6, %v2448_v12  ;;  %781 = vst [vmem:[#allocation2 + $0x9c] sm:$0x1] %v780_v52  ;;  %v7379_v6 = vld [vmem:[%s9411_s3 + $0x1b8] sm:$0xff] }
 0x116   : > { %v1038_v40 = vsel %vm7728_vm7, %v1030_v25, %v1037_v30  ;;  %v857_v46 = vld [vmem:[#allocation2 + $0x74] sm:$0xf]  ;;  %v2168_v55 = vunpack.c.l.b16 %v1912_v41  ;;  %4533 = vmatpush.bf16.msrb.mxu3 %v7379_v6 }
 0x117   : > { %v1917_v42 = vrot.slane %v1916_v33, 4  ;;  %v1516_v44 = vunpack.c.l.b16 %v1038_v40  ;;  %v1725_v47 = vld [vmem:[#allocation2 + $0x74] sm:$0xf]  ;;  %816 = vst [vmem:[#allocation2 + $0x78] sm:$0xf] %v664_v39  ;;  %v1045_v50 = vshrl.u32 %v857_v46, 16  ;;  %v2458_v33 = vsel %vm7728_vm7, %v2450_v63, %v2457_v13 }
 0x118   : > { %v1924_v51 = vshrl.u32 %v1725_v47, 16  ;;  %v574_v53 = vpop.f32.mrf.mxu0  ;;  %v1927_v57 = vshll.u32 %v1725_v47, 16  ;;  %v1048_v11 = vshll.u32 %v857_v46, 16  ;;  %v734_v13 = vld [vmem:[#allocation2 + $0xa0] sm:$0x8] }
 0x119   : > { %v1922_v49 = vsel %vm7737_vm10, %v1917_v42, %v1921_v27  ;;  %v1541_v54 = vpack.c.b16 %v1516_v44, %v1515_v43  ;;  %v575_v60 = vadd.f32 %v7765_v37, %v574_v53  ;;  %v1047_v2 = vrot.slane %v1045_v50, 7 }
 0x11a   : > { %v2169_v56 = vunpack.c.l.b16 %v1922_v49  ;;  %v1926_v8 = vrot.slane %v1924_v51, 4  ;;  %v1929_v9 = vrot.slane %v1927_v57, 5  ;;  %v1945_v43 = vrot.slane %v1943_v23, 5 }
 0x11b   : > { %1653 = vmatmul.bf16.gmra.mxu2 %v1541_v54  ;;  %v633_v5 = vmax.f32 %v575_v60, 0.0  ;;  %613 = vmatmul.bf16.gmra.mxu0 %v7267_v48  ;;  %v1050_v21 = vor.u32 %v1048_v11, %v1047_v2  ;;  %v1052_v42 = vrot.slane %v1047_v2, 4  ;;  %v2474_v44 = vshrl.u32 %v7917_v0, 16 }
 0x11c   : > { %v2194_v1 = vpack.c.b16 %v2169_v56, %v2168_v55  ;;  %v1930_v25 = vor.u32 %v1929_v9, %v1926_v8  ;;  %v2807_v50 = vunpack.c.l.b16 %v2458_v33  ;;  %v7931_v51 = vrot.slane %v2465_v34, 7 }
 0x11d   : > { %v665_v16 = vpack.c.bf16 %v633_v5, %v633_v5  ;;  %v1051_v41 = vsel %vm7728_vm7, %v6471_v17, %v1050_v21  ;;  %v2806_v60 = vunpack.c.l.b16 %v2449_v32  ;;  %v2476_v4 = vrot.slane %v2474_v44, 7 }
 0x11e   : > { %2306 = vmatmul.bf16.gmra.mxu3 %v2194_v1  ;;  %v7283_v19 = vld [vmem:[#allocation2 + $0x74] sm:$0xff]  ;;  %v1931_v48 = vrot.slane %v1930_v25, 4  ;;  %v1517_v57 = vunpack.c.l.b16 %v1051_v41 }
 0x11f   : > { %v858_v20 = vld [vmem:[#allocation2 + $0x78] sm:$0xf]  ;;  %817 = vst [vmem:[#allocation2 + $0x84] sm:$0xf] %v665_v16  ;;  %1457 = vmatmul.bf16.gmra.mxu1 %v7283_v19  ;;  %v7948_v16 = vld [vmem:[%s9410_s2] ss:$0 sm:$0xff]  ;;  %v2838_v63 = vpack.c.b16 %v2807_v50, %v2806_v60 }
 0x120   : > { %v1726_v22 = vld [vmem:[#allocation2 + $0x78] sm:$0xf]  ;;  %v1054_v24 = vshrl.u32 %v858_v20, 16  ;;  %v576_v29 = vpop.f32.mrf.mxu0  ;;  %v1057_v30 = vshll.u32 %v858_v20, 16  ;;  %v7951_v19 = vld [vmem:[#allocation2 + $0x30] sm:$0x8] }
 0x121   : > { %v1933_v27 = vshll.u32 %v1726_v22, 16  ;;  %v1937_v28 = vshrl.u32 %v1726_v22, 16  ;;  %v577_v36 = vadd.f32 %v7765_v37, %v576_v29  ;;  %v2468_v37 = vshll.u32 %v7915_v18, 16 }
 0x122   : > { %v1056_v38 = vrot.slane %v1054_v24, 7  ;;  %v1062_v18 = vshrl.u32 %v859_v61, 16  ;;  %v735_v20 = vsel %vm7683_vm2, 0, %v734_v13  ;;  %v2477_v24 = vshll.u32 %v7917_v0, 16 }
 0x123   : > { %v1935_v39 = vrot.slane %v1933_v27, 5  ;;  %v1939_v40 = vrot.slane %v1937_v28, 4  ;;  %v634_v46 = vmax.f32 %v577_v36, 0.0  ;;  %v2470_v23 = vor.u32 %v2468_v37, %v7931_v51  ;;  %736 = vst [vmem:[#allocation2 + $0xa0] sm:$0x8] %v735_v20 }
 0x124   : > { %v1059_v47 = vor.u32 %v1057_v30, %v1056_v38  ;;  %v1730_v27 = vld [vmem:[#allocation2 + $0x8c] sm:$0x1]  ;;  %v2479_v32 = vor.u32 %v2477_v24, %v2476_v4  ;;  %v2482_v33 = vshrl.u32 %v7951_v19, 16  ;;  %v6472_v35 = vrot.slane %v1062_v18, 11  ;;  %v7959_v38 = vld [vmem:[#allocation2 + $0x34] sm:$0xf] }
 0x125   : > { %v1940_v49 = vor.u32 %v1939_v40, %v1935_v39  ;;  %v666_v53 = vpack.c.bf16 %v634_v46, %v634_v46  ;;  %v1936_v55 = vsel %vm7737_vm10, %v1931_v48, %v1935_v39  ;;  %v2472_v36 = vrot.slane %v7931_v51, 4  ;;  %v7961_v39 = vld [vmem:[#allocation2 + $0x38] sm:$0xf] }
 0x126   : > { %v1060_v54 = vsel %vm7728_vm7, %v1052_v42, %v1059_v47  ;;  %v860_v62 = vld [vmem:[#allocation2 + $0x84] sm:$0xf]  ;;  %v2170_v9 = vunpack.c.l.b16 %v1936_v55  ;;  %v2471_v42 = vsel %vm7728_vm7, %v7912_v14, %v2470_v23  ;;  %v1967_v44 = vshll.u32 %v1730_v27, 16 }
 0x127   : > { %v1941_v56 = vrot.slane %v1940_v49, 4  ;;  %v1518_v58 = vunpack.c.l.b16 %v1060_v54  ;;  %v1728_v1 = vld [vmem:[#allocation2 + $0x84] sm:$0xf]  ;;  %818 = vst [vmem:[#allocation2 + $0x88] sm:$0xf] %v666_v53  ;;  %v1067_v3 = vshrl.u32 %v860_v62, 16  ;;  %v2480_v51 = vsel %vm7728_vm7, %v2472_v36, %v2479_v32 }
 0x128   : > { %v1948_v5 = vshrl.u32 %v1728_v1, 16  ;;  %v579_v7 = vpop.f32.mrf.mxu0  ;;  %v1951_v12 = vshll.u32 %v1728_v1, 16  ;;  %v1070_v30 = vshll.u32 %v860_v62, 16  ;;  %v2487_v37 = vshrl.u32 %v7959_v38, 16 }
 0x129   : > { %v1946_v2 = vsel %vm7737_vm10, %v1941_v56, %v1945_v43  ;;  %v1542_v8 = vpack.c.b16 %v1518_v58, %v1517_v57  ;;  %v580_v17 = vadd.f32 %v7948_v16, %v579_v7  ;;  %v1069_v22 = vrot.slane %v1067_v3, 7  ;;  %v7976_v7 = vld [vmem:[#allocation2 + $0x44] sm:$0xf] }
 0x12a   : > { %v2171_v11 = vunpack.c.l.b16 %v1946_v2  ;;  %v1950_v28 = vrot.slane %v1948_v5, 4  ;;  %v1953_v29 = vrot.slane %v1951_v12, 5  ;;  %v2496_v52 = vshrl.u32 %v7961_v39, 16 }
 0x12b   : > { %1658 = vmatmul.bf16.gmra.mxu2 %v1542_v8  ;;  %v635_v25 = vmax.f32 %v580_v17, 0.0  ;;  %2926 = vmatmul.bf16.vlgmr.msrb.gmra.mxu0 %v2838_v63  ;;  %v1072_v41 = vor.u32 %v1070_v30, %v1069_v22  ;;  %v1074_v57 = vrot.slane %v1069_v22, 4  ;;  %v2808_v58 = vunpack.c.l.b16 %v2471_v42  ;;  %v7978_v8 = vpop.f32.mrf.mxu1  ;;  %v862_v17 = vld [vmem:[#allocation2 + $0x90] sm:$0x8]  ;;  %v782_v63 = vld [vmem:[#allocation2 + $0xac] sm:$0x1] }
 0x12c   : > { %v2195_v21 = vpack.c.b16 %v2171_v11, %v2170_v9  ;;  %v1954_v46 = vor.u32 %v1953_v29, %v1950_v28  ;;  %v1969_v60 = vrot.slane %v1967_v44, 5  ;;  %v2809_v3 = vunpack.c.l.b16 %v2480_v51  ;;  %v7342_v29 = vld [vmem:[%s9411_s3 + $0x110] sm:$0xff]  ;;  %v2398_v42 = vld [vmem:[#allocation2 + $0x40] sm:$0x8] }
 0x12d   : > { %v667_v34 = vpack.c.bf16 %v635_v25, %v635_v25  ;;  %v1073_v56 = vsel %vm7728_vm7, %v6472_v35, %v1072_v41  ;;  %v7973_v4 = vrot.slane %v2487_v37, 7  ;;  %v2490_v5 = vshll.u32 %v7959_v38, 16  ;;  %3205 = vmatpush.bf16.msrb.mxu1 %v7342_v29  ;;  %v737_v37 = vld [vmem:[#allocation2 + $0xb0] sm:$0x8] }
 0x12e   : > { %2311 = vmatmul.bf16.gmra.mxu3 %v2195_v21  ;;  %v7284_v0 = vld [vmem:[#allocation2 + $0x84] sm:$0xff]  ;;  %v1955_v1 = vrot.slane %v1954_v46, 4  ;;  %v2498_v6 = vrot.slane %v2496_v52, 7  ;;  %v1519_v18 = vunpack.c.l.b16 %v1073_v56  ;;  %v2499_v22 = vshll.u32 %v7961_v39, 16 }
 0x12f   : > { %v861_v40 = vld [vmem:[#allocation2 + $0x88] sm:$0xf]  ;;  %819 = vst [vmem:[#allocation2 + $0x94] sm:$0xf] %v667_v34  ;;  %1462 = vmatmul.bf16.gmra.mxu1 %v7284_v0  ;;  %v783_v24 = vsel %vm7693_vm5, 0, %v782_v63  ;;  %v2509_v30 = vshrl.u32 %v7976_v7, 16  ;;  %v2839_v0 = vpack.c.b16 %v2809_v3, %v2808_v58 }
 0x130   : > { %v1729_v43 = vld [vmem:[#allocation2 + $0x88] sm:$0xf]  ;;  %v1076_v45 = vshrl.u32 %v861_v40, 16  ;;  %v581_v49 = vpop.f32.mrf.mxu0  ;;  %v1079_v50 = vshll.u32 %v861_v40, 16  ;;  %784 = vst [vmem:[#allocation2 + $0xac] sm:$0x1] %v783_v24  ;;  %v2501_v46 = vor.u32 %v2499_v22, %v2498_v6 }
 0x131   : > { %v1957_v47 = vshll.u32 %v1729_v43, 16  ;;  %v1961_v48 = vshrl.u32 %v1729_v43, 16  ;;  %v582_v53 = vadd.f32 %v7948_v16, %v581_v49  ;;  %v1084_v40 = vshrl.u32 %v862_v17, 16  ;;  %v8004_v56 = vld [vmem:[#allocation2 + $0x48] sm:$0xf]  ;;  %v7354_v63 = vld [vmem:[%s9411_s3 + $0x170] sm:$0xff] }
 0x132   : > { %v1078_v14 = vrot.slane %v1076_v45, 7  ;;  %v6674_v41 = vrot.slane %v2482_v33, 11  ;;  %v2492_v45 = vor.u32 %v2490_v5, %v7973_v4  ;;  %v2494_v49 = vrot.slane %v7973_v4, 4  ;;  %3883 = vmatpush.bf16.msrb.mxu2 %v7354_v63 }
 0x133   : > { %v1959_v54 = vrot.slane %v1957_v47, 5  ;;  %v1963_v55 = vrot.slane %v1961_v48, 4  ;;  %v636_v61 = vmax.f32 %v582_v53, 0.0  ;;  %v1733_v47 = vld [vmem:[#allocation2 + $0x9c] sm:$0x1]  ;;  %v2504_v19 = vshrl.u32 %v2398_v42, 16 }
 0x134   : > { %v1081_v62 = vor.u32 %v1079_v50, %v1078_v14  ;;  %v7998_v33 = vrot.slane %v2509_v30, 7  ;;  %v738_v53 = vsel %vm7683_vm2, 0, %v737_v37  ;;  %v1991_v3 = vshll.u32 %v1733_v47, 16  ;;  %v8035_v37 = vpop.f32.mrf.mxu3 }
 0x135   : > { %v1964_v2 = vor.u32 %v1963_v55, %v1959_v54  ;;  %v668_v9 = vpack.c.bf16 %v636_v61, %v636_v61  ;;  %v1960_v12 = vsel %vm7737_vm10, %v1955_v1, %v1959_v54  ;;  %v6473_v55 = vrot.slane %v1084_v40, 11  ;;  %739 = vst [vmem:[#allocation2 + $0xb0] sm:$0x8] %v738_v53 }
 0x136   : > { %v1082_v11 = vsel %vm7728_vm7, %v1074_v57, %v1081_v62  ;;  %v863_v21 = vld [vmem:[#allocation2 + $0x94] sm:$0xf]  ;;  %v2172_v35 = vunpack.c.l.b16 %v1960_v12  ;;  %v2512_v57 = vshll.u32 %v7976_v7, 16  ;;  %v2493_v62 = vsel %vm7728_vm7, %v6674_v41, %v2492_v45  ;;  %v785_v45 = vld [vmem:[#allocation2 + $0xbc] sm:$0x1] }
 0x137   : > { %v1965_v13 = vrot.slane %v1964_v2, 4  ;;  %v1520_v20 = vunpack.c.l.b16 %v1082_v11  ;;  %v1731_v23 = vld [vmem:[#allocation2 + $0x94] sm:$0xf]  ;;  %820 = vst [vmem:[#allocation2 + $0x98] sm:$0xf] %v668_v9  ;;  %v1089_v27 = vshrl.u32 %v863_v21, 16  ;;  %v2502_v1 = vsel %vm7728_vm7, %v2494_v49, %v2501_v46 }
 0x138   : > { %v1972_v28 = vshrl.u32 %v1731_v23, 16  ;;  %v584_v32 = vpop.f32.mrf.mxu0  ;;  %v1975_v38 = vshll.u32 %v1731_v23, 16  ;;  %v1092_v52 = vshll.u32 %v863_v21, 16  ;;  %v8011_v12 = vrot.slane %v2504_v19, 11  ;;  %v1736_v63 = vld [vmem:[#allocation2 + $0xac] sm:$0x1] }
 0x139   : > { %v1970_v25 = vsel %vm7737_vm10, %v1965_v13, %v1969_v60  ;;  %v1543_v34 = vpack.c.b16 %v1520_v20, %v1519_v18  ;;  %v585_v39 = vadd.f32 %v7948_v16, %v584_v32  ;;  %v1091_v44 = vrot.slane %v1089_v27, 7 }
 0x13a   : > { %v2173_v36 = vunpack.c.l.b16 %v1970_v25  ;;  %v1974_v50 = vrot.slane %v1972_v28, 4  ;;  %v1977_v51 = vrot.slane %v1975_v38, 5  ;;  %v2514_v13 = vor.u32 %v2512_v57, %v7998_v33  ;;  %v2401_v38 = vld [vmem:[#allocation2 + $0x50] sm:$0x8] }
 0x13b   : > { %1663 = vmatmul.bf16.gmra.mxu2 %v1543_v34  ;;  %v637_v48 = vmax.f32 %v585_v39, 0.0  ;;  %2931 = vmatmul.bf16.gmra.mxu0 %v2839_v0  ;;  %v1094_v61 = vor.u32 %v1092_v52, %v1091_v44  ;;  %v2518_v17 = vshrl.u32 %v8004_v56, 16  ;;  %v1096_v24 = vrot.slane %v1091_v44, 4  ;;  %v8024_v39 = vpop.f32.mrf.mxu2  ;;  %v865_v44 = vld [vmem:[#allocation2 + $0xa0] sm:$0x8] }
 0x13c   : > { %v2196_v43 = vpack.c.b16 %v2173_v36, %v2172_v35  ;;  %v8002_v54 = vpop.f32.mrf.mxu1  ;;  %v1978_v5 = vor.u32 %v1977_v51, %v1974_v50  ;;  %v1993_v25 = vrot.slane %v1991_v3, 5  ;;  %v2810_v32 = vunpack.c.l.b16 %v2493_v62 }
 0x13d   : > { %v669_v14 = vpack.c.bf16 %v637_v48, %v637_v48  ;;  %v1095_v23 = vsel %vm7728_vm7, %v6473_v55, %v1094_v61  ;;  %v2811_v34 = vunpack.c.l.b16 %v2502_v1  ;;  %v2515_v35 = vsel %vm7728_vm7, %v8011_v12, %v2514_v13 }
 0x13e   : > { %2316 = vmatmul.bf16.gmra.mxu3 %v2196_v43  ;;  %v7285_v58 = vld [vmem:[#allocation2 + $0x94] sm:$0xff]  ;;  %v1979_v29 = vrot.slane %v1978_v5, 4  ;;  %v2520_v36 = vrot.slane %v2518_v17, 7  ;;  %v1521_v46 = vunpack.c.l.b16 %v1095_v23  ;;  %v2521_v49 = vshll.u32 %v8004_v56, 16 }
 0x13f   : > { %v864_v60 = vld [vmem:[#allocation2 + $0x98] sm:$0xf]  ;;  %821 = vst [vmem:[#allocation2 + $0xa4] sm:$0xf] %v669_v14  ;;  %1467 = vmatmul.bf16.gmra.mxu1 %v7285_v58  ;;  %v786_v51 = vsel %vm7693_vm5, 0, %v785_v45  ;;  %v7378_v14 = vld [vmem:[%s9411_s3 + $0x1b0] sm:$0xff]  ;;  %v2840_v1 = vpack.c.b16 %v2811_v34, %v2810_v32  ;;  %v8046_v17 = vunpack.c.l.b16 %v2515_v35 }
 0x140   : > { %v1732_v2 = vld [vmem:[#allocation2 + $0x98] sm:$0xf]  ;;  %v1098_v4 = vshrl.u32 %v864_v60, 16  ;;  %v586_v11 = vpop.f32.mrf.mxu0  ;;  %v1101_v7 = vshll.u32 %v864_v60, 16  ;;  %v2526_v55 = vshrl.u32 %v2401_v38, 16  ;;  %v2516_v3 = vrot.slane %v7998_v33, 4  ;;  %4534 = vmatpush.bf16.msrb.mxu3 %v7378_v14 }
 0x141   : > { %v1981_v6 = vshll.u32 %v1732_v2, 16  ;;  %v1985_v9 = vshrl.u32 %v1732_v2, 16  ;;  %v587_v18 = vadd.f32 %v7948_v16, %v586_v11  ;;  %787 = vst [vmem:[#allocation2 + $0xbc] sm:$0x1] %v786_v51  ;;  %v1106_v2 = vshrl.u32 %v865_v44, 16 }
 0x142   : > { %v1100_v20 = vrot.slane %v1098_v4, 7  ;;  %v2402_v4 = vld [vmem:[#allocation2 + $0x54] sm:$0xf]  ;;  %v8044_v5 = vld [vmem:[#allocation2 + $0x58] sm:$0xf] }
 0x143   : > { %v1983_v21 = vrot.slane %v1981_v6, 5  ;;  %v1987_v22 = vrot.slane %v1985_v9, 4  ;;  %v638_v27 = vmax.f32 %v587_v18, 0.0  ;;  %v2523_v9 = vor.u32 %v2521_v49, %v2520_v36  ;;  %v740_v18 = vld [vmem:[#allocation2 + $0xc0] sm:$0x8] }
 0x144   : > { %v1103_v28 = vor.u32 %v1101_v7, %v1100_v20  ;;  %v8026_v40 = vpop.f32.mrf.mxu1  ;;  %v8048_v20 = vrot.slane %v2526_v55, 11  ;;  %v2531_v33 = vshrl.u32 %v2402_v4, 16 }
 0x145   : > { %v1988_v30 = vor.u32 %v1987_v22, %v1983_v21  ;;  %v670_v0 = vpack.c.bf16 %v638_v27, %v638_v27  ;;  %v1984_v42 = vsel %vm7737_vm10, %v1979_v29, %v1983_v21  ;;  %v2540_v21 = vshrl.u32 %v8044_v5, 16 }
 0x146   : > { %v1104_v41 = vsel %vm7728_vm7, %v1096_v24, %v1103_v28  ;;  %v866_v48 = vld [vmem:[#allocation2 + $0xa4] sm:$0xf]  ;;  %v2174_v56 = vunpack.c.l.b16 %v1984_v42  ;;  %v741_v22 = vsel %vm7683_vm2, 0, %v740_v18  ;;  %v6474_v27 = vrot.slane %v1106_v2, 11 }
 0x147   : > { %v1989_v43 = vrot.slane %v1988_v30, 4  ;;  %v1522_v47 = vunpack.c.l.b16 %v1104_v41  ;;  %v1734_v50 = vld [vmem:[#allocation2 + $0xa4] sm:$0xf]  ;;  %822 = vst [vmem:[#allocation2 + $0xa8] sm:$0xf] %v670_v0  ;;  %v1111_v19 = vshrl.u32 %v866_v48, 16  ;;  %v2524_v35 = vsel %vm7728_vm7, %v2516_v3, %v2523_v9 }
 0x148   : > { %v1996_v53 = vshrl.u32 %v1734_v50, 16  ;;  %v589_v57 = vpop.f32.mrf.mxu0  ;;  %v1999_v61 = vshll.u32 %v1734_v50, 16  ;;  %v1114_v28 = vshll.u32 %v866_v48, 16  ;;  %v2534_v29 = vshll.u32 %v2402_v4, 16  ;;  %742 = vst [vmem:[#allocation2 + $0xc0] sm:$0x8] %v741_v22 }
 0x149   : > { %v1994_v52 = vsel %vm7737_vm10, %v1989_v43, %v1993_v25  ;;  %v1544_v58 = vpack.c.b16 %v1522_v47, %v1521_v46  ;;  %v590_v62 = vadd.f32 %v7948_v16, %v589_v57  ;;  %v1113_v13 = vrot.slane %v1111_v19, 7 }
 0x14a   : > { %v2175_v60 = vunpack.c.l.b16 %v1994_v52  ;;  %v1998_v11 = vrot.slane %v1996_v53, 4  ;;  %v2001_v7 = vrot.slane %v1999_v61, 5  ;;  %v2015_v0 = vshll.u32 %v1736_v63, 16  ;;  %v2404_v53 = vld [vmem:[#allocation2 + $0x60] sm:$0x8] }
 0x14b   : > { %1668 = vmatmul.bf16.gmra.mxu2 %v1544_v58  ;;  %v639_v12 = vmax.f32 %v590_v62, 0.0  ;;  %2936 = vmatmul.bf16.gmra.mxu0 %v2840_v1  ;;  %v1116_v42 = vor.u32 %v1114_v28, %v1113_v13  ;;  %v2542_v49 = vrot.slane %v2540_v21, 7  ;;  %v1118_v14 = vrot.slane %v1113_v13, 4  ;;  %v788_v63 = vld [vmem:[#allocation2 + $0xcc] sm:$0x1] }
 0x14c   : > { %v2197_v6 = vpack.c.b16 %v2175_v60, %v2174_v56  ;;  %v8053_v25 = vpop.f32.mrf.mxu1  ;;  %v2002_v38 = vor.u32 %v2001_v7, %v1998_v11  ;;  %v2017_v57 = vrot.slane %v2015_v0, 5  ;;  %v2543_v58 = vshll.u32 %v8044_v5, 16 }
 0x14d   : > { %v671_v23 = vpack.c.bf16 %v639_v12, %v639_v12  ;;  %v1117_v60 = vsel %vm7728_vm7, %v6474_v27, %v1116_v42  ;;  %v2813_v1 = vunpack.c.l.b16 %v2524_v35  ;;  %v2548_v4 = vshrl.u32 %v2404_v53, 16  ;;  %v868_v12 = vld [vmem:[#allocation2 + $0xb0] sm:$0x8] }
 0x14e   : > { %2321 = vmatmul.bf16.gmra.mxu3 %v2197_v6  ;;  %v1629_v24 = vpop.f32.mrf.mxu2  ;;  %v7286_v32 = vld [vmem:[#allocation2 + $0xa4] sm:$0xff]  ;;  %v2003_v55 = vrot.slane %v2002_v38, 4  ;;  %v2545_v13 = vor.u32 %v2543_v58, %v2542_v49  ;;  %v743_v53 = vld [vmem:[#allocation2 + $0xd0] sm:$0x8] }
 0x14f   : > { %v1630_v30 = vadd.f32 %v1629_v24, %v8002_v54  ;;  %v867_v34 = vld [vmem:[#allocation2 + $0xa8] sm:$0xf]  ;;  %823 = vst [vmem:[#allocation2 + $0xb4] sm:$0xf] %v671_v23  ;;  %1472 = vmatmul.bf16.gmra.mxu1 %v7286_v32  ;;  %v8060_v54 = vrot.slane %v2531_v33, 7  ;;  %v1523_v33 = vunpack.c.l.b16 %v1117_v60  ;;  %v789_v24 = vsel %vm7693_vm5, 0, %v788_v63 }
 0x150   : > { %v1735_v36 = vld [vmem:[#allocation2 + $0xa8] sm:$0xf]  ;;  %v1120_v43 = vshrl.u32 %v867_v34, 16  ;;  %v591_v47 = vpop.f32.mrf.mxu0  ;;  %v1123_v48 = vshll.u32 %v867_v34, 16  ;;  %790 = vst [vmem:[#allocation2 + $0xcc] sm:$0x1] %v789_v24  ;;  %v2841_v42 = vpack.c.b16 %v2813_v1, %v8046_v17 }
 0x151   : > { %v2282_v41 = vpop.f32.mrf.mxu3  ;;  %v2005_v44 = vshll.u32 %v1735_v36, 16  ;;  %v2009_v45 = vshrl.u32 %v1735_v36, 16  ;;  %v592_v50 = vadd.f32 %v7948_v16, %v591_v47  ;;  %v2536_v3 = vor.u32 %v2534_v29, %v8060_v54  ;;  %v7341_v34 = vld [vmem:[%s9411_s3 + $0x108] sm:$0xff]  ;;  %v8086_v47 = vld [vmem:[#allocation2 + $0x14] sm:$0xf] }
 0x152   : > { %v8058_v46 = vadd.f32 %v2282_v41, %v1630_v30  ;;  %v1122_v51 = vrot.slane %v1120_v43, 7  ;;  %v1128_v43 = vshrl.u32 %v868_v12, 16  ;;  %3206 = vmatpush.bf16.msrb.mxu1 %v7341_v34 }
 0x153   : > { %v2007_v52 = vrot.slane %v2005_v44, 5  ;;  %v2011_v19 = vrot.slane %v2009_v45, 4  ;;  %v640_v56 = vmax.f32 %v592_v50, 0.0  ;;  %v2538_v44 = vrot.slane %v8060_v54, 4  ;;  %v2405_v45 = vld [vmem:[#allocation2 + $0x64] sm:$0xf] }
 0x154   : > { %v1125_v61 = vor.u32 %v1123_v48, %v1122_v51  ;;  %v8069_v11 = vpop.f32.mrf.mxu1  ;;  %v2537_v49 = vsel %vm7728_vm7, %v8048_v20, %v2536_v3  ;;  %v1739_v54 = vld [vmem:[#allocation2 + $0xbc] sm:$0x1]  ;;  %v3370_v20 = vshrl.u32 %v8086_v47, 16 }
 0x155   : > { %v2012_v62 = vor.u32 %v2011_v19, %v2007_v52  ;;  %v2008_v2 = vsel %vm7737_vm10, %v2003_v55, %v2007_v52  ;;  %v672_v6 = vpack.c.bf16 %v640_v56, %v640_v56  ;;  %v8093_v17 = vsel %vm7728_vm7, %v2538_v44, %v2545_v13 }
 0x156   : > { %v1631_v9 = vpop.f32.mrf.mxu2  ;;  %v1126_v5 = vsel %vm7728_vm7, %v1118_v14, %v1125_v61  ;;  %v869_v22 = vld [vmem:[#allocation2 + $0xb4] sm:$0xf]  ;;  %v2176_v29 = vunpack.c.l.b16 %v2008_v2  ;;  %v8095_v14 = vrot.slane %v2548_v4, 11  ;;  %v2553_v55 = vshrl.u32 %v2405_v45, 16  ;;  %v8104_v2 = vld [vmem:[#allocation2 + $0x68] sm:$0xf] }
 0x157   : > { %v2013_v7 = vrot.slane %v2012_v62, 4  ;;  %v1632_v18 = vadd.f32 %v1631_v9, %v8026_v40  ;;  %v1524_v21 = vunpack.c.l.b16 %v1126_v5  ;;  %v1737_v23 = vld [vmem:[#allocation2 + $0xb4] sm:$0xf]  ;;  %824 = vst [vmem:[#allocation2 + $0xb8] sm:$0xf] %v672_v6  ;;  %v1133_v30 = vshrl.u32 %v869_v22, 16 }
 0x158   : > { %v2020_v32 = vshrl.u32 %v1737_v23, 16  ;;  %v594_v35 = vpop.f32.mrf.mxu0  ;;  %v2023_v0 = vshll.u32 %v1737_v23, 16  ;;  %v6475_v61 = vrot.slane %v1128_v43, 11  ;;  %v1136_v62 = vshll.u32 %v869_v22, 16 }
 0x159   : > { %v2284_v27 = vpop.f32.mrf.mxu3  ;;  %v2018_v28 = vsel %vm7737_vm10, %v2013_v7, %v2017_v57  ;;  %v1545_v36 = vpack.c.b16 %v1524_v21, %v1523_v33  ;;  %v595_v41 = vadd.f32 %v7948_v16, %v594_v35  ;;  %v1135_v19 = vrot.slane %v1133_v30, 7  ;;  %v2407_v35 = vld [vmem:[#allocation2 + $0x70] sm:$0x8] }
 0x15a   : > { %v8081_v40 = vadd.f32 %v2284_v27, %v1632_v18  ;;  %v2177_v38 = vunpack.c.l.b16 %v2018_v28  ;;  %v2022_v50 = vrot.slane %v2020_v32, 4  ;;  %v2025_v51 = vrot.slane %v2023_v0, 5  ;;  %v7353_v28 = vld [vmem:[%s9411_s3 + $0x168] sm:$0xff] }
 0x15b   : > { %1673 = vmatmul.bf16.gmra.mxu2 %v1545_v36  ;;  %v641_v52 = vmax.f32 %v595_v41, 0.0  ;;  %2941 = vmatmul.bf16.gmra.mxu0 %v2841_v42  ;;  %v744_v57 = vsel %vm7683_vm2, 0, %v743_v53  ;;  %v8102_v1 = vunpack.c.l.b16 %v2537_v49  ;;  %v2815_v9 = vunpack.c.l.b16 %v8093_v17 }
 0x15c   : > { %v2198_v48 = vpack.c.b16 %v2177_v38, %v2176_v29  ;;  %v8100_v60 = vpop.f32.mrf.mxu1  ;;  %745 = vst [vmem:[#allocation2 + $0xd0] sm:$0x8] %v744_v57  ;;  %v2026_v7 = vor.u32 %v2025_v51, %v2022_v50  ;;  %v2039_v12 = vshll.u32 %v1739_v54, 16  ;;  %v1138_v63 = vor.u32 %v1136_v62, %v1135_v19  ;;  %3884 = vmatpush.bf16.msrb.mxu2 %v7353_v28  ;;  %v871_v57 = vld [vmem:[#allocation2 + $0xc0] sm:$0x8] }
 0x15d   : > { %v673_v58 = vpack.c.bf16 %v641_v52, %v641_v52  ;;  %v8110_v27 = vrot.slane %v2553_v55, 7  ;;  %v1140_v36 = vrot.slane %v1135_v19, 4  ;;  %v2556_v41 = vshll.u32 %v2405_v45, 16 }
 0x15e   : > { %2326 = vmatmul.bf16.gmra.mxu3 %v2198_v48  ;;  %v1634_v56 = vpop.f32.mrf.mxu2  ;;  %v7287_v4 = vld [vmem:[#allocation2 + $0xb4] sm:$0xff]  ;;  %v2027_v38 = vrot.slane %v2026_v7, 4  ;;  %v2041_v0 = vrot.slane %v2039_v12, 5  ;;  %v1139_v43 = vsel %vm7728_vm7, %v6475_v61, %v1138_v63  ;;  %v2565_v51 = vshll.u32 %v8104_v2, 16 }
 0x15f   : > { %v1635_v3 = vadd.f32 %v1634_v56, %v8053_v25  ;;  %v870_v6 = vld [vmem:[#allocation2 + $0xb8] sm:$0xf]  ;;  %825 = vst [vmem:[#allocation2 + $0xc4] sm:$0xf] %v673_v58  ;;  %1477 = vmatmul.bf16.gmra.mxu1 %v7287_v4  ;;  %v2562_v25 = vshrl.u32 %v8104_v2, 16  ;;  %v2558_v50 = vor.u32 %v2556_v41, %v8110_v27  ;;  %v2570_v52 = vshrl.u32 %v2407_v35, 16 }
 0x160   : > { %v1738_v5 = vld [vmem:[#allocation2 + $0xb8] sm:$0xf]  ;;  %v1142_v18 = vshrl.u32 %v870_v6, 16  ;;  %v596_v23 = vpop.f32.mrf.mxu0  ;;  %v1145_v24 = vshll.u32 %v870_v6, 16  ;;  %v791_v56 = vld [vmem:[#allocation2 + $0xdc] sm:$0x1]  ;;  %v1525_v62 = vunpack.c.l.b16 %v1139_v43  ;;  %v2842_v28 = vpack.c.b16 %v2815_v9, %v8102_v1 }
 0x161   : > { %v2287_v13 = vpop.f32.mrf.mxu3  ;;  %v2029_v33 = vshll.u32 %v1738_v5, 16  ;;  %v2033_v21 = vshrl.u32 %v1738_v5, 16  ;;  %v597_v29 = vadd.f32 %v7948_v16, %v596_v23  ;;  %v2564_v58 = vrot.slane %v2562_v25, 7  ;;  %v746_v43 = vld [vmem:[#allocation2 + $0xe0] sm:$0x8] }
 0x162   : > { %v8108_v22 = vadd.f32 %v2287_v13, %v1635_v3  ;;  %v1144_v30 = vrot.slane %v1142_v18, 7  ;;  %v792_v2 = vsel %vm7693_vm5, 0, %v791_v56  ;;  %v7377_v18 = vld [vmem:[%s9411_s3 + $0x1a8] sm:$0xff]  ;;  %v2560_v17 = vrot.slane %v8110_v27, 4 }
 0x163   : > { %v2031_v32 = vrot.slane %v2029_v33, 5  ;;  %v2035_v34 = vrot.slane %v2033_v21, 4  ;;  %v642_v42 = vmax.f32 %v597_v29, 0.0  ;;  %793 = vst [vmem:[#allocation2 + $0xdc] sm:$0x1] %v792_v2  ;;  %v1150_v29 = vshrl.u32 %v871_v57, 16  ;;  %4535 = vmatpush.bf16.msrb.mxu3 %v7377_v18 }
 0x164   : > { %v1147_v44 = vor.u32 %v1145_v24, %v1144_v30  ;;  %v8123_v53 = vpop.f32.mrf.mxu1  ;;  %v2559_v30 = vsel %vm7728_vm7, %v8095_v14, %v2558_v50  ;;  %v2567_v35 = vor.u32 %v2565_v51, %v2564_v58  ;;  %v8145_v1 = vrot.slane %v2570_v52, 11 }
 0x165   : > { %v2036_v48 = vor.u32 %v2035_v34, %v2031_v32  ;;  %v2032_v49 = vsel %vm7737_vm10, %v2027_v38, %v2031_v32  ;;  %v674_v54 = vpack.c.bf16 %v642_v42, %v642_v42  ;;  %v2408_v32 = vld [vmem:[#allocation2 + $0x74] sm:$0xf]  ;;  %v1742_v42 = vld [vmem:[#allocation2 + $0xcc] sm:$0x1]  ;;  %v747_v14 = vsel %vm7683_vm2, 0, %v746_v43 }
 0x166   : > { %v1636_v19 = vpop.f32.mrf.mxu2  ;;  %v1148_v45 = vsel %vm7728_vm7, %v1140_v36, %v1147_v44  ;;  %v872_v4 = vld [vmem:[#allocation2 + $0xc4] sm:$0xf]  ;;  %v2178_v12 = vunpack.c.l.b16 %v2032_v49  ;;  %v2575_v9 = vshrl.u32 %v2408_v32, 16  ;;  %v6476_v50 = vrot.slane %v1150_v29, 11  ;;  %748 = vst [vmem:[#allocation2 + $0xe0] sm:$0x8] %v747_v14 }
 0x167   : > { %v2037_v55 = vrot.slane %v2036_v48, 4  ;;  %v1637_v61 = vadd.f32 %v1636_v19, %v8069_v11  ;;  %v1526_v3 = vunpack.c.l.b16 %v1148_v45  ;;  %v1740_v6 = vld [vmem:[#allocation2 + $0xc4] sm:$0xf]  ;;  %826 = vst [vmem:[#allocation2 + $0xc8] sm:$0xf] %v674_v54  ;;  %v1155_v13 = vshrl.u32 %v872_v4, 16 }
 0x168   : > { %v2044_v63 = vshrl.u32 %v1740_v6, 16  ;;  %v599_v33 = vpop.f32.mrf.mxu0  ;;  %v2047_v24 = vshll.u32 %v1740_v6, 16  ;;  %v1158_v51 = vshll.u32 %v872_v4, 16  ;;  %v8151_v54 = vunpack.c.l.b16 %v2559_v30  ;;  %v8153_v19 = vld [vmem:[#allocation2 + $0x78] sm:$0xf] }
 0x169   : > { %v2289_v5 = vpop.f32.mrf.mxu3  ;;  %v2042_v7 = vsel %vm7737_vm10, %v2037_v55, %v2041_v0  ;;  %v1546_v21 = vpack.c.b16 %v1526_v3, %v1525_v62  ;;  %v600_v25 = vadd.f32 %v7948_v16, %v599_v33  ;;  %v1157_v41 = vrot.slane %v1155_v13, 7 }
 0x16a   : > { %v8135_v11 = vadd.f32 %v2289_v5, %v1637_v61  ;;  %v2179_v23 = vunpack.c.l.b16 %v2042_v7  ;;  %v2046_v36 = vrot.slane %v2044_v63, 4  ;;  %v2049_v38 = vrot.slane %v2047_v24, 5 }
 0x16b   : > { %1678 = vmatmul.bf16.gmra.mxu2 %v1546_v21  ;;  %v643_v0 = vmax.f32 %v600_v25, 0.0  ;;  %2946 = vmatmul.bf16.gmra.mxu0 %v2842_v28  ;;  %v2568_v55 = vsel %vm7728_vm7, %v2560_v17, %v2567_v35  ;;  %v2063_v56 = vshll.u32 %v1742_v42, 16  ;;  %v1160_v62 = vor.u32 %v1158_v51, %v1157_v41 }
 0x16c   : > { %v2199_v34 = vpack.c.b16 %v2179_v23, %v2178_v12  ;;  %v8149_v49 = vpop.f32.mrf.mxu1  ;;  %v2050_v58 = vor.u32 %v2049_v38, %v2046_v36  ;;  %v2584_v12 = vshrl.u32 %v8153_v19, 16  ;;  %v1162_v21 = vrot.slane %v1157_v41, 4 }
 0x16d   : > { %v675_v44 = vpack.c.bf16 %v643_v0, %v643_v0  ;;  %v2065_v24 = vrot.slane %v2063_v56, 5  ;;  %v2578_v25 = vshll.u32 %v2408_v32, 16  ;;  %v1161_v29 = vsel %vm7728_vm7, %v6476_v50, %v1160_v62 }
 0x16e   : > { %2331 = vmatmul.bf16.gmra.mxu3 %v2199_v34  ;;  %v1639_v48 = vpop.f32.mrf.mxu2  ;;  %v7288_v27 = vld [vmem:[#allocation2 + $0xc4] sm:$0xff]  ;;  %v2051_v23 = vrot.slane %v2050_v58, 4  ;;  %v2817_v35 = vunpack.c.l.b16 %v2568_v55  ;;  %v2587_v0 = vshll.u32 %v8153_v19, 16  ;;  %v2586_v14 = vrot.slane %v2584_v12, 7 }
 0x16f   : > { %v1640_v45 = vadd.f32 %v1639_v48, %v8100_v60  ;;  %v873_v52 = vld [vmem:[#allocation2 + $0xc8] sm:$0xf]  ;;  %827 = vst [vmem:[#allocation2 + $0xd4] sm:$0xf] %v675_v44  ;;  %1482 = vmatmul.bf16.gmra.mxu1 %v7288_v27  ;;  %v8160_v60 = vrot.slane %v2575_v9, 7  ;;  %v1527_v50 = vunpack.c.l.b16 %v1161_v29 }
 0x170   : > { %v1741_v57 = vld [vmem:[#allocation2 + $0xc8] sm:$0xf]  ;;  %v1164_v3 = vshrl.u32 %v873_v52, 16  ;;  %v601_v5 = vpop.f32.mrf.mxu0  ;;  %v1167_v7 = vshll.u32 %v873_v52, 16  ;;  %v874_v9 = vld [vmem:[#allocation2 + $0xd0] sm:$0x8] }
 0x171   : > { %v2292_v61 = vpop.f32.mrf.mxu3  ;;  %v2053_v4 = vshll.u32 %v1741_v57, 16  ;;  %v2057_v6 = vshrl.u32 %v1741_v57, 16  ;;  %v602_v13 = vadd.f32 %v7948_v16, %v601_v5  ;;  %v2580_v38 = vor.u32 %v2578_v25, %v8160_v60  ;;  %v794_v44 = vld [vmem:[#allocation2 + $0xec] sm:$0x1]  ;;  %v749_v29 = vld [vmem:[#allocation2 + $0xf0] sm:$0x8] }
 0x172   : > { %v8158_v2 = vadd.f32 %v2292_v61, %v1640_v45  ;;  %v1166_v63 = vrot.slane %v1164_v3, 7  ;;  %v795_v19 = vsel %vm7693_vm5, 0, %v794_v44  ;;  %v7340_v61 = vld [vmem:[%s9411_s3 + $0x100] sm:$0xff]  ;;  %v1172_v12 = vshrl.u32 %v874_v9, 16 }
 0x173   : > { %v2055_v18 = vrot.slane %v2053_v4, 5  ;;  %v2059_v33 = vrot.slane %v2057_v6, 4  ;;  %v644_v28 = vmax.f32 %v602_v13, 0.0  ;;  %796 = vst [vmem:[#allocation2 + $0xec] sm:$0x1] %v795_v19  ;;  %v2581_v13 = vsel %vm7728_vm7, %v8145_v1, %v2580_v38  ;;  %3207 = vmatpush.bf16.msrb.mxu1 %v7340_v61 }
 0x174   : > { %v1169_v30 = vor.u32 %v1167_v7, %v1166_v63  ;;  %v8170_v41 = vpop.f32.mrf.mxu1  ;;  %v2843_v7 = vpack.c.b16 %v2817_v35, %v8151_v54  ;;  %v2410_v63 = vld [vmem:[#allocation2 + $0x80] sm:$0x8]  ;;  %v2582_v54 = vrot.slane %v8160_v60, 4  ;;  %v750_v1 = vsel %vm7683_vm2, 0, %v749_v29 }
 0x175   : > { %v2060_v34 = vor.u32 %v2059_v33, %v2055_v18  ;;  %v2056_v36 = vsel %vm7737_vm10, %v2051_v23, %v2055_v18  ;;  %v676_v42 = vpack.c.bf16 %v644_v28, %v644_v28  ;;  %v2589_v33 = vor.u32 %v2587_v0, %v2586_v14  ;;  %v1745_v28 = vld [vmem:[#allocation2 + $0xdc] sm:$0x1]  ;;  %751 = vst [vmem:[#allocation2 + $0xf0] sm:$0x8] %v750_v1 }
 0x176   : > { %v1641_v43 = vpop.f32.mrf.mxu2  ;;  %v1170_v32 = vsel %vm7728_vm7, %v1162_v21, %v1169_v30  ;;  %v875_v45 = vld [vmem:[#allocation2 + $0xd4] sm:$0xf]  ;;  %v2180_v57 = vunpack.c.l.b16 %v2056_v36  ;;  %v8190_v30 = vld [vmem:[#allocation2 + $0x84] sm:$0xf]  ;;  %v3373_v35 = vshll.u32 %v8086_v47, 16 }
 0x177   : > { %v2061_v17 = vrot.slane %v2060_v34, 4  ;;  %v1642_v48 = vadd.f32 %v1641_v43, %v8123_v53  ;;  %v1528_v51 = vunpack.c.l.b16 %v1170_v32  ;;  %v1743_v27 = vld [vmem:[#allocation2 + $0xd4] sm:$0xf]  ;;  %828 = vst [vmem:[#allocation2 + $0xd8] sm:$0xf] %v676_v42  ;;  %v1177_v58 = vshrl.u32 %v875_v45, 16 }
 0x178   : > { %v2068_v56 = vshrl.u32 %v1743_v27, 16  ;;  %v604_v62 = vpop.f32.mrf.mxu0  ;;  %v2071_v6 = vshll.u32 %v1743_v27, 16  ;;  %v2592_v34 = vshrl.u32 %v2410_v63, 16  ;;  %v6477_v42 = vrot.slane %v1172_v12, 11 }
 0x179   : > { %v2294_v52 = vpop.f32.mrf.mxu3  ;;  %v2066_v55 = vsel %vm7737_vm10, %v2061_v17, %v2065_v24  ;;  %v1547_v3 = vpack.c.b16 %v1528_v51, %v1527_v50  ;;  %v605_v5 = vadd.f32 %v7948_v16, %v604_v62  ;;  %v1179_v25 = vrot.slane %v1177_v58, 7  ;;  %v8199_v17 = vld [vmem:[#allocation2 + $0x88] sm:$0xf]  ;;  %v7352_v62 = vld [vmem:[%s9411_s3 + $0x160] sm:$0xff] }
 0x17a   : > { %v8182_v53 = vadd.f32 %v2294_v52, %v1642_v48  ;;  %v2181_v4 = vunpack.c.l.b16 %v2066_v55  ;;  %v2070_v21 = vrot.slane %v2068_v56, 4  ;;  %v2073_v23 = vrot.slane %v2071_v6, 5  ;;  %3885 = vmatpush.bf16.msrb.mxu2 %v7352_v62 }
 0x17b   : > { %1683 = vmatmul.bf16.gmra.mxu2 %v1547_v3  ;;  %v645_v24 = vmax.f32 %v605_v5, 0.0  ;;  %2951 = vmatmul.bf16.gmra.mxu0 %v2843_v7  ;;  %v1180_v43 = vshll.u32 %v875_v45, 16  ;;  %v8197_v32 = vunpack.c.l.b16 %v2581_v13  ;;  %v8204_v44 = vsel %vm7728_vm7, %v2582_v54, %v2589_v33 }
 0x17c   : > { %v2200_v18 = vpack.c.b16 %v2181_v4, %v2180_v57  ;;  %v8195_v0 = vpop.f32.mrf.mxu1  ;;  %v2074_v50 = vor.u32 %v2073_v23, %v2070_v21  ;;  %v2087_v51 = vshll.u32 %v1745_v28, 16  ;;  %v2597_v56 = vshrl.u32 %v8190_v30, 16 }
 0x17d   : > { %v677_v36 = vpack.c.bf16 %v645_v24, %v645_v24  ;;  %v1182_v19 = vor.u32 %v1180_v43, %v1179_v25  ;;  %v2606_v61 = vshrl.u32 %v8199_v17, 16  ;;  %v1184_v7 = vrot.slane %v1179_v25, 4  ;;  %v797_v43 = vld [vmem:[#allocation2 + $0xfc] sm:$0x1] }
 0x17e   : > { %2336 = vmatmul.bf16.gmra.mxu3 %v2200_v18  ;;  %v1644_v38 = vpop.f32.mrf.mxu2  ;;  %v7289_v9 = vld [vmem:[#allocation2 + $0xd4] sm:$0xff]  ;;  %v2075_v12 = vrot.slane %v2074_v50, 4  ;;  %v2089_v13 = vrot.slane %v2087_v51, 5  ;;  %v8214_v63 = vrot.slane %v2592_v34, 11  ;;  %v2819_v24 = vunpack.c.l.b16 %v8204_v44 }
 0x17f   : > { %v1645_v60 = vadd.f32 %v1644_v38, %v8149_v49  ;;  %v876_v14 = vld [vmem:[#allocation2 + $0xd8] sm:$0xf]  ;;  %829 = vst [vmem:[#allocation2 + $0xe4] sm:$0xf] %v677_v36  ;;  %1487 = vmatmul.bf16.gmra.mxu1 %v7289_v9  ;;  %v1183_v33 = vsel %vm7728_vm7, %v6477_v42, %v1182_v19  ;;  %v8221_v28 = vrot.slane %v2597_v56, 7  ;;  %v2600_v25 = vshll.u32 %v8190_v30, 16 }
 0x180   : > { %v1744_v48 = vld [vmem:[#allocation2 + $0xd8] sm:$0xf]  ;;  %v1186_v45 = vshrl.u32 %v876_v14, 16  ;;  %v606_v58 = vpop.f32.mrf.mxu0  ;;  %v1189_v49 = vshll.u32 %v876_v14, 16  ;;  %v877_v38 = vld [vmem:[#allocation2 + $0xe0] sm:$0x8]  ;;  %v1529_v9 = vunpack.c.l.b16 %v1183_v33 }
 0x181   : > { %v2297_v27 = vpop.f32.mrf.mxu3  ;;  %v2077_v52 = vshll.u32 %v1744_v48, 16  ;;  %v2081_v55 = vshrl.u32 %v1744_v48, 16  ;;  %v607_v3 = vadd.f32 %v7948_v16, %v606_v58  ;;  %v2608_v42 = vrot.slane %v2606_v61, 7  ;;  %v8241_v61 = vld [vmem:[%s9410_s2] ss:$0 sm:$0xff] }
 0x182   : > { %v8206_v57 = vadd.f32 %v2297_v27, %v1645_v60  ;;  %v1188_v4 = vrot.slane %v1186_v45, 7  ;;  %v798_v30 = vsel %vm7693_vm5, 0, %v797_v43 }
 0x183   : > { %v2079_v6 = vrot.slane %v2077_v52, 5  ;;  %v2083_v5 = vrot.slane %v2081_v55, 4  ;;  %v646_v18 = vmax.f32 %v607_v3, 0.0  ;;  %v7376_v52 = vld [vmem:[%s9411_s3 + $0x1a0] sm:$0xff]  ;;  %799 = vst [vmem:[#allocation2 + $0xfc] sm:$0x1] %v798_v30  ;;  %v2844_v3 = vpack.c.b16 %v2819_v24, %v8197_v32 }
 0x184   : > { %v1191_v21 = vor.u32 %v1189_v49, %v1188_v4  ;;  %v8224_v34 = vpop.f32.mrf.mxu1  ;;  %v1194_v4 = vshrl.u32 %v877_v38, 16  ;;  %4536 = vmatpush.bf16.msrb.mxu3 %v7376_v52  ;;  %v7351_v32 = vld [vmem:[%s9411_s3 + $0x158] sm:$0xff]  ;;  %v8258_v24 = vrot.slane %v3370_v20, 4 }
 0x185   : > { %v2084_v23 = vor.u32 %v2083_v5, %v2079_v6  ;;  %v2080_v16 = vsel %vm7737_vm10, %v2075_v12, %v2079_v6  ;;  %v678_v29 = vpack.c.bf16 %v646_v18, %v646_v18  ;;  %v8246_v6 = vor.u32 %v2600_v25, %v8221_v28  ;;  %v8248_v5 = vld [vmem:[#allocation2 + $0x90] sm:$0x8]  ;;  %v8270_v20 = vld [vmem:[#allocation2 + $0x98] sm:$0xf]  ;;  %3886 = vmatpush.bf16.msrb.mxu2 %v7351_v32  ;;  %v7349_v32 = vld [vmem:[%s9411_s3 + $0x148] sm:$0xff] }
 0x186   : > { %v1646_v54 = vpop.f32.mrf.mxu2  ;;  %v1192_v1 = vsel %vm7728_vm7, %v1184_v7, %v1191_v21  ;;  %v878_v44 = vld [vmem:[#allocation2 + $0xe4] sm:$0xf]  ;;  %v2182_v27 = vunpack.c.l.b16 %v2080_v16  ;;  %v2609_v12 = vshll.u32 %v8199_v17, 16  ;;  %v2604_v16 = vrot.slane %v8221_v28, 4 }
 0x187   : > { %v2085_v36 = vrot.slane %v2084_v23, 4  ;;  %v1647_v60 = vadd.f32 %v1646_v54, %v8170_v41  ;;  %v1530_v14 = vunpack.c.l.b16 %v1192_v1  ;;  %v1746_v48 = vld [vmem:[#allocation2 + $0xe4] sm:$0xf]  ;;  %830 = vst [vmem:[#allocation2 + $0xe8] sm:$0xf] %v678_v29  ;;  %v1199_v19 = vshrl.u32 %v878_v44, 16 }
 0x188   : > { %v2092_v45 = vshrl.u32 %v1746_v48, 16  ;;  %v609_v55 = vpop.f32.mrf.mxu0  ;;  %v2095_v56 = vshll.u32 %v1746_v48, 16  ;;  %v1748_v23 = vld [vmem:[#allocation2 + $0xec] sm:$0x1]  ;;  %v2611_v25 = vor.u32 %v2609_v12, %v2608_v42  ;;  %v2614_v17 = vshrl.u32 %v8248_v5, 16 }
 0x189   : > { %v2299_v50 = vpop.f32.mrf.mxu3  ;;  %v2090_v51 = vsel %vm7737_vm10, %v2085_v36, %v2089_v13  ;;  %v1548_v58 = vpack.c.b16 %v1530_v14, %v1529_v9  ;;  %v610_v62 = vadd.f32 %v8241_v61, %v609_v55  ;;  %v8251_v21 = vrot.slane %v1199_v19, 7  ;;  %v7375_v55 = vld [vmem:[%s9411_s3 + $0x198] sm:$0xff] }
 0x18a   : > { %v8236_v41 = vadd.f32 %v2299_v50, %v1647_v60  ;;  %v2183_v49 = vunpack.c.l.b16 %v2090_v51  ;;  %v2094_v13 = vrot.slane %v2092_v45, 4  ;;  %v2097_v18 = vrot.slane %v2095_v56, 5  ;;  %v8268_v60 = vld [vmem:[#allocation2 + $0x94] sm:$0xf]  ;;  %4537 = vmatpush.bf16.msrb.mxu3 %v7375_v55 }
 0x18b   : > { %1688 = vmatmul.bf16.gmra.mxu2 %v1548_v58  ;;  %v647_v33 = vmax.f32 %v610_v62, 0.0  ;;  %2956 = vmatmul.bf16.gmra.mxu0 %v2844_v3  ;;  %v8264_v29 = vrot.slane %v3373_v35, 5  ;;  %v6478_v38 = vrot.slane %v1194_v4, 11  ;;  %v1202_v43 = vshll.u32 %v878_v44, 16  ;;  %v7350_v58 = vld [vmem:[%s9411_s3 + $0x150] sm:$0xff] }
 0x18c   : > { %v2201_v7 = vpack.c.b16 %v2183_v49, %v2182_v27  ;;  %v8266_v36 = vpop.f32.mrf.mxu1  ;;  %v2603_v47 = vsel %vm7728_vm7, %v8214_v63, %v8246_v6  ;;  %v2098_v14 = vor.u32 %v2097_v18, %v2094_v13  ;;  %v2111_v48 = vshll.u32 %v1748_v23, 16  ;;  %v8289_v49 = vld [vmem:[#allocation2 + $0x18] sm:$0xf]  ;;  %3887 = vmatpush.bf16.msrb.mxu2 %v7350_v58  ;;  %v7374_v23 = vld [vmem:[%s9411_s3 + $0x190] sm:$0xff] }
 0x18d   : > { %v679_v54 = vpack.c.bf16 %v647_v33, %v647_v33  ;;  %v1204_v44 = vor.u32 %v1202_v43, %v8251_v21  ;;  %v2612_v52 = vsel %vm7728_vm7, %v2604_v16, %v2611_v25  ;;  %v2619_v63 = vshrl.u32 %v8268_v60, 16  ;;  %v7387_v6 = vld [vmem:[%s9411_s3 + $0x1f8] sm:$0xff] }
 0x18e   : > { %2341 = vmatmul.bf16.gmra.mxu3 %v2201_v7  ;;  %v1649_v1 = vpop.f32.mrf.mxu2  ;;  %v7290_v42 = vld [vmem:[#allocation2 + $0xe4] sm:$0xff]  ;;  %v7395_v7 = vld [vmem:[%s9411_s3 + $0x238] sm:$0xff]  ;;  %v1206_v12 = vrot.slane %v8251_v21, 4  ;;  %v2099_v13 = vrot.slane %v2098_v14, 4  ;;  %v2113_v18 = vrot.slane %v2111_v48, 5  ;;  %v2628_v33 = vshrl.u32 %v8270_v20, 16  ;;  %4815 = vmatpush.bf16.msra.mxu0 %v7387_v6 }
 0x18f   : > { %v1650_v28 = vadd.f32 %v1649_v1, %v8195_v0  ;;  %v879_v9 = vld [vmem:[#allocation2 + $0xe8] sm:$0xf]  ;;  %831 = vst [vmem:[#allocation2 + $0xf4] sm:$0xf] %v679_v54  ;;  %1492 = vmatmul.bf16.gmra.mxu1 %v7290_v42  ;;  %v1205_v25 = vsel %vm7728_vm7, %v6478_v38, %v1204_v44  ;;  %v2820_v1 = vunpack.c.l.b16 %v2603_v47  ;;  %v2821_v43 = vunpack.c.l.b16 %v2612_v52  ;;  %v880_v38 = vld [vmem:[#allocation2 + $0xf0] sm:$0x8]  ;;  %4538 = vmatpush.bf16.msrb.mxu3 %v7374_v23 }
 0x190   : > { %v1747_v35 = vld [vmem:[#allocation2 + $0xe8] sm:$0xf]  ;;  %v1208_v50 = vshrl.u32 %v879_v9, 16  ;;  %v611_v0 = vpop.f32.mrf.mxu0  ;;  %v1211_v45 = vshll.u32 %v879_v9, 16  ;;  %5497 = vmatpush.bf16.msra.mxu1 %v7395_v7  ;;  %v3379_v42 = vshll.u32 %v8289_v49, 16  ;;  %v8315_v44 = vrot.slane %v2619_v63, 7  ;;  %3888 = vmatpush.bf16.msrb.mxu2 %v7349_v32 }
 0x191   : > { %v2302_v30 = vpop.f32.mrf.mxu3  ;;  %v2101_v51 = vshll.u32 %v1747_v35, 16  ;;  %v2105_v27 = vshrl.u32 %v1747_v35, 16  ;;  %v612_v56 = vadd.f32 %v8241_v61, %v611_v0  ;;  %v1531_v47 = vunpack.c.l.b16 %v1205_v25  ;;  %v7373_v52 = vld [vmem:[%s9411_s3 + $0x188] sm:$0xff] }
 0x192   : > { %v8278_v19 = vadd.f32 %v2302_v30, %v1650_v28  ;;  %v1210_v62 = vrot.slane %v1208_v50, 7  ;;  %v2630_v0 = vrot.slane %v2628_v33, 7  ;;  %v2845_v33 = vpack.c.b16 %v2821_v43, %v2820_v1  ;;  %v1751_v43 = vld [vmem:[#allocation2 + $0xfc] sm:$0x1] }
 0x193   : > { %v2103_v3 = vrot.slane %v2101_v51, 5  ;;  %v2107_v4 = vrot.slane %v2105_v27, 4  ;;  %v648_v16 = vmax.f32 %v612_v56, 0.0  ;;  %v1216_v23 = vshrl.u32 %v880_v38, 16  ;;  %4539 = vmatpush.bf16.msrb.mxu3 %v7373_v52 }
 0x194   : > { %v1213_v54 = vor.u32 %v1211_v45, %v1210_v62  ;;  %v8311_v14 = vpop.f32.mrf.mxu1  ;;  %v3383_v32 = vshrl.u32 %v8289_v49, 16  ;;  %v2622_v25 = vshll.u32 %v8268_v60, 16  ;;  %v6680_v1 = vrot.slane %v2614_v17, 11 }
 0x195   : > { %v2108_v21 = vor.u32 %v2107_v4, %v2103_v3  ;;  %v2104_v28 = vsel %vm7737_vm10, %v2099_v13, %v2103_v3  ;;  %v680_v9 = vpack.c.bf16 %v648_v16, %v648_v16 }
 0x196   : > { %v1651_v35 = vpop.f32.mrf.mxu2  ;;  %v1214_v48 = vsel %vm7728_vm7, %v1206_v12, %v1213_v54  ;;  %v881_v27 = vld [vmem:[#allocation2 + $0xf4] sm:$0xf]  ;;  %v2184_v63 = vunpack.c.l.b16 %v2104_v28  ;;  %v7348_v12 = vld [vmem:[%s9411_s3 + $0x140] sm:$0xff]  ;;  %v2631_v54 = vshll.u32 %v8270_v20, 16  ;;  %v2624_v60 = vor.u32 %v2622_v25, %v8315_v44 }
 0x197   : > { %v2109_v30 = vrot.slane %v2108_v21, 4  ;;  %v1652_v50 = vadd.f32 %v1651_v35, %v8224_v34  ;;  %v1532_v51 = vunpack.c.l.b16 %v1214_v48  ;;  %v1749_v45 = vld [vmem:[#allocation2 + $0xf4] sm:$0xf]  ;;  %832 = vst [vmem:[#allocation2 + $0xf8] sm:$0xf] %v680_v9  ;;  %v1221_v56 = vshrl.u32 %v881_v27, 16  ;;  %3889 = vmatpush.bf16.msrb.mxu2 %v7348_v12 }
 0x198   : > { %v2116_v62 = vshrl.u32 %v1749_v45, 16  ;;  %v614_v3 = vpop.f32.mrf.mxu0  ;;  %v2119_v7 = vshll.u32 %v1749_v45, 16  ;;  %v7372_v21 = vld [vmem:[%s9411_s3 + $0x180] sm:$0xff]  ;;  %v1224_v35 = vshll.u32 %v881_v27, 16  ;;  %v2633_v48 = vor.u32 %v2631_v54, %v2630_v0 }
 0x199   : > { %v2304_v55 = vpop.f32.mrf.mxu3  ;;  %v2114_v58 = vsel %vm7737_vm10, %v2109_v30, %v2113_v18  ;;  %v1549_v4 = vpack.c.b16 %v1532_v51, %v1531_v47  ;;  %v615_v13 = vadd.f32 %v8241_v61, %v614_v3  ;;  %v8330_v16 = vrot.slane %v1221_v56, 7  ;;  %4540 = vmatpush.bf16.msrb.mxu3 %v7372_v21 }
 0x19a   : > { %v8323_v34 = vadd.f32 %v2304_v55, %v1652_v50  ;;  %v2185_v6 = vunpack.c.l.b16 %v2114_v58  ;;  %v2118_v49 = vrot.slane %v2116_v62, 4  ;;  %v2121_v9 = vrot.slane %v2119_v7, 5 }
 0x19b   : > { %1693 = vmatmul.bf16.gmra.mxu2 %v1549_v4  ;;  %v649_v28 = vmax.f32 %v615_v13, 0.0  ;;  %2961 = vmatmul.bf16.gmra.mxu0 %v2845_v33  ;;  %v8340_v20 = vrot.slane %v3379_v42, 5  ;;  %v6479_v47 = vrot.slane %v1216_v23, 11  ;;  %v2626_v51 = vrot.slane %v8315_v44, 4  ;;  %v3323_v33 = vld [vmem:[#allocation2 + $0x1c] sm:$0x1] }
 0x19c   : > { %v2202_v18 = vpack.c.b16 %v2185_v6, %v2184_v63  ;;  %v8342_v50 = vpop.f32.mrf.mxu1  ;;  %v8345_v5 = vrot.slane %v3383_v32, 4  ;;  %v1226_v27 = vor.u32 %v1224_v35, %v8330_v16  ;;  %v2135_v58 = vshll.u32 %v1751_v43, 16  ;;  %v2418_v43 = vld [vmem:[#allocation2 + $0xa8] sm:$0xf] }
 0x19d   : > { %v681_v30 = vpack.c.bf16 %v649_v28, %v649_v28  ;;  %v3376_v42 = vor.u32 %v8264_v29, %v8258_v24  ;;  %v2122_v56 = vor.u32 %v2121_v9, %v2118_v49  ;;  %v2625_v6 = vsel %vm7728_vm7, %v6680_v1, %v2624_v60  ;;  %v8363_v49 = vld [vmem:[#allocation2 + $0x24] sm:$0xf] }
 0x19e   : > { %2346 = vmatmul.bf16.gmra.mxu3 %v2202_v18  ;;  %v1654_v38 = vpop.f32.mrf.mxu2  ;;  %v7291_v45 = vld [vmem:[#allocation2 + $0xf4] sm:$0xff]  ;;  %v2634_v7 = vsel %vm7728_vm7, %v2626_v51, %v2633_v48  ;;  %v1227_v23 = vsel %vm7728_vm7, %v6479_v47, %v1226_v27  ;;  %v1228_v32 = vrot.slane %v8330_v16, 4  ;;  %v2137_v18 = vrot.slane %v2135_v58, 5  ;;  %v8367_v48 = vld [vmem:[#allocation2 + $0xa4] sm:$0xf] }
 0x19f   : > { %v1655_v17 = vadd.f32 %v1654_v38, %v8266_v36  ;;  %v882_v52 = vld [vmem:[#allocation2 + $0xf8] sm:$0xf]  ;;  %833 = vst [vmem:[#allocation2 + $0x104] sm:$0xf] %v681_v30  ;;  %1497 = vmatmul.bf16.gmra.mxu1 %v7291_v45  ;;  %v8361_v25 = vrot.slane %v3376_v42, 4  ;;  %v2123_v28 = vrot.slane %v2122_v56, 4  ;;  %v2823_v9 = vunpack.c.l.b16 %v2634_v7 }
 0x1a0   : > { %v1750_v55 = vld [vmem:[#allocation2 + $0xf8] sm:$0xf]  ;;  %v1230_v63 = vshrl.u32 %v882_v52, 16  ;;  %v616_v4 = vpop.f32.mrf.mxu0  ;;  %v1233_v36 = vshll.u32 %v882_v52, 16  ;;  %v3386_v35 = vor.u32 %v8345_v5, %v8340_v20  ;;  %v3389_v60 = vshll.u32 %v3323_v33, 16 }
 0x1a1   : > { %v2307_v0 = vpop.f32.mrf.mxu3  ;;  %v2125_v62 = vshll.u32 %v1750_v55, 16  ;;  %v2129_v44 = vshrl.u32 %v1750_v55, 16  ;;  %v617_v12 = vadd.f32 %v8241_v61, %v616_v4  ;;  %v2822_v61 = vunpack.c.l.b16 %v2625_v6  ;;  %v4006_v30 = vld [vmem:[#allocation2 + $0x28] sm:$0xf] }
 0x1a2   : > { %v8351_v3 = vadd.f32 %v2307_v0, %v1655_v17  ;;  %v1232_v24 = vrot.slane %v1230_v63, 7  ;;  %v1533_v27 = vunpack.c.l.b16 %v1227_v23  ;;  %v2650_v5 = vshrl.u32 %v2418_v43, 16  ;;  %v3324_v23 = vld [vmem:[#allocation2 + $0x24] sm:$0xf] }
 0x1a3   : > { %v2127_v29 = vrot.slane %v2125_v62, 5  ;;  %v2131_v13 = vrot.slane %v2129_v44, 4  ;;  %v650_v54 = vmax.f32 %v617_v12, 0.0  ;;  %v2641_v0 = vshrl.u32 %v8367_v48, 16 }
 0x1a4   : > { %v1235_v21 = vor.u32 %v1233_v36, %v1232_v24  ;;  %v8369_v47 = vpop.f32.mrf.mxu1  ;;  %v4058_v63 = vshrl.u32 %v8363_v49, 16  ;;  %v4067_v56 = vshrl.u32 %v4006_v30, 16  ;;  %v2846_v12 = vpack.c.b16 %v2823_v9, %v2822_v61  ;;  %v2416_v24 = vld [vmem:[#allocation2 + $0xa0] sm:$0x8] }
 0x1a5   : > { %v2132_v1 = vor.u32 %v2131_v13, %v2127_v29  ;;  %v682_v16 = vpack.c.bf16 %v650_v54, %v650_v54  ;;  %v2128_v17 = vsel %vm7737_vm10, %v2123_v28, %v2127_v29  ;;  %v3382_v13 = vsel %vm7737_vm10, %v8361_v25, %v8340_v20 }
 0x1a6   : > { %v1656_v38 = vpop.f32.mrf.mxu2  ;;  %v1236_v51 = vsel %vm7728_vm7, %v1228_v32, %v1235_v21  ;;  %v2186_v36 = vunpack.c.l.b16 %v2128_v17  ;;  %v2652_v33 = vrot.slane %v2650_v5, 7  ;;  %v3325_v32 = vld [vmem:[#allocation2 + $0x28] sm:$0xf]  ;;  %v3391_v54 = vrot.slane %v3389_v60, 5 }
 0x1a7   : > { %v2133_v45 = vrot.slane %v2132_v1, 4  ;;  %v1657_v52 = vadd.f32 %v1656_v38, %v8311_v14  ;;  %v1534_v55 = vunpack.c.l.b16 %v1236_v51  ;;  %834 = vst [vmem:[#allocation2 + $0x108] sm:$0xf] %v682_v16  ;;  %v4004_v14 = vld [vmem:[#allocation2 + $0x20] sm:$0x8]  ;;  %v4069_v28 = vrot.slane %v4067_v56, 7 }
 0x1a8   : > { %v2927_v44 = vpop.f32.mrf.mxu0  ;;  %v4053_v21 = vshrl.u32 %v4004_v14, 16  ;;  %v2643_v1 = vrot.slane %v2641_v0, 7  ;;  %v2653_v61 = vshll.u32 %v2418_v43, 16  ;;  %v4060_v9 = vrot.slane %v4058_v63, 7 }
 0x1a9   : > { %v2309_v58 = vpop.f32.mrf.mxu3  ;;  %v2138_v42 = vsel %vm7737_vm10, %v2133_v45, %v2137_v18  ;;  %v1550_v4 = vpack.c.b16 %v1534_v55, %v1533_v27  ;;  %v8383_v7 = vadd.f32 %v2927_v44, %v7885_v15  ;;  %v3387_v18 = vrot.slane %v3386_v35, 4 }
 0x1aa   : > { %v8380_v62 = vadd.f32 %v2309_v58, %v1657_v52  ;;  %v2187_v6 = vunpack.c.l.b16 %v2138_v42  ;;  %v2636_v15 = vshrl.u32 %v2416_v24, 16  ;;  %v4070_v51 = vshll.u32 %v4006_v30, 16  ;;  %v7316_v52 = vld [vmem:[#allocation2 + $0x14] sm:$0xff] }
 0x1ab   : > { %1698 = vmatmul.bf16.gmra.mxu2 %v1550_v4  ;;  %2966 = vmatmul.bf16.gmra.mxu0 %v2846_v12  ;;  %v3394_v17 = vshrl.u32 %v3324_v23, 16  ;;  %v3403_v45 = vshll.u32 %v3325_v32, 16  ;;  %v3407_v20 = vshrl.u32 %v3325_v32, 16  ;;  %v2644_v35 = vshll.u32 %v8367_v48, 16  ;;  %v7386_v48 = vld [vmem:[%s9411_s3 + $0x1f0] sm:$0xff] }
 0x1ac   : > { %v2203_v29 = vpack.c.b16 %v2187_v6, %v2186_v36  ;;  %v8389_v38 = vpop.f32.mrf.mxu1  ;;  %v2655_v60 = vor.u32 %v2653_v61, %v2652_v33  ;;  %v3397_v27 = vshll.u32 %v3324_v23, 16  ;;  %v3392_v5 = vsel %vm7737_vm10, %v3387_v18, %v3391_v54  ;;  %v3326_v12 = vld [vmem:[#allocation2 + $0x2c] sm:$0x1]  ;;  %4816 = vmatpush.bf16.msra.mxu0 %v7386_v48  ;;  %v2421_v23 = vld [vmem:[#allocation2 + $0xb8] sm:$0xf] }
 0x1ad   : > { %v6896_v43 = vrot.slane %v4053_v21, 11  ;;  %v4061_v58 = vshll.u32 %v8363_v49, 16  ;;  %v4072_v42 = vor.u32 %v4070_v51, %v4069_v28  ;;  %v6681_v63 = vrot.slane %v2636_v15, 11  ;;  %v7394_v49 = vld [vmem:[%s9411_s3 + $0x230] sm:$0xff]  ;;  %v4009_v28 = vld [vmem:[#allocation2 + $0x38] sm:$0xf] }
 0x1ae   : > { %2351 = vmatmul.bf16.gmra.mxu3 %v2203_v29  ;;  %v1659_v16 = vpop.f32.mrf.mxu2  ;;  %v2648_v56 = vrot.slane %v2643_v1, 4  ;;  %v4065_v4 = vrot.slane %v4060_v9, 4  ;;  %v8403_v36 = vrot.slane %v3403_v45, 5  ;;  %v3409_v6 = vrot.slane %v3407_v20, 4  ;;  %5498 = vmatpush.bf16.msra.mxu1 %v7394_v49  ;;  %v4008_v21 = vld [vmem:[#allocation2 + $0x34] sm:$0xf] }
 0x1af   : > { %v1660_v25 = vadd.f32 %v1659_v16, %v8342_v50  ;;  %3208 = vmatmul.bf16.vlgmr.msrb.gmra.mxu1 %v7316_v52  ;;  %v2646_v50 = vor.u32 %v2644_v35, %v2643_v1  ;;  %v4063_v44 = vor.u32 %v4061_v58, %v4060_v9  ;;  %v3396_v24 = vrot.slane %v3394_v17, 4  ;;  %v2420_v17 = vld [vmem:[#allocation2 + $0xb4] sm:$0xf] }
 0x1b0   : > { %v8398_v30 = vpop.f32.mrf.mxu0  ;;  %v2656_v14 = vsel %vm7728_vm7, %v2648_v56, %v2655_v60  ;;  %v3399_v29 = vrot.slane %v3397_v27, 5  ;;  %v4073_v33 = vsel %vm7728_vm7, %v4065_v4, %v4072_v42  ;;  %v3770_v32 = vunpack.c.l.b16 %v3382_v13  ;;  %v4007_v60 = vld [vmem:[#allocation2 + $0x30] sm:$0x8] }
 0x1b1   : > { %v2312_v55 = vpop.f32.mrf.mxu3  ;;  %v3771_v18 = vunpack.c.l.b16 %v3392_v5  ;;  %v2647_v54 = vsel %vm7728_vm7, %v6681_v63, %v2646_v50  ;;  %v2825_v61 = vunpack.c.l.b16 %v2656_v14  ;;  %v4064_v9 = vsel %vm7728_vm7, %v6896_v43, %v4063_v44  ;;  %v3327_v50 = vld [vmem:[#allocation2 + $0x34] sm:$0xf]  ;;  %v2419_v4 = vld [vmem:[#allocation2 + $0xb0] sm:$0x8] }
 0x1b2   : > { %v8396_v0 = vadd.f32 %v2312_v55, %v1660_v25  ;;  %v3410_v16 = vor.u32 %v3409_v6, %v8403_v36  ;;  %v3413_v51 = vshll.u32 %v3326_v12, 16  ;;  %v4422_v13 = vunpack.c.l.b16 %v4073_v33 }
 0x1b3   : > { %v3400_v20 = vor.u32 %v3399_v29, %v3396_v24  ;;  %v2672_v25 = vshrl.u32 %v2421_v23, 16  ;;  %v2824_v35 = vunpack.c.l.b16 %v2647_v54  ;;  %v4080_v27 = vshrl.u32 %v4008_v21, 16 }
 0x1b4   : > { %v8414_v1 = vpop.f32.mrf.mxu1  ;;  %v4089_v55 = vshrl.u32 %v4009_v28, 16  ;;  %v3802_v42 = vpack.c.b16 %v3771_v18, %v3770_v32  ;;  %v4421_v63 = vunpack.c.l.b16 %v4064_v9  ;;  %v2663_v43 = vshrl.u32 %v2420_v17, 16 }
 0x1b5   : > { %v2847_v48 = vpack.c.b16 %v2825_v61, %v2824_v35  ;;  %v3415_v44 = vrot.slane %v3413_v51, 5  ;;  %v3401_v49 = vrot.slane %v3400_v20, 4  ;;  %v2674_v14 = vrot.slane %v2672_v25, 7  ;;  %v7317_v20 = vld [vmem:[#allocation2 + $0x24] sm:$0xff] }
 0x1b6   : > { %v1661_v15 = vpop.f32.mrf.mxu2  ;;  %v4453_v6 = vpack.c.b16 %v4422_v13, %v4421_v63  ;;  %v4075_v12 = vshrl.u32 %v4007_v60, 16  ;;  %v4082_v24 = vrot.slane %v4080_v27, 7  ;;  %v4091_v29 = vrot.slane %v4089_v55, 7  ;;  %v3328_v60 = vld [vmem:[#allocation2 + $0x38] sm:$0xf] }
 0x1b7   : > { %v1662_v45 = vadd.f32 %v1661_v15, %v8369_v47  ;;  %v3411_v47 = vrot.slane %v3410_v16, 4  ;;  %v3418_v33 = vshrl.u32 %v3327_v50, 16  ;;  %v3421_v32 = vshll.u32 %v3327_v50, 16 }
 0x1b8   : > { %v2932_v58 = vpop.f32.mrf.mxu0  ;;  %v2658_v18 = vshrl.u32 %v2419_v4, 16  ;;  %v2665_v54 = vrot.slane %v2663_v43, 7  ;;  %v2675_v15 = vshll.u32 %v2421_v23, 16  ;;  %v3406_v61 = vsel %vm7737_vm10, %v3401_v49, %v8403_v36  ;;  %v2424_v49 = vld [vmem:[#allocation2 + $0xc8] sm:$0xf] }
 0x1b9   : > { %v2314_v52 = vpop.f32.mrf.mxu3  ;;  %v8423_v56 = vadd.f32 %v2932_v58, %v8058_v46  ;;  %v3416_v16 = vsel %vm7737_vm10, %v3411_v47, %v3415_v44  ;;  %v4083_v51 = vshll.u32 %v4008_v21, 16  ;;  %v2666_v25 = vshll.u32 %v2420_v17, 16  ;;  %v4012_v44 = vld [vmem:[#allocation2 + $0x48] sm:$0xf] }
 0x1ba   : > { %v8420_v5 = vadd.f32 %v2314_v52, %v1662_v45  ;;  %v4092_v45 = vshll.u32 %v4009_v28, 16  ;;  %v2677_v52 = vor.u32 %v2675_v15, %v2674_v14  ;;  %v6897_v35 = vrot.slane %v4075_v12, 11 }
 0x1bb   : > { %3890 = vmatmul.bf16.vlgmr.msrb.gmra.mxu2 %v3802_v42  ;;  %2971 = vmatmul.bf16.gmra.mxu0 %v2847_v48  ;;  %v4085_v27 = vor.u32 %v4083_v51, %v4082_v24  ;;  %v3420_v58 = vrot.slane %v3418_v33, 4  ;;  %v3423_v42 = vrot.slane %v3421_v32, 5  ;;  %v6682_v43 = vrot.slane %v2658_v18, 11  ;;  %v8446_v33 = vld [vmem:[#allocation2 + $0x44] sm:$0xf] }
 0x1bc   : > { %v8425_v9 = vpop.f32.mrf.mxu1  ;;  %v4094_v55 = vor.u32 %v4092_v45, %v4091_v29  ;;  %v2668_v50 = vor.u32 %v2666_v25, %v2665_v54  ;;  %v2670_v21 = vrot.slane %v2665_v54, 4  ;;  %v3427_v17 = vshll.u32 %v3328_v60, 16  ;;  %v3329_v29 = vld [vmem:[#allocation2 + $0x3c] sm:$0x1] }
 0x1bd   : > { %v3431_v48 = vshrl.u32 %v3328_v60, 16  ;;  %v3773_v4 = vunpack.c.l.b16 %v3416_v16  ;;  %v3772_v14 = vunpack.c.l.b16 %v3406_v61  ;;  %v2423_v16 = vld [vmem:[#allocation2 + $0xc4] sm:$0xf]  ;;  %v4111_v51 = vshrl.u32 %v4012_v44, 16 }
 0x1be   : > { %4541 = vmatmul.bf16.vlgmr.msrb.gmra.mxu3 %v4453_v6  ;;  %v1664_v46 = vpop.f32.mrf.mxu2  ;;  %v2678_v47 = vsel %vm7728_vm7, %v2670_v21, %v2677_v52  ;;  %v2669_v12 = vsel %vm7728_vm7, %v6682_v43, %v2668_v50  ;;  %v8450_v15 = vrot.slane %v3427_v17, 5  ;;  %v4102_v60 = vshrl.u32 %v8446_v33, 16  ;;  %v2422_v50 = vld [vmem:[#allocation2 + $0xc0] sm:$0x8] }
 0x1bf   : > { %v1665_v13 = vadd.f32 %v1664_v46, %v8389_v38  ;;  %3213 = vmatmul.bf16.gmra.mxu1 %v7317_v20  ;;  %v4087_v38 = vrot.slane %v4082_v24, 4  ;;  %v3424_v24 = vor.u32 %v3423_v42, %v3420_v58  ;;  %v2827_v54 = vunpack.c.l.b16 %v2678_v47  ;;  %v3330_v47 = vld [vmem:[#allocation2 + $0x44] sm:$0xf] }
 0x1c0   : > { %v2934_v36 = vpop.f32.mrf.mxu0  ;;  %v3433_v46 = vrot.slane %v3431_v48, 4  ;;  %v3803_v25 = vpack.c.b16 %v3773_v4, %v3772_v14  ;;  %v2826_v52 = vunpack.c.l.b16 %v2669_v12  ;;  %v3437_v58 = vshll.u32 %v3329_v29, 16  ;;  %v4010_v48 = vld [vmem:[#allocation2 + $0x40] sm:$0x8] }
 0x1c1   : > { %v2317_v23 = vpop.f32.mrf.mxu3  ;;  %v8436_v28 = vadd.f32 %v2934_v36, %v8081_v40  ;;  %v4095_v6 = vsel %vm7728_vm7, %v4087_v38, %v4094_v55  ;;  %v4086_v40 = vsel %vm7728_vm7, %v6897_v35, %v4085_v27  ;;  %v8456_v55 = vrot.slane %v3424_v24, 4  ;;  %v3331_v24 = vld [vmem:[#allocation2 + $0x48] sm:$0xf] }
 0x1c2   : > { %v8433_v63 = vadd.f32 %v2317_v23, %v1665_v13  ;;  %v4424_v45 = vunpack.c.l.b16 %v4095_v6  ;;  %v2694_v13 = vshrl.u32 %v2424_v49, 16  ;;  %v4423_v35 = vunpack.c.l.b16 %v4086_v40 }
 0x1c3   : > { %v2685_v42 = vshrl.u32 %v2423_v16, 16  ;;  %v2848_v43 = vpack.c.b16 %v2827_v54, %v2826_v52  ;;  %v4113_v21 = vrot.slane %v4111_v51, 7  ;;  %v3430_v4 = vsel %vm7737_vm10, %v8456_v55, %v8450_v15 }
 0x1c4   : > { %v8448_v18 = vpop.f32.mrf.mxu1  ;;  %v4454_v38 = vpack.c.b16 %v4424_v45, %v4423_v35  ;;  %v2696_v17 = vrot.slane %v2694_v13, 7  ;;  %v4104_v6 = vrot.slane %v4102_v60, 7  ;;  %v4114_v14 = vshll.u32 %v4012_v44, 16 }
 0x1c5   : > { %v2680_v12 = vshrl.u32 %v2422_v50, 16  ;;  %v2687_v40 = vrot.slane %v2685_v42, 7  ;;  %v2697_v29 = vshll.u32 %v2424_v49, 16  ;;  %v4097_v51 = vshrl.u32 %v4010_v48, 16 }
 0x1c6   : > { %v1666_v32 = vpop.f32.mrf.mxu2  ;;  %v3442_v45 = vshrl.u32 %v3330_v47, 16  ;;  %v3445_v52 = vshll.u32 %v3330_v47, 16  ;;  %v4105_v35 = vshll.u32 %v8446_v33, 16  ;;  %v4109_v60 = vrot.slane %v4104_v6, 4 }
 0x1c7   : > { %v1667_v61 = vadd.f32 %v1666_v32, %v8414_v1  ;;  %v3434_v1 = vor.u32 %v3433_v46, %v8450_v15  ;;  %v2699_v15 = vor.u32 %v2697_v29, %v2696_v17  ;;  %v3455_v49 = vshrl.u32 %v3331_v24, 16 }
 0x1c8   : > { %v2937_v27 = vpop.f32.mrf.mxu0  ;;  %v6683_v42 = vrot.slane %v2680_v12, 11  ;;  %v6898_v50 = vrot.slane %v4097_v51, 11  ;;  %v3444_v47 = vrot.slane %v3442_v45, 4 }
 0x1c9   : > { %v2319_v20 = vpop.f32.mrf.mxu3  ;;  %v8459_v36 = vadd.f32 %v2937_v27, %v8108_v22  ;;  %v3439_v22 = vrot.slane %v3437_v58, 5  ;;  %v3435_v46 = vrot.slane %v3434_v1, 4  ;;  %v3451_v27 = vshll.u32 %v3331_v24, 16  ;;  %v4014_v24 = vld [vmem:[#allocation2 + $0x54] sm:$0xf] }
 0x1ca   : > { %v8454_v23 = vadd.f32 %v2319_v20, %v1667_v61  ;;  %v4116_v61 = vor.u32 %v4114_v14, %v4113_v21  ;;  %v7318_v20 = vld [vmem:[#allocation2 + $0x34] sm:$0xff]  ;;  %v2692_v1 = vrot.slane %v2687_v40, 4  ;;  %v4107_v21 = vor.u32 %v4105_v35, %v4104_v6 }
 0x1cb   : > { %3895 = vmatmul.bf16.gmra.mxu2 %v3803_v25  ;;  %2976 = vmatmul.bf16.gmra.mxu0 %v2848_v43  ;;  %v2688_v25 = vshll.u32 %v2423_v16, 16  ;;  %v3440_v33 = vsel %vm7737_vm10, %v3435_v46, %v3439_v22  ;;  %v3447_v14 = vrot.slane %v3445_v52, 5  ;;  %v8487_v12 = vrot.slane %v3451_v27, 5  ;;  %v2427_v22 = vld [vmem:[#allocation2 + $0xd8] sm:$0xf] }
 0x1cc   : > { %v8466_v54 = vpop.f32.mrf.mxu1  ;;  %v2700_v17 = vsel %vm7728_vm7, %v2692_v1, %v2699_v15  ;;  %v4117_v48 = vsel %vm7728_vm7, %v4109_v60, %v4116_v61  ;;  %v3775_v6 = vunpack.c.l.b16 %v3440_v33  ;;  %v4108_v45 = vsel %vm7728_vm7, %v6898_v50, %v4107_v21 }
 0x1cd   : > { %v2690_v43 = vor.u32 %v2688_v25, %v2687_v40  ;;  %v3457_v40 = vrot.slane %v3455_v49, 4  ;;  %v2829_v61 = vunpack.c.l.b16 %v2700_v17  ;;  %v2426_v25 = vld [vmem:[#allocation2 + $0xd4] sm:$0xf]  ;;  %v3448_v52 = vor.u32 %v3447_v14, %v3444_v47 }
 0x1ce   : > { %4546 = vmatmul.bf16.gmra.mxu3 %v4454_v38  ;;  %v1669_v32 = vpop.f32.mrf.mxu2  ;;  %v7393_v38 = vld [vmem:[%s9411_s3 + $0x228] sm:$0xff]  ;;  %v2716_v35 = vshrl.u32 %v2427_v22, 16  ;;  %v4425_v33 = vunpack.c.l.b16 %v4108_v45  ;;  %v2707_v50 = vshrl.u32 %v2426_v25, 16  ;;  %v3333_v17 = vld [vmem:[#allocation2 + $0x54] sm:$0xf]  ;;  %v2719_v45 = vshll.u32 %v2427_v22, 16 }
 0x1cf   : > { %v1670_v13 = vadd.f32 %v1669_v32, %v8425_v9  ;;  %3218 = vmatmul.bf16.gmra.mxu1 %v7318_v20  ;;  %v7385_v9 = vld [vmem:[%s9411_s3 + $0x1e8] sm:$0xff]  ;;  %v2691_v29 = vsel %vm7728_vm7, %v6683_v42, %v2690_v43  ;;  %v4015_v32 = vld [vmem:[#allocation2 + $0x58] sm:$0xf]  ;;  %v4426_v20 = vunpack.c.l.b16 %v4117_v48  ;;  %v3458_v49 = vor.u32 %v3457_v40, %v8487_v12 }
 0x1d0   : > { %v2939_v58 = vpop.f32.mrf.mxu0  ;;  %4817 = vmatpush.bf16.msra.mxu0 %v7385_v9  ;;  %5499 = vmatpush.bf16.msra.mxu1 %v7393_v38  ;;  %v2828_v27 = vunpack.c.l.b16 %v2691_v29  ;;  %v4124_v42 = vshrl.u32 %v4014_v24, 16  ;;  %v4133_v43 = vshrl.u32 %v4015_v32, 16  ;;  %v2425_v38 = vld [vmem:[#allocation2 + $0xd0] sm:$0x8]  ;;  %v3449_v47 = vrot.slane %v3448_v52, 4 }
 0x1d1   : > { %v2322_v44 = vpop.f32.mrf.mxu3  ;;  %v8476_v16 = vadd.f32 %v2939_v58, %v8135_v11  ;;  %v3332_v11 = vld [vmem:[#allocation2 + $0x4c] sm:$0x1]  ;;  %v4013_v58 = vld [vmem:[#allocation2 + $0x50] sm:$0x8]  ;;  %v4455_v48 = vpack.c.b16 %v4426_v20, %v4425_v33  ;;  %v2718_v14 = vrot.slane %v2716_v35, 7  ;;  %v3459_v29 = vrot.slane %v3458_v49, 4 }
 0x1d2   : > { %v8470_v55 = vadd.f32 %v2322_v44, %v1670_v13  ;;  %v3774_v13 = vunpack.c.l.b16 %v3430_v4  ;;  %v3461_v44 = vshll.u32 %v3332_v11, 16  ;;  %v4119_v11 = vshrl.u32 %v4013_v58, 16  ;;  %v3334_v40 = vld [vmem:[#allocation2 + $0x58] sm:$0xf]  ;;  %v7319_v58 = vld [vmem:[#allocation2 + $0x44] sm:$0xff] }
 0x1d3   : > { %v3475_v20 = vshll.u32 %v3334_v40, 16  ;;  %v3479_v52 = vshrl.u32 %v3334_v40, 16  ;;  %v2710_v33 = vshll.u32 %v2426_v25, 16  ;;  %v2721_v49 = vor.u32 %v2719_v45, %v2718_v14  ;;  %v3335_v14 = vld [vmem:[#allocation2 + $0x5c] sm:$0x1] }
 0x1d4   : > { %v8491_v51 = vpop.f32.mrf.mxu1  ;;  %v3804_v9 = vpack.c.b16 %v3775_v6, %v3774_v13  ;;  %v2702_v6 = vshrl.u32 %v2425_v38, 16  ;;  %v2709_v13 = vrot.slane %v2707_v50, 7  ;;  %v6899_v50 = vrot.slane %v4119_v11, 11 }
 0x1d5   : > { %v3481_v45 = vrot.slane %v3479_v52, 4  ;;  %v3454_v11 = vsel %vm7737_vm10, %v3449_v47, %v8487_v12 }
 0x1d6   : > { %v1671_v46 = vpop.f32.mrf.mxu2  ;;  %v2714_v40 = vrot.slane %v2709_v13, 4  ;;  %v3776_v52 = vunpack.c.l.b16 %v3454_v11 }
 0x1d7   : > { %v1672_v15 = vadd.f32 %v1671_v46, %v8448_v18  ;;  %v2849_v18 = vpack.c.b16 %v2829_v61, %v2828_v27  ;;  %v3463_v46 = vrot.slane %v3461_v44, 5  ;;  %v4136_v27 = vshll.u32 %v4015_v32, 16 }
 0x1d8   : > { %v2942_v4 = vpop.f32.mrf.mxu0  ;;  %v3469_v44 = vshll.u32 %v3333_v17, 16  ;;  %v6684_v32 = vrot.slane %v2702_v6, 11  ;;  %v4017_v6 = vld [vmem:[#allocation2 + $0x64] sm:$0xf] }
 0x1d9   : > { %v2324_v60 = vpop.f32.mrf.mxu3  ;;  %v8500_v21 = vadd.f32 %v2942_v4, %v8158_v2  ;;  %v4127_v2 = vshll.u32 %v4014_v24, 16 }
 0x1da   : > { %v8497_v1 = vadd.f32 %v2324_v60, %v1672_v15  ;;  %v4126_v15 = vrot.slane %v4124_v42, 7  ;;  %v4135_v60 = vrot.slane %v4133_v43, 7  ;;  %v3464_v43 = vsel %vm7737_vm10, %v3459_v29, %v3463_v46 }
 0x1db   : > { %9431 = vst [vmem:[#allocation5_spill] sm:$0xff] %v8500_v21  ;;  %3900 = vmatmul.bf16.gmra.mxu2 %v3804_v9  ;;  %2981 = vmatmul.bf16.gmra.mxu0 %v2849_v18  ;;  %v3466_v9 = vshrl.u32 %v3333_v17, 16  ;;  %v8512_v17 = vrot.slane %v3475_v20, 5  ;;  %v2722_v29 = vsel %vm7728_vm7, %v2714_v40, %v2721_v49  ;;  %v4018_v20 = vld [vmem:[#allocation2 + $0x68] sm:$0xf]  ;;  %v4146_v49 = vshrl.u32 %v4017_v6, 16 }
 0x1dc   : > { %v8502_v61 = vpop.f32.mrf.mxu1  ;;  %v4129_v22 = vor.u32 %v4127_v2, %v4126_v15  ;;  %v4138_v24 = vor.u32 %v4136_v27, %v4135_v60  ;;  %v4131_v25 = vrot.slane %v4126_v15, 4  ;;  %v3471_v60 = vrot.slane %v3469_v44, 5 }
 0x1dd   : > { %v3468_v46 = vrot.slane %v3466_v9, 4  ;;  %v3777_v2 = vunpack.c.l.b16 %v3464_v43  ;;  %v3485_v27 = vshll.u32 %v3335_v14, 16  ;;  %v2831_v9 = vunpack.c.l.b16 %v2722_v29 }
 0x1de   : > { %4551 = vmatmul.bf16.gmra.mxu3 %v4455_v48  ;;  %v1674_v4 = vpop.f32.mrf.mxu2  ;;  %v2712_v48 = vor.u32 %v2710_v33, %v2709_v13  ;;  %v2430_v13 = vld [vmem:[#allocation2 + $0xe8] sm:$0xf]  ;;  %v4016_v33 = vld [vmem:[#allocation2 + $0x60] sm:$0x8] }
 0x1df   : > { %v1675_v35 = vadd.f32 %v1674_v4, %v8466_v54  ;;  %3223 = vmatmul.bf16.gmra.mxu1 %v7319_v58  ;;  %v4130_v4 = vsel %vm7728_vm7, %v6899_v50, %v4129_v22  ;;  %v2429_v58 = vld [vmem:[#allocation2 + $0xe4] sm:$0xf]  ;;  %v3472_v43 = vor.u32 %v3471_v60, %v3468_v46  ;;  %v3487_v14 = vrot.slane %v3485_v27, 5 }
 0x1e0   : > { %v2944_v38 = vpop.f32.mrf.mxu0  ;;  %v2713_v15 = vsel %vm7728_vm7, %v6684_v32, %v2712_v48  ;;  %v3805_v32 = vpack.c.b16 %v3777_v2, %v3776_v52  ;;  %v4427_v22 = vunpack.c.l.b16 %v4130_v4  ;;  %v4155_v48 = vshrl.u32 %v4018_v20, 16  ;;  %v3336_v52 = vld [vmem:[#allocation2 + $0x64] sm:$0xf] }
 0x1e1   : > { %v2327_v42 = vpop.f32.mrf.mxu3  ;;  %v8510_v54 = vadd.f32 %v2944_v38, %v8182_v53  ;;  %v4139_v53 = vsel %vm7728_vm7, %v4131_v25, %v4138_v24  ;;  %v2738_v24 = vshrl.u32 %v2430_v13, 16  ;;  %v2830_v50 = vunpack.c.l.b16 %v2713_v15 }
 0x1e2   : > { %v8507_v18 = vadd.f32 %v2327_v42, %v1675_v35  ;;  %v3482_v35 = vor.u32 %v3481_v45, %v8512_v17  ;;  %v4428_v42 = vunpack.c.l.b16 %v4139_v53  ;;  %v2729_v11 = vshrl.u32 %v2429_v58, 16  ;;  %v3337_v45 = vld [vmem:[#allocation2 + $0x68] sm:$0xf]  ;;  %v2428_v53 = vld [vmem:[#allocation2 + $0xe0] sm:$0x8] }
 0x1e3   : > { %9432 = vst [vmem:[#allocation6_spill] sm:$0xff] %v8510_v54  ;;  %v4141_v29 = vshrl.u32 %v4016_v33, 16  ;;  %v2850_v54 = vpack.c.b16 %v2831_v9, %v2830_v50  ;;  %v4148_v46 = vrot.slane %v4146_v49, 7  ;;  %v3473_v2 = vrot.slane %v3472_v43, 4  ;;  %v7320_v43 = vld [vmem:[#allocation2 + $0x54] sm:$0xff] }
 0x1e4   : > { %v8525_v47 = vpop.f32.mrf.mxu1  ;;  %v4456_v60 = vpack.c.b16 %v4428_v42, %v4427_v22  ;;  %v2740_v15 = vrot.slane %v2738_v24, 7  ;;  %v4149_v4 = vshll.u32 %v4017_v6, 16  ;;  %v3503_v27 = vshrl.u32 %v3337_v45, 16 }
 0x1e5   : > { %v2724_v33 = vshrl.u32 %v2428_v53, 16  ;;  %v2741_v21 = vshll.u32 %v2430_v13, 16  ;;  %v4158_v49 = vshll.u32 %v4018_v20, 16  ;;  %v2732_v24 = vshll.u32 %v2429_v58, 16 }
 0x1e6   : > { %v1676_v12 = vpop.f32.mrf.mxu2  ;;  %v4151_v6 = vor.u32 %v4149_v4, %v4148_v46  ;;  %v3490_v50 = vshrl.u32 %v3336_v52, 16  ;;  %v4153_v58 = vrot.slane %v4148_v46, 4  ;;  %v4020_v4 = vld [vmem:[#allocation2 + $0x74] sm:$0xf] }
 0x1e7   : > { %v1677_v44 = vadd.f32 %v1676_v12, %v8491_v51  ;;  %v3483_v51 = vrot.slane %v3482_v35, 4  ;;  %v4157_v12 = vrot.slane %v4155_v48, 7  ;;  %v3478_v35 = vsel %vm7737_vm10, %v3473_v2, %v8512_v17  ;;  %v7392_v2 = vld [vmem:[%s9411_s3 + $0x220] sm:$0xff] }
 0x1e8   : > { %v2947_v25 = vpop.f32.mrf.mxu0  ;;  %v3493_v48 = vshll.u32 %v3336_v52, 16  ;;  %v6685_v53 = vrot.slane %v2724_v33, 11  ;;  %v4019_v33 = vld [vmem:[#allocation2 + $0x70] sm:$0x8]  ;;  %5500 = vmatpush.bf16.msra.mxu1 %v7392_v2 }
 0x1e9   : > { %v2329_v38 = vpop.f32.mrf.mxu3  ;;  %v8532_v31 = vadd.f32 %v2947_v25, %v8206_v57  ;;  %v6900_v57 = vrot.slane %v4141_v29, 11  ;;  %v4160_v22 = vor.u32 %v4158_v49, %v4157_v12  ;;  %v3505_v29 = vrot.slane %v3503_v27, 4  ;;  %v4021_v49 = vld [vmem:[#allocation2 + $0x78] sm:$0xf] }
 0x1ea   : > { %v8529_v40 = vadd.f32 %v2329_v38, %v1677_v44  ;;  %v3499_v44 = vshll.u32 %v3337_v45, 16  ;;  %v2731_v38 = vrot.slane %v2729_v11, 7  ;;  %v3778_v12 = vunpack.c.l.b16 %v3478_v35 }
 0x1eb   : > { %3905 = vmatmul.bf16.gmra.mxu2 %v3805_v32  ;;  %2986 = vmatmul.bf16.gmra.mxu0 %v2850_v54  ;;  %v3488_v54 = vsel %vm7737_vm10, %v3483_v51, %v3487_v14  ;;  %v2743_v32 = vor.u32 %v2741_v21, %v2740_v15  ;;  %v4161_v52 = vsel %vm7728_vm7, %v4153_v58, %v4160_v22  ;;  %v3495_v27 = vrot.slane %v3493_v48, 5 }
 0x1ec   : > { %v8534_v9 = vpop.f32.mrf.mxu1  ;;  %v8542_v11 = vrot.slane %v3499_v44, 5  ;;  %v2734_v14 = vor.u32 %v2732_v24, %v2731_v38  ;;  %v2736_v51 = vrot.slane %v2731_v38, 4  ;;  %v3779_v20 = vunpack.c.l.b16 %v3488_v54 }
 0x1ed   : > { %v3492_v44 = vrot.slane %v3490_v50, 4  ;;  %v4152_v38 = vsel %vm7728_vm7, %v6900_v57, %v4151_v6  ;;  %v4168_v50 = vshrl.u32 %v4020_v4, 16  ;;  %v4430_v22 = vunpack.c.l.b16 %v4161_v52 }
 0x1ee   : > { %4556 = vmatmul.bf16.gmra.mxu3 %v4456_v60  ;;  %v1679_v25 = vpop.f32.mrf.mxu2  ;;  %v3338_v60 = vld [vmem:[#allocation2 + $0x6c] sm:$0x1]  ;;  %v2744_v15 = vsel %vm7728_vm7, %v2736_v51, %v2743_v32  ;;  %v2735_v46 = vsel %vm7728_vm7, %v6685_v53, %v2734_v14  ;;  %v2432_v32 = vld [vmem:[#allocation2 + $0xf4] sm:$0xf]  ;;  %v4429_v51 = vunpack.c.l.b16 %v4152_v38  ;;  %v4177_v6 = vshrl.u32 %v4021_v49, 16 }
 0x1ef   : > { %v1680_v42 = vadd.f32 %v1679_v25, %v8502_v61  ;;  %3228 = vmatmul.bf16.gmra.mxu1 %v7320_v43  ;;  %v7384_v61 = vld [vmem:[%s9411_s3 + $0x1e0] sm:$0xff]  ;;  %v3506_v25 = vor.u32 %v3505_v29, %v8542_v11  ;;  %v3509_v54 = vshll.u32 %v3338_v60, 16  ;;  %v3806_v43 = vpack.c.b16 %v3779_v20, %v3778_v12  ;;  %v2431_v12 = vld [vmem:[#allocation2 + $0xf0] sm:$0x8] }
 0x1f0   : > { %v2949_v17 = vpop.f32.mrf.mxu0  ;;  %4818 = vmatpush.bf16.msra.mxu0 %v7384_v61  ;;  %v2833_v24 = vunpack.c.l.b16 %v2744_v15  ;;  %v2832_v14 = vunpack.c.l.b16 %v2735_v46  ;;  %v3496_v57 = vor.u32 %v3495_v27, %v3492_v44  ;;  %v2751_v2 = vshrl.u32 %v2432_v32, 16  ;;  %v3340_v46 = vld [vmem:[#allocation2 + $0x78] sm:$0xf]  ;;  %v752_v38 = vld [vmem:[#allocation2 + $0x100] sm:$0x8] }
 0x1f1   : > { %v2332_v13 = vpop.f32.mrf.mxu3  ;;  %v8550_v21 = vadd.f32 %v2949_v17, %v8236_v41  ;;  %v2433_v41 = vld [vmem:[#allocation2 + $0xf8] sm:$0xf]  ;;  %v4163_v17 = vshrl.u32 %v4019_v33, 16  ;;  %v3507_v58 = vrot.slane %v3506_v25, 4  ;;  %v3511_v60 = vrot.slane %v3509_v54, 5 }
 0x1f2   : > { %v8544_v45 = vadd.f32 %v2332_v13, %v1680_v42  ;;  %v2760_v48 = vshrl.u32 %v2433_v41, 16  ;;  %v2851_v15 = vpack.c.b16 %v2833_v24, %v2832_v14  ;;  %v4457_v52 = vpack.c.b16 %v4430_v22, %v4429_v51 }
 0x1f3   : > { %v3497_v44 = vrot.slane %v3496_v57, 4  ;;  %v4171_v27 = vshll.u32 %v4020_v4, 16  ;;  %v753_v25 = vsel %vm7683_vm2, 0, %v752_v38  ;;  %v2746_v54 = vshrl.u32 %v2431_v12, 16 }
 0x1f4   : > { %v8564_v35 = vpop.f32.mrf.mxu1  ;;  %v2762_v33 = vrot.slane %v2760_v48, 7  ;;  %v2753_v24 = vrot.slane %v2751_v2, 7  ;;  %754 = vst [vmem:[#allocation2 + $0x100] sm:$0x8] %v753_v25  ;;  %v4180_v14 = vshll.u32 %v4021_v49, 16  ;;  %v3523_v51 = vshll.u32 %v3340_v46, 16 }
 0x1f5   : > { %v3502_v4 = vsel %vm7737_vm10, %v3497_v44, %v8542_v11  ;;  %v6686_v11 = vrot.slane %v2746_v54, 11  ;;  %v3341_v54 = vld [vmem:[#allocation2 + $0x7c] sm:$0x1] }
 0x1f6   : > { %v1681_v42 = vpop.f32.mrf.mxu2  ;;  %v2758_v49 = vrot.slane %v2753_v24, 4 }
 0x1f7   : > { %v1682_v13 = vadd.f32 %v1681_v42, %v8525_v47  ;;  %v4170_v47 = vrot.slane %v4168_v50, 7  ;;  %v6901_v42 = vrot.slane %v4163_v17, 11  ;;  %v7383_v50 = vld [vmem:[%s9411_s3 + $0x1d8] sm:$0xff] }
 0x1f8   : > { %v2952_v61 = vpop.f32.mrf.mxu0  ;;  %4819 = vmatpush.bf16.msra.mxu0 %v7383_v50 }
 0x1f9   : > { %v2334_v53 = vpop.f32.mrf.mxu3  ;;  %v8570_v20 = vadd.f32 %v2952_v61, %v8278_v19  ;;  %v3512_v19 = vsel %vm7737_vm10, %v3507_v58, %v3511_v60  ;;  %v4173_v17 = vor.u32 %v4171_v27, %v4170_v47  ;;  %v2754_v61 = vshll.u32 %v2432_v32, 16 }
 0x1fa   : > { %v8567_v29 = vadd.f32 %v2334_v53, %v1682_v13  ;;  %v4179_v13 = vrot.slane %v4177_v6, 7  ;;  %v3339_v53 = vld [vmem:[#allocation2 + $0x74] sm:$0xf]  ;;  %v7321_v6 = vld [vmem:[#allocation2 + $0x64] sm:$0xff]  ;;  %v3527_v58 = vshrl.u32 %v3340_v46, 16  ;;  %v3781_v2 = vunpack.c.l.b16 %v3512_v19 }
 0x1fb   : > { %9433 = vst [vmem:[#allocation7_spill] sm:$0xff] %v8570_v20  ;;  %3910 = vmatmul.bf16.gmra.mxu2 %v3806_v43  ;;  %2991 = vmatmul.bf16.gmra.mxu0 %v2851_v15  ;;  %v2763_v43 = vshll.u32 %v2433_v41, 16  ;;  %v4175_v15 = vrot.slane %v4170_v47, 4  ;;  %v2756_v44 = vor.u32 %v2754_v61, %v2753_v24  ;;  %v4174_v32 = vsel %vm7728_vm7, %v6901_v42, %v4173_v17  ;;  %v2435_v46 = vld [vmem:[#allocation2 + $0x104] sm:$0xf]  ;;  %v7382_v47 = vld [vmem:[%s9411_s3 + $0x1d0] sm:$0xff] }
 0x1fc   : > { %v8579_v48 = vpop.f32.mrf.mxu1  ;;  %v4182_v12 = vor.u32 %v4180_v14, %v4179_v13  ;;  %v2436_v19 = vld [vmem:[#allocation2 + $0x108] sm:$0xf]  ;;  %v3529_v24 = vrot.slane %v3527_v58, 4  ;;  %4820 = vmatpush.bf16.msra.mxu0 %v7382_v47  ;;  %v2773_v17 = vshrl.u32 %v2435_v46, 16  ;;  %v4022_v47 = vld [vmem:[#allocation2 + $0x80] sm:$0x8] }
 0x1fd   : > { %v2765_v41 = vor.u32 %v2763_v43, %v2762_v33  ;;  %v3517_v33 = vshll.u32 %v3339_v53, 16  ;;  %v8597_v43 = vrot.slane %v3523_v51, 5  ;;  %v7381_v42 = vld [vmem:[%s9411_s3 + $0x1c8] sm:$0xff]  ;;  %v2782_v14 = vshrl.u32 %v2436_v19, 16 }
 0x1fe   : > { %4561 = vmatmul.bf16.gmra.mxu3 %v4457_v52  ;;  %v1684_v22 = vpop.f32.mrf.mxu2  ;;  %v3514_v52 = vshrl.u32 %v3339_v53, 16  ;;  %v4183_v50 = vsel %vm7728_vm7, %v4175_v15, %v4182_v12  ;;  %v2757_v53 = vsel %vm7728_vm7, %v6686_v11, %v2756_v44  ;;  %v2776_v44 = vshll.u32 %v2435_v46, 16 }
 0x1ff   : > { %v1685_v57 = vadd.f32 %v1684_v22, %v8534_v9  ;;  %3233 = vmatmul.bf16.gmra.mxu1 %v7321_v6  ;;  %v3780_v9 = vunpack.c.l.b16 %v3502_v4  ;;  %v2766_v13 = vsel %vm7728_vm7, %v2758_v49, %v2765_v41  ;;  %v4023_v22 = vld [vmem:[#allocation2 + $0x84] sm:$0xf]  ;;  %v4431_v4 = vunpack.c.l.b16 %v4174_v32 }
 0x200   : > { %v2954_v25 = vpop.f32.mrf.mxu0  ;;  %v2835_v61 = vunpack.c.l.b16 %v2766_v13  ;;  %v3516_v41 = vrot.slane %v3514_v52, 4  ;;  %v3519_v58 = vrot.slane %v3517_v33, 5  ;;  %v4432_v12 = vunpack.c.l.b16 %v4183_v50  ;;  %4821 = vmatpush.bf16.msra.mxu0 %v7381_v42 }
 0x201   : > { %v2337_v60 = vpop.f32.mrf.mxu3  ;;  %v8588_v27 = vadd.f32 %v2954_v25, %v8323_v34  ;;  %v3807_v34 = vpack.c.b16 %v3781_v2, %v3780_v9  ;;  %v2434_v2 = vld [vmem:[#allocation2 + $0x100] sm:$0x8]  ;;  %v3530_v25 = vor.u32 %v3529_v24, %v8597_v43  ;;  %v4190_v49 = vshrl.u32 %v4023_v22, 16 }
 0x202   : > { %v8585_v38 = vadd.f32 %v2337_v60, %v1685_v57  ;;  %v4024_v57 = vld [vmem:[#allocation2 + $0x88] sm:$0xf]  ;;  %v3533_v60 = vshll.u32 %v3341_v54, 16  ;;  %v2834_v11 = vunpack.c.l.b16 %v2757_v53  ;;  %v2785_v32 = vshll.u32 %v2436_v19, 16  ;;  %v7380_v24 = vld [vmem:[%s9411_s3 + $0x1c0] sm:$0xff] }
 0x203   : > { %9434 = vst [vmem:[#allocation8_spill] sm:$0xff] %v8588_v27  ;;  %v4199_v26 = vshrl.u32 %v4024_v57, 16  ;;  %v2768_v52 = vshrl.u32 %v2434_v2, 16  ;;  %v2775_v33 = vrot.slane %v2773_v17, 7  ;;  %v2784_v54 = vrot.slane %v2782_v14, 7 }
 0x204   : > { %v8606_v6 = vpop.f32.mrf.mxu1  ;;  %v4458_v46 = vpack.c.b16 %v4432_v12, %v4431_v4  ;;  %v3535_v19 = vrot.slane %v3533_v60, 5  ;;  %v4185_v50 = vshrl.u32 %v4022_v47, 16  ;;  %v4192_v53 = vrot.slane %v4190_v49, 7  ;;  %4822 = vmatpush.bf16.msra.mxu0 %v7380_v24  ;;  %v7322_v60 = vld [vmem:[#allocation2 + $0x74] sm:$0xff] }
 0x205   : > { %v3520_v42 = vor.u32 %v3519_v58, %v3516_v41  ;;  %v4201_v2 = vrot.slane %v4199_v26, 7  ;;  %v6687_v17 = vrot.slane %v2768_v52, 11  ;;  %v2778_v14 = vor.u32 %v2776_v44, %v2775_v33  ;;  %v7391_v24 = vld [vmem:[%s9411_s3 + $0x218] sm:$0xff] }
 0x206   : > { %v1686_v51 = vpop.f32.mrf.mxu2  ;;  %v6902_v12 = vrot.slane %v4185_v50, 11  ;;  %5501 = vmatpush.bf16.msra.mxu1 %v7391_v24 }
 0x207   : > { %v1687_v15 = vadd.f32 %v1686_v51, %v8564_v35  ;;  %v2852_v35 = vpack.c.b16 %v2835_v61, %v2834_v11  ;;  %v3531_v51 = vrot.slane %v3530_v25, 4  ;;  %v3343_v61 = vld [vmem:[#allocation2 + $0x88] sm:$0xf]  ;;  %v3521_v58 = vrot.slane %v3520_v42, 4 }
 0x208   : > { %v2957_v13 = vpop.f32.mrf.mxu0  ;;  %v3547_v25 = vshll.u32 %v3343_v61, 16  ;;  %v2779_v47 = vsel %vm7728_vm7, %v6687_v17, %v2778_v14  ;;  %v3551_v52 = vshrl.u32 %v3343_v61, 16  ;;  %v4027_v14 = vld [vmem:[#allocation2 + $0x98] sm:$0xf]  ;;  %v4026_v61 = vld [vmem:[#allocation2 + $0x94] sm:$0xf] }
 0x209   : > { %v2339_v9 = vpop.f32.mrf.mxu3  ;;  %v8613_v20 = vadd.f32 %v2957_v13, %v8351_v3  ;;  %v2780_v3 = vrot.slane %v2775_v33, 4  ;;  %v3536_v26 = vsel %vm7737_vm10, %v3531_v51, %v3535_v19  ;;  %v2836_v50 = vunpack.c.l.b16 %v2779_v47 }
 0x20a   : > { %v8610_v27 = vadd.f32 %v2339_v9, %v1687_v15  ;;  %v4193_v15 = vshll.u32 %v4023_v22, 16  ;;  %v2787_v9 = vor.u32 %v2785_v32, %v2784_v54  ;;  %v3526_v54 = vsel %vm7737_vm10, %v3521_v58, %v8597_v43 }
 0x20b   : > { %3915 = vmatmul.bf16.gmra.mxu2 %v3807_v34  ;;  %2996 = vmatmul.bf16.gmra.mxu0 %v2852_v35  ;;  %v4202_v34 = vshll.u32 %v4024_v57, 16  ;;  %v3342_v57 = vld [vmem:[#allocation2 + $0x84] sm:$0xf]  ;;  %v4197_v35 = vrot.slane %v4192_v53, 4  ;;  %v8642_v43 = vrot.slane %v3547_v25, 5 }
 0x20c   : > { %v8618_v13 = vpop.f32.mrf.mxu1  ;;  %v4195_v49 = vor.u32 %v4193_v15, %v4192_v53  ;;  %v3538_v15 = vshrl.u32 %v3342_v57, 16  ;;  %v3541_v17 = vshll.u32 %v3342_v57, 16  ;;  %v3553_v53 = vrot.slane %v3551_v52, 4 }
 0x20d   : > { %v4204_v22 = vor.u32 %v4202_v34, %v4201_v2  ;;  %v3782_v2 = vunpack.c.l.b16 %v3526_v54  ;;  %v4212_v57 = vshrl.u32 %v4026_v61, 16 }
 0x20e   : > { %4566 = vmatmul.bf16.gmra.mxu3 %v4458_v46  ;;  %v1689_v11 = vpop.f32.mrf.mxu2  ;;  %v3783_v46 = vunpack.c.l.b16 %v3536_v26  ;;  %v4196_v19 = vsel %vm7728_vm7, %v6902_v12, %v4195_v49  ;;  %v4221_v26 = vshrl.u32 %v4027_v14, 16  ;;  %v3554_v47 = vor.u32 %v3553_v53, %v8642_v43 }
 0x20f   : > { %v1690_v4 = vadd.f32 %v1689_v11, %v8579_v48  ;;  %3238 = vmatmul.bf16.gmra.mxu1 %v7322_v60  ;;  %v2788_v48 = vsel %vm7728_vm7, %v2780_v3, %v2787_v9  ;;  %v4205_v51 = vsel %vm7728_vm7, %v4197_v35, %v4204_v22 }
 0x210   : > { %v2959_v32 = vpop.f32.mrf.mxu0  ;;  %v2837_v42 = vunpack.c.l.b16 %v2788_v48  ;;  %v3808_v34 = vpack.c.b16 %v3783_v46, %v3782_v2  ;;  %v4434_v60 = vunpack.c.l.b16 %v4205_v51  ;;  %v4025_v48 = vld [vmem:[#allocation2 + $0x90] sm:$0x8]  ;;  %v4223_v35 = vrot.slane %v4221_v26, 7  ;;  %v7323_v2 = vld [vmem:[#allocation2 + $0x84] sm:$0xff] }
 0x211   : > { %v2342_v41 = vpop.f32.mrf.mxu3  ;;  %v8630_v33 = vadd.f32 %v2959_v32, %v8380_v62  ;;  %v3344_v62 = vld [vmem:[#allocation2 + $0x8c] sm:$0x1]  ;;  %v3543_v32 = vrot.slane %v3541_v17, 5  ;;  %v4207_v54 = vshrl.u32 %v4025_v48, 16  ;;  %v3555_v46 = vrot.slane %v3554_v47, 4 }
 0x212   : > { %v8623_v44 = vadd.f32 %v2342_v41, %v1690_v4  ;;  %v4433_v4 = vunpack.c.l.b16 %v4196_v19  ;;  %v2853_v49 = vpack.c.b16 %v2837_v42, %v2836_v50  ;;  %v3540_v41 = vrot.slane %v3538_v15, 4 }
 0x213   : > { %v3557_v58 = vshll.u32 %v3344_v62, 16  ;;  %v4214_v50 = vrot.slane %v4212_v57, 7  ;;  %v4224_v62 = vshll.u32 %v4027_v14, 16  ;;  %v4215_v17 = vshll.u32 %v4026_v61, 16  ;;  %v7403_v14 = vld [vmem:[%s9413_s5 + $0x38] sm:$0xff] }
 0x214   : > { %v8644_v9 = vpop.f32.mrf.mxu1  ;;  %v3544_v24 = vor.u32 %v3543_v32, %v3540_v41  ;;  %v3345_v41 = vld [vmem:[#allocation2 + $0x94] sm:$0xf]  ;;  %5770 = vmatpush.bf16.msra.mxu2 %v7403_v14 }
 0x215   : > { %v3559_v19 = vrot.slane %v3557_v58, 5  ;;  %v4219_v61 = vrot.slane %v4214_v50, 4  ;;  %v3562_v57 = vshrl.u32 %v3345_v41, 16 }
 0x216   : > { %v1691_v3 = vpop.f32.mrf.mxu2 }
 0x217   : > { %v1692_v11 = vadd.f32 %v1691_v3, %v8606_v6  ;;  %v4459_v6 = vpack.c.b16 %v4434_v60, %v4433_v4  ;;  %v6903_v3 = vrot.slane %v4207_v54, 11  ;;  %v3545_v60 = vrot.slane %v3544_v24, 4  ;;  %v4030_v54 = vld [vmem:[#allocation2 + $0xa8] sm:$0xf] }
 0x218   : > { %v2962_v25 = vpop.f32.mrf.mxu0 }
 0x219   : > { %v2344_v12 = vpop.f32.mrf.mxu3  ;;  %v8651_v52 = vadd.f32 %v2962_v25, %v8396_v0  ;;  %v3346_v0 = vld [vmem:[#allocation2 + $0x98] sm:$0xf]  ;;  %v3550_v32 = vsel %vm7737_vm10, %v3545_v60, %v8642_v43  ;;  %v4029_v43 = vld [vmem:[#allocation2 + $0xa4] sm:$0xf] }
 0x21a   : > { %v8647_v22 = vadd.f32 %v2344_v12, %v1692_v11  ;;  %v4226_v11 = vor.u32 %v4224_v62, %v4223_v35  ;;  %v3560_v12 = vsel %vm7737_vm10, %v3555_v46, %v3559_v19  ;;  %v3571_v58 = vshll.u32 %v3346_v0, 16  ;;  %v7427_v25 = vld [vmem:[%s9415_s7 + $0x38] sm:$0xff] }
 0x21b   : > { %3920 = vmatmul.bf16.gmra.mxu2 %v3808_v34  ;;  %3001 = vmatmul.bf16.gmra.mxu0 %v2853_v49  ;;  %v4217_v49 = vor.u32 %v4215_v17, %v4214_v50  ;;  %v3575_v26 = vshrl.u32 %v3346_v0, 16  ;;  %v3785_v47 = vunpack.c.l.b16 %v3560_v12  ;;  %v3784_v46 = vunpack.c.l.b16 %v3550_v32  ;;  %v4028_v12 = vld [vmem:[#allocation2 + $0xa0] sm:$0x8] }
 0x21c   : > { %v8653_v51 = vpop.f32.mrf.mxu1  ;;  %v4227_v48 = vsel %vm7728_vm7, %v4219_v61, %v4226_v11  ;;  %6051 = vmatpush.bf16.msra.mxu3 %v7427_v25  ;;  %v8678_v19 = vrot.slane %v3571_v58, 5  ;;  %v7356_v61 = vld [vmem:[#allocation2 + $0x24] sm:$0xff] }
 0x21d   : > { %v3577_v50 = vrot.slane %v3575_v26, 4  ;;  %v4436_v62 = vunpack.c.l.b16 %v4227_v48  ;;  %v3809_v17 = vpack.c.b16 %v3785_v47, %v3784_v46  ;;  %v4229_v26 = vshrl.u32 %v4028_v12, 16  ;;  %v3348_v12 = vld [vmem:[#allocation2 + $0xa4] sm:$0xf] }
 0x21e   : > { %4571 = vmatmul.bf16.gmra.mxu3 %v4459_v6  ;;  %v1694_v42 = vpop.f32.mrf.mxu2  ;;  %v3565_v6 = vshll.u32 %v3345_v41, 16 }
 0x21f   : > { %v1695_v15 = vadd.f32 %v1694_v42, %v8618_v13  ;;  %3243 = vmatmul.bf16.gmra.mxu1 %v7323_v2  ;;  %v3578_v41 = vor.u32 %v3577_v50, %v8678_v19 }
 0x220   : > { %v2964_v4 = vpop.f32.mrf.mxu0  ;;  %v3567_v60 = vrot.slane %v3565_v6, 5 }
 0x221   : > { %v2347_v53 = vpop.f32.mrf.mxu3  ;;  %v8664_v13 = vadd.f32 %v2964_v4, %v8420_v5  ;;  %v4218_v5 = vsel %vm7728_vm7, %v6903_v3, %v4217_v49  ;;  %v3564_v4 = vrot.slane %v3562_v57, 4  ;;  %v4234_v49 = vshrl.u32 %v4029_v43, 16 }
 0x222   : > { %v8656_v34 = vadd.f32 %v2347_v53, %v1695_v15  ;;  %v3347_v15 = vld [vmem:[#allocation2 + $0x9c] sm:$0x1]  ;;  %v4435_v0 = vunpack.c.l.b16 %v4218_v5  ;;  %v4243_v53 = vshrl.u32 %v4030_v54, 16  ;;  %v3579_v57 = vrot.slane %v3578_v41, 4 }
 0x223   : > { %v3568_v32 = vor.u32 %v3567_v60, %v3564_v4  ;;  %v4236_v47 = vrot.slane %v4234_v49, 7 }
 0x224   : > { %v8676_v24 = vpop.f32.mrf.mxu1  ;;  %v4460_v58 = vpack.c.b16 %v4436_v62, %v4435_v0  ;;  %v4245_v25 = vrot.slane %v4243_v53, 7  ;;  %v4237_v62 = vshll.u32 %v4029_v43, 16  ;;  %v7390_v43 = vld [vmem:[%s9411_s3 + $0x210] sm:$0xff] }
 0x225   : > { %v3569_v4 = vrot.slane %v3568_v32, 4  ;;  %v4241_v60 = vrot.slane %v4236_v47, 4  ;;  %5502 = vmatpush.bf16.msra.mxu1 %v7390_v43 }
 0x226   : > { %v1696_v35 = vpop.f32.mrf.mxu2 }
 0x227   : > { %v1697_v42 = vadd.f32 %v1696_v35, %v8644_v9  ;;  %v3581_v9 = vshll.u32 %v3347_v15, 16  ;;  %v4246_v35 = vshll.u32 %v4030_v54, 16  ;;  %v3349_v15 = vld [vmem:[#allocation2 + $0xa8] sm:$0xf]  ;;  %v4239_v54 = vor.u32 %v4237_v62, %v4236_v47 }
 0x228   : > { %v2967_v11 = vpop.f32.mrf.mxu0 }
 0x229   : > { %v2349_v2 = vpop.f32.mrf.mxu3  ;;  %v8684_v14 = vadd.f32 %v2967_v11, %v8433_v63  ;;  %v3583_v6 = vrot.slane %v3581_v9, 5  ;;  %v1627_v63 = vadd.f32 %v8024_v39, %v7978_v8  ;;  %v4248_v0 = vor.u32 %v4246_v35, %v4245_v25  ;;  %v4033_v25 = vld [vmem:[#allocation2 + $0xb8] sm:$0xf] }
 0x22a   : > { %v8681_v3 = vadd.f32 %v2349_v2, %v1697_v42  ;;  %v7324_v42 = vld [vmem:[#allocation2 + $0x94] sm:$0xff]  ;;  %v3589_v9 = vshll.u32 %v3348_v12, 16 }
 0x22b   : > { %3925 = vmatmul.bf16.gmra.mxu2 %v3809_v17  ;;  %4823 = vmatmul.bf16.vlgmr.msra.gmra.mxu0 %v7356_v61  ;;  %v6904_v17 = vrot.slane %v4229_v26, 11  ;;  %v3584_v39 = vsel %vm7737_vm10, %v3579_v57, %v3583_v6  ;;  %v2358_v49 = vadd.f32 %v8035_v37, %v1627_v63  ;;  %v3574_v61 = vsel %vm7737_vm10, %v3569_v4, %v8678_v19  ;;  %v4032_v57 = vld [vmem:[#allocation2 + $0xb4] sm:$0xf] }
 0x22c   : > { %v3209_v5 = vpop.f32.mrf.mxu1  ;;  %v4249_v41 = vsel %vm7728_vm7, %v4241_v60, %v4248_v0  ;;  %v3787_v26 = vunpack.c.l.b16 %v3584_v39  ;;  %v3786_v35 = vunpack.c.l.b16 %v3574_v61  ;;  %v3591_v62 = vrot.slane %v3589_v9, 5  ;;  %v7357_v60 = vld [vmem:[#allocation2 + $0x34] sm:$0xff]  ;;  %v4031_v39 = vld [vmem:[#allocation2 + $0xb0] sm:$0x8] }
 0x22d   : > { %v8691_v50 = vadd.f32 %v3209_v5, %v8383_v7  ;;  %v3595_v7 = vshll.u32 %v3349_v15, 16  ;;  %v4438_v63 = vunpack.c.l.b16 %v4249_v41  ;;  %v4256_v4 = vshrl.u32 %v4032_v57, 16 }
 0x22e   : > { %4576 = vmatmul.bf16.gmra.mxu3 %v4460_v58  ;;  %v1699_v48 = vpop.f32.mrf.mxu2  ;;  %v3008_v58 = vadd.f32 %v8398_v30, %v2358_v49  ;;  %v4251_v49 = vshrl.u32 %v4031_v39, 16 }
 0x22f   : > { %v1700_v46 = vadd.f32 %v1699_v48, %v8653_v51  ;;  %3248 = vmatmul.bf16.gmra.mxu1 %v7324_v42  ;;  %v3599_v51 = vshrl.u32 %v3349_v15, 16  ;;  %v4240_v48 = vsel %vm7728_vm7, %v6904_v17, %v4239_v54  ;;  %v8712_v37 = vrot.slane %v3595_v7, 5 }
 0x230   : > { %v2969_v11 = vpop.f32.mrf.mxu0  ;;  %v4265_v15 = vshrl.u32 %v4033_v25, 16  ;;  %v4437_v17 = vunpack.c.l.b16 %v4240_v48  ;;  %v4258_v61 = vrot.slane %v4256_v4, 7  ;;  %v4259_v48 = vshll.u32 %v4032_v57, 16 }
 0x231   : > { %v2352_v2 = vpop.f32.mrf.mxu3  ;;  %v8696_v8 = vadd.f32 %v2969_v11, %v8454_v23  ;;  %v3586_v23 = vshrl.u32 %v3348_v12, 16  ;;  %v3601_v5 = vrot.slane %v3599_v51, 4  ;;  %v3810_v11 = vpack.c.b16 %v3787_v26, %v3786_v35 }
 0x232   : > { %v8693_v53 = vadd.f32 %v2352_v2, %v1700_v46  ;;  %v3350_v46 = vld [vmem:[#allocation2 + $0xac] sm:$0x1]  ;;  %v4461_v7 = vpack.c.b16 %v4438_v63, %v4437_v17  ;;  %v4267_v43 = vrot.slane %v4265_v15, 7  ;;  %v4268_v26 = vshll.u32 %v4033_v25, 16  ;;  %v7426_v17 = vld [vmem:[%s9415_s7 + $0x30] sm:$0xff] }
 0x233   : > { %v3588_v30 = vrot.slane %v3586_v23, 4  ;;  %v3605_v12 = vshll.u32 %v3350_v46, 16  ;;  %v4263_v15 = vrot.slane %v4258_v61, 4  ;;  %6052 = vmatpush.bf16.msra.mxu3 %v7426_v17  ;;  %v3354_v17 = vld [vmem:[#allocation2 + $0xc4] sm:$0xf] }
 0x234   : > { %v3211_v47 = vpop.f32.mrf.mxu1  ;;  %v4270_v63 = vor.u32 %v4268_v26, %v4267_v43  ;;  %v3353_v26 = vld [vmem:[#allocation2 + $0xbc] sm:$0x1] }
 0x235   : > { %v8715_v6 = vadd.f32 %v3211_v47, %v3008_v58  ;;  %v3592_v51 = vor.u32 %v3591_v62, %v3588_v30  ;;  %v3607_v58 = vrot.slane %v3605_v12, 5  ;;  %v7325_v47 = vld [vmem:[#allocation2 + $0xa4] sm:$0xff]  ;;  %v6905_v30 = vrot.slane %v4251_v49, 11 }
 0x236   : > { %v1701_v32 = vpop.f32.mrf.mxu2  ;;  %v4261_v62 = vor.u32 %v4259_v48, %v4258_v61  ;;  %v4036_v12 = vld [vmem:[#allocation2 + $0xc8] sm:$0xf] }
 0x237   : > { %v1702_v19 = vadd.f32 %v1701_v32, %v8676_v24  ;;  %v3602_v24 = vor.u32 %v3601_v5, %v8712_v37  ;;  %v3352_v5 = vld [vmem:[#allocation2 + $0xb8] sm:$0xf]  ;;  %v3593_v35 = vrot.slane %v3592_v51, 4  ;;  %v4287_v48 = vshrl.u32 %v4036_v12, 16 }
 0x238   : > { %v2972_v0 = vpop.f32.mrf.mxu0  ;;  %v3619_v57 = vshll.u32 %v3352_v5, 16  ;;  %v4262_v51 = vsel %vm7728_vm7, %v6905_v30, %v4261_v62 }
 0x239   : > { %v2354_v42 = vpop.f32.mrf.mxu3  ;;  %v8720_v54 = vadd.f32 %v2972_v0, %v8470_v55  ;;  %v3603_v9 = vrot.slane %v3602_v24, 4  ;;  %v3351_v0 = vld [vmem:[#allocation2 + $0xb4] sm:$0xf]  ;;  %v3598_v4 = vsel %vm7737_vm10, %v3593_v35, %v8712_v37 }
 0x23a   : > { %v8717_v2 = vadd.f32 %v2354_v42, %v1702_v19  ;;  %v3610_v24 = vshrl.u32 %v3351_v0, 16  ;;  %v3613_v43 = vshll.u32 %v3351_v0, 16  ;;  %v8747_v49 = vrot.slane %v3619_v57, 5 }
 0x23b   : > { %3930 = vmatmul.bf16.gmra.mxu2 %v3810_v11  ;;  %4828 = vmatmul.bf16.gmra.mxu0 %v7357_v60  ;;  %v3608_v25 = vsel %vm7737_vm10, %v3603_v9, %v3607_v58  ;;  %v3623_v11 = vshrl.u32 %v3352_v5, 16  ;;  %v4271_v60 = vsel %vm7728_vm7, %v4263_v15, %v4270_v63  ;;  %v3788_v9 = vunpack.c.l.b16 %v3598_v4 }
 0x23c   : > { %v3214_v23 = vpop.f32.mrf.mxu1  ;;  %v4440_v58 = vunpack.c.l.b16 %v4271_v60  ;;  %v4439_v63 = vunpack.c.l.b16 %v4262_v51  ;;  %v3615_v15 = vrot.slane %v3613_v43, 5  ;;  %v3629_v0 = vshll.u32 %v3353_v26, 16 }
 0x23d   : > { %v8725_v32 = vadd.f32 %v3214_v23, %v8423_v56  ;;  %v3625_v61 = vrot.slane %v3623_v11, 4  ;;  %v4289_v57 = vrot.slane %v4287_v48, 7 }
 0x23e   : > { %4581 = vmatmul.bf16.gmra.mxu3 %v4461_v7  ;;  %v3891_v41 = vpop.f32.mrf.mxu2 }
 0x23f   : > { %v3971_v55 = vadd.f32 %v3891_v41, %v8691_v50  ;;  %3253 = vmatmul.bf16.gmra.mxu1 %v7325_v47  ;;  %v7402_v50 = vld [vmem:[%s9413_s5 + $0x30] sm:$0xff]  ;;  %v4035_v41 = vld [vmem:[#allocation2 + $0xc4] sm:$0xf]  ;;  %v3612_v47 = vrot.slane %v3610_v24, 4 }
 0x240   : > { %v2974_v42 = vpop.f32.mrf.mxu0  ;;  %5771 = vmatpush.bf16.msra.mxu2 %v7402_v50  ;;  %v4278_v30 = vshrl.u32 %v4035_v41, 16  ;;  %v4462_v50 = vpack.c.b16 %v4440_v58, %v4439_v63 }
 0x241   : > { %v4542_v19 = vpop.f32.mrf.mxu3  ;;  %v8733_v56 = vadd.f32 %v2974_v42, %v8497_v1  ;;  %v3789_v1 = vunpack.c.l.b16 %v3608_v25  ;;  %v4034_v42 = vld [vmem:[#allocation2 + $0xc0] sm:$0x8]  ;;  %v3616_v24 = vor.u32 %v3615_v15, %v3612_v47  ;;  %v3637_v15 = vshll.u32 %v3354_v17, 16 }
 0x242   : > { %v8727_v46 = vadd.f32 %v4542_v19, %v3971_v55  ;;  %v4273_v25 = vshrl.u32 %v4034_v42, 16  ;;  %v4280_v11 = vrot.slane %v4278_v30, 7 }
 0x243   : > { %v3811_v35 = vpack.c.b16 %v3789_v1, %v3788_v9 }
 0x244   : > { %v3216_v7 = vpop.f32.mrf.mxu1  ;;  %v6906_v58 = vrot.slane %v4273_v25, 11  ;;  %v4285_v42 = vrot.slane %v4280_v11, 4  ;;  %v4038_v25 = vld [vmem:[#allocation2 + $0xd4] sm:$0xf] }
 0x245   : > { %v8751_v37 = vadd.f32 %v3216_v7, %v8436_v28  ;;  %v3626_v28 = vor.u32 %v3625_v61, %v8747_v49  ;;  %v3355_v7 = vld [vmem:[#allocation2 + $0xc8] sm:$0xf]  ;;  %v7326_v61 = vld [vmem:[#allocation2 + $0xb4] sm:$0xff] }
 0x246   : > { %v3893_v39 = vpop.f32.mrf.mxu2  ;;  %v3647_v63 = vshrl.u32 %v3355_v7, 16 }
 0x247   : > { %v3972_v23 = vadd.f32 %v3893_v39, %v8715_v6  ;;  %v7358_v6 = vld [vmem:[#allocation2 + $0x44] sm:$0xff]  ;;  %v3627_v1 = vrot.slane %v3626_v28, 4  ;;  %v3631_v39 = vrot.slane %v3629_v0, 5 }
 0x248   : > { %v2977_v19 = vpop.f32.mrf.mxu0 }
 0x249   : > { %v4544_v55 = vpop.f32.mrf.mxu3  ;;  %v8756_v62 = vadd.f32 %v2977_v19, %v8507_v18  ;;  %v4290_v18 = vshll.u32 %v4036_v12, 16 }
 0x24a   : > { %v8753_v5 = vadd.f32 %v4544_v55, %v3972_v23  ;;  %v4281_v23 = vshll.u32 %v4035_v41, 16  ;;  %v3634_v55 = vshrl.u32 %v3354_v17, 16  ;;  %v7389_v41 = vld [vmem:[%s9411_s3 + $0x208] sm:$0xff] }
 0x24b   : > { %3935 = vmatmul.bf16.gmra.mxu2 %v3811_v35  ;;  %4833 = vmatmul.bf16.gmra.mxu0 %v7358_v6  ;;  %v4292_v26 = vor.u32 %v4290_v18, %v4289_v57  ;;  %v3643_v35 = vshll.u32 %v3355_v7, 16  ;;  %v4039_v57 = vld [vmem:[#allocation2 + $0xd8] sm:$0xf] }
 0x24c   : > { %v3219_v60 = vpop.f32.mrf.mxu1  ;;  %v4283_v47 = vor.u32 %v4281_v23, %v4280_v11  ;;  %5503 = vmatpush.bf16.msra.mxu1 %v7389_v41  ;;  %v4309_v23 = vshrl.u32 %v4039_v57, 16 }
 0x24d   : > { %v8761_v43 = vadd.f32 %v3219_v60, %v8459_v36  ;;  %v3632_v36 = vsel %vm7737_vm10, %v3627_v1, %v3631_v39  ;;  %v4293_v6 = vsel %vm7728_vm7, %v4285_v42, %v4292_v26  ;;  %v8780_v0 = vrot.slane %v3643_v35, 5  ;;  %v3356_v60 = vld [vmem:[#allocation2 + $0xcc] sm:$0x1] }
 0x24e   : > { %4586 = vmatmul.bf16.gmra.mxu3 %v4462_v50  ;;  %v3896_v4 = vpop.f32.mrf.mxu2  ;;  %v4284_v28 = vsel %vm7728_vm7, %v6906_v58, %v4283_v47  ;;  %v3649_v50 = vrot.slane %v3647_v63, 4  ;;  %v4442_v39 = vunpack.c.l.b16 %v4293_v6  ;;  %v3653_v47 = vshll.u32 %v3356_v60, 16  ;;  %v7327_v60 = vld [vmem:[#allocation2 + $0xc4] sm:$0xff] }
 0x24f   : > { %v3973_v51 = vadd.f32 %v3896_v4, %v8725_v32  ;;  %3258 = vmatmul.bf16.gmra.mxu1 %v7326_v61  ;;  %v3617_v32 = vrot.slane %v3616_v24, 4  ;;  %v3636_v24 = vrot.slane %v3634_v55, 4  ;;  %v4441_v7 = vunpack.c.l.b16 %v4284_v28  ;;  %v4037_v55 = vld [vmem:[#allocation2 + $0xd0] sm:$0x8] }
 0x250   : > { %v2979_v19 = vpop.f32.mrf.mxu0  ;;  %v4300_v61 = vshrl.u32 %v4038_v25, 16  ;;  %v4311_v42 = vrot.slane %v4309_v23, 7  ;;  %v4312_v28 = vshll.u32 %v4039_v57, 16 }
 0x251   : > { %v4547_v9 = vpop.f32.mrf.mxu3  ;;  %v8766_v12 = vadd.f32 %v2979_v19, %v8529_v40  ;;  %v3622_v30 = vsel %vm7737_vm10, %v3617_v32, %v8747_v49  ;;  %v3791_v40 = vunpack.c.l.b16 %v3632_v36  ;;  %v3650_v19 = vor.u32 %v3649_v50, %v8780_v0  ;;  %v3358_v50 = vld [vmem:[#allocation2 + $0xd8] sm:$0xf] }
 0x252   : > { %v8763_v48 = vadd.f32 %v4547_v9, %v3973_v51  ;;  %v3790_v17 = vunpack.c.l.b16 %v3622_v30  ;;  %v3639_v51 = vrot.slane %v3637_v15, 5  ;;  %v4463_v35 = vpack.c.b16 %v4442_v39, %v4441_v7  ;;  %v3357_v7 = vld [vmem:[#allocation2 + $0xd4] sm:$0xf] }
 0x253   : > { %v4295_v32 = vshrl.u32 %v4037_v55, 16  ;;  %v4302_v36 = vrot.slane %v4300_v61, 7  ;;  %v3651_v41 = vrot.slane %v3650_v19, 4  ;;  %v3655_v30 = vrot.slane %v3653_v47, 5  ;;  %v7425_v19 = vld [vmem:[%s9415_s7 + $0x28] sm:$0xff] }
 0x254   : > { %v3221_v4 = vpop.f32.mrf.mxu1  ;;  %v3812_v26 = vpack.c.b16 %v3791_v40, %v3790_v17  ;;  %v3640_v63 = vor.u32 %v3639_v51, %v3636_v24  ;;  %v4303_v40 = vshll.u32 %v4038_v25, 16  ;;  %v3667_v57 = vshll.u32 %v3358_v50, 16  ;;  %6053 = vmatpush.bf16.msra.mxu3 %v7425_v19 }
 0x255   : > { %v8784_v1 = vadd.f32 %v3221_v4, %v8476_v16  ;;  %v7359_v16 = vld [vmem:[#allocation2 + $0x54] sm:$0xff]  ;;  %v6907_v24 = vrot.slane %v4295_v32, 11  ;;  %v3656_v25 = vsel %vm7737_vm10, %v3651_v41, %v3655_v30  ;;  %v3671_v23 = vshrl.u32 %v3358_v50, 16 }
 0x256   : > { %v3898_v11 = vpop.f32.mrf.mxu2  ;;  %v3641_v17 = vrot.slane %v3640_v63, 4  ;;  %v4305_v39 = vor.u32 %v4303_v40, %v4302_v36  ;;  %v3658_v55 = vshrl.u32 %v3357_v7, 16  ;;  %v3661_v63 = vshll.u32 %v3357_v7, 16 }
 0x257   : > { %v3974_v49 = vadd.f32 %v3898_v11, %v8751_v37  ;;  %v8816_v32 = vrot.slane %v3667_v57, 5 }
 0x258   : > { %v2982_v58 = vpop.f32.mrf.mxu0  ;;  %v3646_v47 = vsel %vm7737_vm10, %v3641_v17, %v8780_v0  ;;  %v4041_v0 = vld [vmem:[#allocation2 + $0xe4] sm:$0xf] }
 0x259   : > { %v4549_v18 = vpop.f32.mrf.mxu3  ;;  %v8790_v37 = vadd.f32 %v2982_v58, %v8544_v45  ;;  %v9435_v45 = vld [vmem:[#allocation5_spill] sm:$0xff]  ;;  %v4322_v57 = vshrl.u32 %v4041_v0, 16 }
 0x25a   : > { %v8786_v9 = vadd.f32 %v4549_v18, %v3974_v49  ;;  %v4314_v18 = vor.u32 %v4312_v28, %v4311_v42  ;;  %v4042_v42 = vld [vmem:[#allocation2 + $0xe8] sm:$0xf]  ;;  %v9436_v28 = vld [vmem:[#allocation6_spill] sm:$0xff] }
 0x25b   : > { %3940 = vmatmul.bf16.gmra.mxu2 %v3812_v26  ;;  %4838 = vmatmul.bf16.gmra.mxu0 %v7359_v16  ;;  %v4307_v26 = vrot.slane %v4302_v36, 4  ;;  %v3793_v16 = vunpack.c.l.b16 %v3656_v25  ;;  %v3673_v36 = vrot.slane %v3671_v23, 4 }
 0x25c   : > { %v3224_v15 = vpop.f32.mrf.mxu1 }
 0x25d   : > { %v8794_v4 = vadd.f32 %v3224_v15, %v9435_v45  ;;  %v3359_v15 = vld [vmem:[#allocation2 + $0xdc] sm:$0x1]  ;;  %v3660_v45 = vrot.slane %v3658_v55, 4 }
 0x25e   : > { %4591 = vmatmul.bf16.gmra.mxu3 %v4463_v35  ;;  %v3901_v6 = vpop.f32.mrf.mxu2  ;;  %v4315_v35 = vsel %vm7728_vm7, %v4307_v26, %v4314_v18  ;;  %v3677_v25 = vshll.u32 %v3359_v15, 16  ;;  %v4325_v15 = vshll.u32 %v4041_v0, 16 }
 0x25f   : > { %v3975_v11 = vadd.f32 %v3901_v6, %v8761_v43  ;;  %3263 = vmatmul.bf16.gmra.mxu1 %v7327_v60  ;;  %v7401_v43 = vld [vmem:[%s9413_s5 + $0x28] sm:$0xff]  ;;  %v3792_v6 = vunpack.c.l.b16 %v3646_v47 }
 0x260   : > { %v2984_v61 = vpop.f32.mrf.mxu0  ;;  %5772 = vmatpush.bf16.msra.mxu2 %v7401_v43  ;;  %v4040_v43 = vld [vmem:[#allocation2 + $0xe0] sm:$0x8] }
 0x261   : > { %v4552_v49 = vpop.f32.mrf.mxu3  ;;  %v8804_v58 = vadd.f32 %v2984_v61, %v8567_v29  ;;  %v4306_v29 = vsel %vm7728_vm7, %v6907_v24, %v4305_v39  ;;  %v3663_v24 = vrot.slane %v3661_v63, 5  ;;  %v4331_v39 = vshrl.u32 %v4042_v42, 16 }
 0x262   : > { %v8796_v51 = vadd.f32 %v4552_v49, %v3975_v11  ;;  %v4444_v11 = vunpack.c.l.b16 %v4315_v35  ;;  %v3813_v49 = vpack.c.b16 %v3793_v16, %v3792_v6  ;;  %v4443_v17 = vunpack.c.l.b16 %v4306_v29  ;;  %v7328_v6 = vld [vmem:[#allocation2 + $0xd4] sm:$0xff] }
 0x263   : > { %v3674_v61 = vor.u32 %v3673_v36, %v8816_v32  ;;  %v3664_v19 = vor.u32 %v3663_v24, %v3660_v45  ;;  %v4333_v47 = vrot.slane %v4331_v39, 7  ;;  %v3679_v16 = vrot.slane %v3677_v25, 5  ;;  %v3360_v39 = vld [vmem:[#allocation2 + $0xe4] sm:$0xf] }
 0x264   : > { %v3226_v30 = vpop.f32.mrf.mxu1  ;;  %v4464_v26 = vpack.c.b16 %v4444_v11, %v4443_v17  ;;  %v4317_v35 = vshrl.u32 %v4040_v43, 16  ;;  %v4324_v63 = vrot.slane %v4322_v57, 7  ;;  %v4334_v36 = vshll.u32 %v4042_v42, 16 }
 0x265   : > { %v8820_v50 = vadd.f32 %v3226_v30, %v9436_v28  ;;  %v3675_v55 = vrot.slane %v3674_v61, 4  ;;  %v3665_v11 = vrot.slane %v3664_v19, 4  ;;  %v7388_v61 = vld [vmem:[%s9411_s3 + $0x200] sm:$0xff]  ;;  %v3685_v43 = vshll.u32 %v3360_v39, 16 }
 0x266   : > { %v3903_v41 = vpop.f32.mrf.mxu2  ;;  %v4336_v45 = vor.u32 %v4334_v36, %v4333_v47  ;;  %v6908_v24 = vrot.slane %v4317_v35, 11  ;;  %v4327_v42 = vor.u32 %v4325_v15, %v4324_v63  ;;  %5504 = vmatpush.bf16.msra.mxu1 %v7388_v61  ;;  %v3364_v61 = vld [vmem:[#allocation2 + $0xf8] sm:$0xf] }
 0x267   : > { %v3976_v40 = vadd.f32 %v3903_v41, %v8784_v1  ;;  %v7360_v1 = vld [vmem:[#allocation2 + $0x64] sm:$0xff]  ;;  %v3680_v17 = vsel %vm7737_vm10, %v3675_v55, %v3679_v16  ;;  %v3670_v25 = vsel %vm7737_vm10, %v3665_v11, %v8816_v32 }
 0x268   : > { %v2987_v7 = vpop.f32.mrf.mxu0  ;;  %v3794_v55 = vunpack.c.l.b16 %v3670_v25  ;;  %v4328_v16 = vsel %vm7728_vm7, %v6908_v24, %v4327_v42 }
 0x269   : > { %v4554_v60 = vpop.f32.mrf.mxu3  ;;  %v8826_v23 = vadd.f32 %v2987_v7, %v8585_v38 }
 0x26a   : > { %v8822_v18 = vadd.f32 %v4554_v60, %v3976_v40  ;;  %v3361_v40 = vld [vmem:[#allocation2 + $0xe8] sm:$0xf] }
 0x26b   : > { %3945 = vmatmul.bf16.gmra.mxu2 %v3813_v49  ;;  %4843 = vmatmul.bf16.gmra.mxu0 %v7360_v1  ;;  %v3691_v7 = vshll.u32 %v3361_v40, 16  ;;  %v3695_v0 = vshrl.u32 %v3361_v40, 16  ;;  %v3682_v1 = vshrl.u32 %v3360_v39, 16  ;;  %v7361_v39 = vld [vmem:[#allocation2 + $0x74] sm:$0xff] }
 0x26c   : > { %v3229_v41 = vpop.f32.mrf.mxu1 }
 0x26d   : > { %v8830_v38 = vadd.f32 %v3229_v41, %v8532_v31  ;;  %v4329_v31 = vrot.slane %v4324_v63, 4  ;;  %v8849_v35 = vrot.slane %v3691_v7, 5  ;;  %v3697_v63 = vrot.slane %v3695_v0, 4 }
 0x26e   : > { %4596 = vmatmul.bf16.gmra.mxu3 %v4464_v26  ;;  %v3906_v29 = vpop.f32.mrf.mxu2  ;;  %v4045_v26 = vld [vmem:[#allocation2 + $0xf8] sm:$0xf]  ;;  %v3684_v40 = vrot.slane %v3682_v1, 4 }
 0x26f   : > { %v3977_v30 = vadd.f32 %v3906_v29, %v8794_v4  ;;  %3268 = vmatmul.bf16.gmra.mxu1 %v7328_v6  ;;  %v4337_v57 = vsel %vm7728_vm7, %v4329_v31, %v4336_v45  ;;  %v4044_v29 = vld [vmem:[#allocation2 + $0xf4] sm:$0xf]  ;;  %v4353_v6 = vshrl.u32 %v4045_v26, 16  ;;  %v4043_v31 = vld [vmem:[#allocation2 + $0xf0] sm:$0x8] }
 0x270   : > { %v2989_v49 = vpop.f32.mrf.mxu0  ;;  %v4446_v36 = vunpack.c.l.b16 %v4337_v57  ;;  %v4344_v24 = vshrl.u32 %v4044_v29, 16  ;;  %v4339_v57 = vshrl.u32 %v4043_v31, 16 }
 0x271   : > { %v4557_v28 = vpop.f32.mrf.mxu3  ;;  %v8837_v4 = vadd.f32 %v2989_v49, %v8610_v27  ;;  %v3795_v27 = vunpack.c.l.b16 %v3680_v17  ;;  %v4445_v17 = vunpack.c.l.b16 %v4328_v16  ;;  %v4355_v0 = vrot.slane %v4353_v6, 7 }
 0x272   : > { %v8832_v60 = vadd.f32 %v4557_v28, %v3977_v30  ;;  %v3362_v30 = vld [vmem:[#allocation2 + $0xec] sm:$0x1]  ;;  %v3687_v28 = vrot.slane %v3685_v43, 5  ;;  %v4346_v1 = vrot.slane %v4344_v24, 7  ;;  %v4356_v43 = vshll.u32 %v4045_v26, 16 }
 0x273   : > { %v3814_v49 = vpack.c.b16 %v3795_v27, %v3794_v55  ;;  %v4465_v7 = vpack.c.b16 %v4446_v36, %v4445_v17  ;;  %v3715_v55 = vshll.u32 %v3364_v61, 16  ;;  %v3719_v16 = vshrl.u32 %v3364_v61, 16  ;;  %v7329_v36 = vld [vmem:[#allocation2 + $0xe4] sm:$0xff]  ;;  %v3365_v61 = vld [vmem:[#allocation2 + $0xfc] sm:$0x1] }
 0x274   : > { %v3231_v47 = vpop.f32.mrf.mxu1  ;;  %v3688_v25 = vor.u32 %v3687_v28, %v3684_v40  ;;  %v4347_v6 = vshll.u32 %v4044_v29, 16  ;;  %v6909_v26 = vrot.slane %v4339_v57, 11  ;;  %v4351_v24 = vrot.slane %v4346_v1, 4 }
 0x275   : > { %v8853_v41 = vadd.f32 %v3231_v47, %v8550_v21  ;;  %v3701_v21 = vshll.u32 %v3362_v30, 16  ;;  %v3721_v31 = vrot.slane %v3719_v16, 4 }
 0x276   : > { %v3908_v19 = vpop.f32.mrf.mxu2  ;;  %v3689_v40 = vrot.slane %v3688_v25, 4  ;;  %v4349_v17 = vor.u32 %v4347_v6, %v4346_v1  ;;  %v4047_v25 = vld [vmem:[#allocation2 + $0x104] sm:$0xf] }
 0x277   : > { %v3978_v32 = vadd.f32 %v3908_v19, %v8820_v50  ;;  %v3698_v50 = vor.u32 %v3697_v63, %v8849_v35  ;;  %v4366_v6 = vshrl.u32 %v4047_v25, 16 }
 0x278   : > { %v2992_v45 = vpop.f32.mrf.mxu0  ;;  %v4350_v1 = vsel %vm7728_vm7, %v6909_v26, %v4349_v17 }
 0x279   : > { %v4559_v15 = vpop.f32.mrf.mxu3  ;;  %v8858_v42 = vadd.f32 %v2992_v45, %v8623_v44  ;;  %v3699_v47 = vrot.slane %v3698_v50, 4  ;;  %v3703_v44 = vrot.slane %v3701_v21, 5  ;;  %v3363_v50 = vld [vmem:[#allocation2 + $0xf4] sm:$0xf]  ;;  %v8875_v21 = vrot.slane %v3715_v55, 5 }
 0x27a   : > { %v8855_v11 = vadd.f32 %v4559_v15, %v3978_v32  ;;  %v9437_v32 = vld [vmem:[#allocation7_spill] sm:$0xff]  ;;  %v4358_v15 = vor.u32 %v4356_v43, %v4355_v0  ;;  %v3706_v43 = vshrl.u32 %v3363_v50, 16 }
 0x27b   : > { %3950 = vmatmul.bf16.gmra.mxu2 %v3814_v49  ;;  %4848 = vmatmul.bf16.gmra.mxu0 %v7361_v39  ;;  %v7400_v39 = vld [vmem:[%s9413_s5 + $0x20] sm:$0xff]  ;;  %v3704_v29 = vsel %vm7737_vm10, %v3699_v47, %v3703_v44  ;;  %v3722_v16 = vor.u32 %v3721_v31, %v8875_v21 }
 0x27c   : > { %v3234_v19 = vpop.f32.mrf.mxu1  ;;  %v4359_v0 = vsel %vm7728_vm7, %v4351_v24, %v4358_v15  ;;  %5773 = vmatpush.bf16.msra.mxu2 %v7400_v39  ;;  %v3797_v57 = vunpack.c.l.b16 %v3704_v29  ;;  %v3708_v24 = vrot.slane %v3706_v43, 4  ;;  %v698_v43 = vld [vmem:[#allocation2 + $0x110] sm:$0x8] }
 0x27d   : > { %v8863_v30 = vadd.f32 %v3234_v19, %v9437_v32  ;;  %v4048_v19 = vld [vmem:[#allocation2 + $0x108] sm:$0xf]  ;;  %v4448_v55 = vunpack.c.l.b16 %v4359_v0 }
 0x27e   : > { %4601 = vmatmul.bf16.gmra.mxu3 %v4465_v7  ;;  %v3911_v27 = vpop.f32.mrf.mxu2  ;;  %v7424_v7 = vld [vmem:[%s9415_s7 + $0x20] sm:$0xff]  ;;  %v9438_v32 = vld [vmem:[#allocation8_spill] sm:$0xff] }
 0x27f   : > { %v3979_v63 = vadd.f32 %v3911_v27, %v8830_v38  ;;  %3273 = vmatmul.bf16.gmra.mxu1 %v7329_v36  ;;  %6054 = vmatpush.bf16.msra.mxu3 %v7424_v7  ;;  %v3709_v27 = vshll.u32 %v3363_v50, 16  ;;  %v7362_v50 = vld [vmem:[#allocation2 + $0x84] sm:$0xff]  ;;  %v3723_v7 = vrot.slane %v3722_v16, 4 }
 0x280   : > { %v2994_v49 = vpop.f32.mrf.mxu0 }
 0x281   : > { %v4562_v45 = vpop.f32.mrf.mxu3  ;;  %v8871_v38 = vadd.f32 %v2994_v49, %v8647_v22  ;;  %v3694_v22 = vsel %vm7737_vm10, %v3689_v40, %v8849_v35  ;;  %v4046_v40 = vld [vmem:[#allocation2 + $0x100] sm:$0x8]  ;;  %v4375_v49 = vshrl.u32 %v4048_v19, 16  ;;  %v3711_v39 = vrot.slane %v3709_v27, 5  ;;  %v3366_v27 = vld [vmem:[#allocation2 + $0x104] sm:$0xf] }
 0x282   : > { %v8865_v28 = vadd.f32 %v4562_v45, %v3979_v63  ;;  %v3725_v63 = vshll.u32 %v3365_v61, 16  ;;  %v3796_v35 = vunpack.c.l.b16 %v3694_v22  ;;  %v4447_v45 = vunpack.c.l.b16 %v4350_v1  ;;  %v800_v61 = vld [vmem:[#allocation2 + $0x10c] sm:$0x1] }
 0x283   : > { %v4361_v22 = vshrl.u32 %v4046_v40, 16  ;;  %v801_v1 = vsel %vm7693_vm5, 0, %v800_v61 }
 0x284   : > { %v3236_v44 = vpop.f32.mrf.mxu1  ;;  %v3815_v17 = vpack.c.b16 %v3797_v57, %v3796_v35  ;;  %v4466_v31 = vpack.c.b16 %v4448_v55, %v4447_v45  ;;  %v3727_v0 = vrot.slane %v3725_v63, 5  ;;  %v4378_v57 = vshll.u32 %v4048_v19, 16  ;;  %802 = vst [vmem:[#allocation2 + $0x10c] sm:$0x1] %v801_v1  ;;  %v7330_v19 = vld [vmem:[#allocation2 + $0xf4] sm:$0xff] }
 0x285   : > { %v8891_v36 = vadd.f32 %v3236_v44, %v9438_v32  ;;  %v4368_v44 = vrot.slane %v4366_v6, 7  ;;  %v4369_v32 = vshll.u32 %v4047_v25, 16  ;;  %v699_v55 = vsel %vm7683_vm2, 0, %v698_v43  ;;  %v3367_v25 = vld [vmem:[#allocation2 + $0x108] sm:$0xf] }
 0x286   : > { %v8887_v47 = vpop.f32.mrf.mxu2  ;;  %v3728_v6 = vsel %vm7737_vm10, %v3723_v7, %v3727_v0  ;;  %700 = vst [vmem:[#allocation2 + $0x110] sm:$0x8] %v699_v55  ;;  %v3739_v0 = vshll.u32 %v3367_v25, 16  ;;  %v3743_v43 = vshrl.u32 %v3367_v25, 16 }
 0x287   : > { %9439 = vst [vmem:[#allocation5_spill] sm:$0xff] %v8891_v36 }
 0x288   : > { %v2997_v26 = vpop.f32.mrf.mxu0  ;;  %v8920_v35 = vrot.slane %v3739_v0, 5  ;;  %v3745_v55 = vrot.slane %v3743_v43, 4 }
 0x289   : > { %v8893_v15 = vpop.f32.mrf.mxu3  ;;  %v8896_v29 = vadd.f32 %v2997_v26, %v8656_v34  ;;  %v3712_v34 = vor.u32 %v3711_v39, %v3708_v24  ;;  %v4371_v26 = vor.u32 %v4369_v32, %v4368_v44  ;;  %v4373_v24 = vrot.slane %v4368_v44, 4  ;;  %v4051_v44 = vld [vmem:[#allocation2 + $0x118] sm:$0xf] }
 0x28a   : > { %9440 = vst [vmem:[#allocation6_spill] sm:$0xff] %v8893_v15  ;;  %v4377_v15 = vrot.slane %v4375_v49, 7  ;;  %v6910_v49 = vrot.slane %v4361_v22, 11  ;;  %v3799_v32 = vunpack.c.l.b16 %v3728_v6  ;;  %v3746_v0 = vor.u32 %v3745_v55, %v8920_v35 }
 0x28b   : > { %3955 = vmatmul.bf16.gmra.mxu2 %v3815_v17  ;;  %4853 = vmatmul.bf16.gmra.mxu0 %v7362_v50  ;;  %v3730_v50 = vshrl.u32 %v3366_v27, 16  ;;  %v3713_v7 = vrot.slane %v3712_v34, 4 }
 0x28c   : > { %v3239_v63 = vpop.f32.mrf.mxu1  ;;  %v4380_v39 = vor.u32 %v4378_v57, %v4377_v15  ;;  %v4372_v15 = vsel %vm7728_vm7, %v6910_v49, %v4371_v26  ;;  %v3368_v26 = vld [vmem:[#allocation2 + $0x10c] sm:$0x1] }
 0x28d   : > { %v8906_v40 = vadd.f32 %v3239_v63, %v8613_v20  ;;  %v4050_v20 = vld [vmem:[#allocation2 + $0x114] sm:$0xf]  ;;  %v3718_v22 = vsel %vm7737_vm10, %v3713_v7, %v8875_v21  ;;  %v4397_v21 = vshrl.u32 %v4051_v44, 16 }
 0x28e   : > { %4606 = vmatmul.bf16.gmra.mxu3 %v4466_v31  ;;  %v3916_v16 = vpop.f32.mrf.mxu2  ;;  %v3733_v31 = vshll.u32 %v3366_v27, 16  ;;  %v4381_v57 = vsel %vm7728_vm7, %v4373_v24, %v4380_v39  ;;  %v3732_v27 = vrot.slane %v3730_v50, 4  ;;  %v4391_v36 = vshll.u32 %v4050_v20, 16 }
 0x28f   : > { %v3981_v45 = vadd.f32 %v3916_v16, %v8863_v30  ;;  %3278 = vmatmul.bf16.gmra.mxu1 %v7330_v19  ;;  %v4937_v16 = vld [vmem:[#allocation2 + $0x28] sm:$0xf]  ;;  %v4449_v19 = vunpack.c.l.b16 %v4372_v15  ;;  %v4450_v49 = vunpack.c.l.b16 %v4381_v57  ;;  %v7363_v15 = vld [vmem:[#allocation2 + $0x94] sm:$0xff]  ;;  %v3749_v57 = vshll.u32 %v3368_v26, 16 }
 0x290   : > { %v2999_v1 = vpop.f32.mrf.mxu0  ;;  %v3735_v34 = vrot.slane %v3733_v31, 5  ;;  %v4994_v31 = vshll.u32 %v4937_v16, 16 }
 0x291   : > { %v4567_v17 = vpop.f32.mrf.mxu3  ;;  %v8911_v30 = vadd.f32 %v2999_v1, %v8681_v3  ;;  %v4388_v3 = vshrl.u32 %v4050_v20, 16  ;;  %v4998_v1 = vshrl.u32 %v4937_v16, 16  ;;  %v3747_v20 = vrot.slane %v3746_v0, 4 }
 0x292   : > { %v8908_v61 = vadd.f32 %v4567_v17, %v3981_v45  ;;  %v3798_v45 = vunpack.c.l.b16 %v3718_v22  ;;  %v4049_v17 = vld [vmem:[#allocation2 + $0x110] sm:$0x8]  ;;  %v3736_v50 = vor.u32 %v3735_v34, %v3732_v27  ;;  %v4400_v22 = vshll.u32 %v4051_v44, 16 }
 0x293   : > { %v4390_v43 = vrot.slane %v4388_v3, 7  ;;  %v8933_v34 = vrot.slane %v4994_v31, 5  ;;  %v5000_v16 = vrot.slane %v4998_v1, 4  ;;  %v4938_v3 = vld [vmem:[#allocation2 + $0x2c] sm:$0x1] }
 0x294   : > { %9443 = vst [vmem:[#allocation7_spill] sm:$0xff] %v8908_v61  ;;  %v3241_v25 = vpop.f32.mrf.mxu1  ;;  %v3816_v39 = vpack.c.b16 %v3799_v32, %v3798_v45  ;;  %v4936_v61 = vld [vmem:[#allocation2 + $0x24] sm:$0xf]  ;;  %v3737_v55 = vrot.slane %v3736_v50, 4  ;;  %v5004_v50 = vshll.u32 %v4938_v3, 16 }
 0x295   : > { %v8925_v6 = vadd.f32 %v3241_v25, %v8630_v33  ;;  %v4383_v25 = vshrl.u32 %v4049_v17, 16  ;;  %v4985_v32 = vshrl.u32 %v4936_v61, 16  ;;  %v4988_v27 = vshll.u32 %v4936_v61, 16 }
 0x296   : > { %v8922_v63 = vpop.f32.mrf.mxu2  ;;  %v4393_v44 = vor.u32 %v4391_v36, %v4390_v43  ;;  %v4395_v26 = vrot.slane %v4390_v43, 4  ;;  %v3742_v0 = vsel %vm7737_vm10, %v3737_v55, %v8920_v35  ;;  %v7423_v35 = vld [vmem:[%s9415_s7 + $0x18] sm:$0xff] }
 0x297   : > { %9444 = vst [vmem:[#allocation8_spill] sm:$0xff] %v8922_v63  ;;  %v6911_v63 = vrot.slane %v4383_v25, 11  ;;  %v4990_v31 = vrot.slane %v4988_v27, 5  ;;  %v5006_v25 = vrot.slane %v5004_v50, 5  ;;  %6055 = vmatpush.bf16.msra.mxu3 %v7423_v35  ;;  %v4940_v55 = vld [vmem:[#allocation2 + $0x38] sm:$0xf] }
 0x298   : > { %9445 = vst [vmem:[#allocation3_spill] sm:$0xff] %v8925_v6  ;;  %v3002_v7 = vpop.f32.mrf.mxu0  ;;  %v4399_v6 = vrot.slane %v4397_v21, 7 }
 0x299   : > { %v8927_v24 = vpop.f32.mrf.mxu3  ;;  %v8931_v33 = vadd.f32 %v3002_v7, %v8693_v53  ;;  %v3751_v7 = vrot.slane %v3749_v57, 5  ;;  %v4394_v43 = vsel %vm7728_vm7, %v6911_v63, %v4393_v44 }
 0x29a   : > { %9446 = vst [vmem:[#allocation9_spill] sm:$0xff] %v8927_v24  ;;  %v4467_v24 = vpack.c.b16 %v4450_v49, %v4449_v19  ;;  %v4402_v17 = vor.u32 %v4400_v22, %v4399_v6  ;;  %v7331_v49 = vld [vmem:[#allocation2 + $0x104] sm:$0xff]  ;;  %v4451_v27 = vunpack.c.l.b16 %v4394_v43 }
 0x29b   : > { %3960 = vmatmul.bf16.gmra.mxu2 %v3816_v39  ;;  %4858 = vmatmul.bf16.gmra.mxu0 %v7363_v15  ;;  %v4987_v39 = vrot.slane %v4985_v32, 4  ;;  %v3752_v6 = vsel %vm7737_vm10, %v3747_v20, %v3751_v7  ;;  %v5022_v7 = vshrl.u32 %v4940_v55, 16 }
 0x29c   : > { %v3244_v53 = vpop.f32.mrf.mxu1  ;;  %v4403_v22 = vsel %vm7728_vm7, %v4395_v26, %v4402_v17  ;;  %v3801_v32 = vunpack.c.l.b16 %v3752_v6  ;;  %v4941_v6 = vld [vmem:[#allocation2 + $0x3c] sm:$0x1] }
 0x29d   : > { %v3303_v19 = vadd.f32 %v3244_v53, %v8651_v52  ;;  %v4991_v15 = vor.u32 %v4990_v31, %v4987_v39  ;;  %v5018_v53 = vshll.u32 %v4940_v55, 16  ;;  %v7364_v39 = vld [vmem:[#allocation2 + $0xa4] sm:$0xff] }
 0x29e   : > { %4611 = vmatmul.bf16.gmra.mxu3 %v4467_v24  ;;  %v3921_v45 = vpop.f32.mrf.mxu2  ;;  %v5001_v24 = vor.u32 %v5000_v16, %v8933_v34  ;;  %v4452_v16 = vunpack.c.l.b16 %v4403_v22 }
 0x29f   : > { %v3983_v21 = vadd.f32 %v3921_v45, %v8906_v40  ;;  %3283 = vmatmul.bf16.gmra.mxu1 %v7331_v49  ;;  %v7399_v40 = vld [vmem:[%s9413_s5 + $0x18] sm:$0xff]  ;;  %v4992_v3 = vrot.slane %v4991_v15, 4  ;;  %v4939_v49 = vld [vmem:[#allocation2 + $0x34] sm:$0xf] }
 0x2a0   : > { %v3004_v36 = vpop.f32.mrf.mxu0  ;;  %5774 = vmatpush.bf16.msra.mxu2 %v7399_v40  ;;  %v5002_v57 = vrot.slane %v5001_v24, 4  ;;  %v5009_v24 = vshrl.u32 %v4939_v49, 16  ;;  %v5012_v50 = vshll.u32 %v4939_v49, 16 }
 0x2a1   : > { %v4572_v61 = vpop.f32.mrf.mxu3  ;;  %v8947_v52 = vadd.f32 %v3004_v36, %v8717_v2  ;;  %v3800_v2 = vunpack.c.l.b16 %v3742_v0  ;;  %v5020_v36 = vrot.slane %v5018_v53, 5  ;;  %v5024_v0 = vrot.slane %v5022_v7, 4  ;;  %v4943_v53 = vld [vmem:[#allocation2 + $0x48] sm:$0xf] }
 0x2a2   : > { %v8938_v1 = vadd.f32 %v4572_v61, %v3983_v21  ;;  %v5007_v45 = vsel %vm7737_vm10, %v5002_v57, %v5006_v25  ;;  %v4468_v21 = vpack.c.b16 %v4452_v16, %v4451_v27  ;;  %v5011_v25 = vrot.slane %v5009_v24, 4  ;;  %v7365_v24 = vld [vmem:[#allocation2 + $0xb4] sm:$0xff] }
 0x2a3   : > { %v3817_v17 = vpack.c.b16 %v3801_v32, %v3800_v2  ;;  %v5386_v31 = vunpack.c.l.b16 %v5007_v45  ;;  %v5014_v2 = vrot.slane %v5012_v50, 5  ;;  %v5028_v32 = vshll.u32 %v4941_v6, 16 }
 0x2a4   : > { %v3246_v63 = vpop.f32.mrf.mxu1  ;;  %v5042_v49 = vshll.u32 %v4943_v53, 16 }
 0x2a5   : > { %v8961_v59 = vadd.f32 %v3246_v63, %v8664_v13  ;;  %v4997_v13 = vsel %vm7737_vm10, %v4992_v3, %v8933_v34  ;;  %v5025_v34 = vor.u32 %v5024_v0, %v5020_v36  ;;  %v5015_v63 = vor.u32 %v5014_v2, %v5011_v25 }
 0x2a6   : > { %v8958_v20 = vpop.f32.mrf.mxu2  ;;  %v5385_v40 = vunpack.c.l.b16 %v4997_v13  ;;  %v5030_v45 = vrot.slane %v5028_v32, 5  ;;  %v4942_v13 = vld [vmem:[#allocation2 + $0x44] sm:$0xf]  ;;  %v5044_v6 = vrot.slane %v5042_v49, 5  ;;  %v4946_v49 = vld [vmem:[#allocation2 + $0x58] sm:$0xf] }
 0x2a7   : > { %v5026_v3 = vrot.slane %v5025_v34, 4 }
 0x2a8   : > { %v4824_v26 = vpop.f32.mrf.mxu0  ;;  %v5417_v15 = vpack.c.b16 %v5386_v31, %v5385_v40  ;;  %v5036_v40 = vshll.u32 %v4942_v13, 16 }
 0x2a9   : > { %v8963_v44 = vpop.f32.mrf.mxu3  ;;  %v8968_v61 = vadd.f32 %v4824_v26, %v8727_v46 }
 0x2ab   : > { %3965 = vmatmul.bf16.gmra.mxu2 %v3817_v17  ;;  %4863 = vmatmul.bf16.gmra.mxu0 %v7364_v39  ;;  %v5016_v17 = vrot.slane %v5015_v63, 4  ;;  %v5046_v39 = vshrl.u32 %v4943_v53, 16  ;;  %v7398_v53 = vld [vmem:[%s9413_s5 + $0x10] sm:$0xff] }
 0x2ac   : > { %v3249_v22 = vpop.f32.mrf.mxu1  ;;  %5775 = vmatpush.bf16.msra.mxu2 %v7398_v53 }
 0x2ad   : > { %v3305_v46 = vadd.f32 %v3249_v22, %v8684_v14  ;;  %v5021_v50 = vsel %vm7737_vm10, %v5016_v17, %v5020_v36 }
 0x2ae   : > { %4616 = vmatmul.bf16.gmra.mxu3 %v4468_v21  ;;  %v3926_v43 = vpop.f32.mrf.mxu2  ;;  %v5031_v21 = vsel %vm7737_vm10, %v5026_v3, %v5030_v45  ;;  %v5387_v22 = vunpack.c.l.b16 %v5021_v50 }
 0x2af   : > { %v3985_v35 = vadd.f32 %v3926_v43, %v3303_v19  ;;  %5505 = vmatmul.bf16.vlgmr.msra.gmra.mxu1 %v5417_v15  ;;  %v5388_v0 = vunpack.c.l.b16 %v5031_v21  ;;  %v5048_v43 = vrot.slane %v5046_v39, 4 }
 0x2b0   : > { %v4826_v16 = vpop.f32.mrf.mxu0 }
 0x2b1   : > { %v4577_v57 = vpop.f32.mrf.mxu3  ;;  %v8977_v55 = vadd.f32 %v4826_v16, %v8753_v5  ;;  %v5418_v34 = vpack.c.b16 %v5388_v0, %v5387_v22  ;;  %v5038_v16 = vrot.slane %v5036_v40, 5  ;;  %v5049_v63 = vor.u32 %v5048_v43, %v5044_v6  ;;  %v4945_v43 = vld [vmem:[#allocation2 + $0x54] sm:$0xf] }
 0x2b2   : > { %v8974_v27 = vadd.f32 %v4577_v57, %v3985_v35  ;;  %v4944_v35 = vld [vmem:[#allocation2 + $0x4c] sm:$0x1]  ;;  %v5066_v0 = vshll.u32 %v4946_v49, 16 }
 0x2b3   : > { %v5052_v3 = vshll.u32 %v4944_v35, 16  ;;  %v5050_v17 = vrot.slane %v5049_v63, 4  ;;  %v7366_v35 = vld [vmem:[#allocation2 + $0xc4] sm:$0xff] }
 0x2b4   : > { %v3251_v14 = vpop.f32.mrf.mxu1 }
 0x2b5   : > { %v8982_v7 = vadd.f32 %v3251_v14, %v8696_v8  ;;  %v5033_v8 = vshrl.u32 %v4942_v13, 16  ;;  %v5054_v21 = vrot.slane %v5052_v3, 5 }
 0x2b6   : > { %v8979_v19 = vpop.f32.mrf.mxu2 }
 0x2b7   : > { %v5035_v32 = vrot.slane %v5033_v8, 4  ;;  %v5055_v50 = vsel %vm7737_vm10, %v5050_v17, %v5054_v21  ;;  %v5070_v8 = vshrl.u32 %v4946_v49, 16 }
 0x2b8   : > { %v4829_v5 = vpop.f32.mrf.mxu0 }
 0x2b9   : > { %v8984_v26 = vpop.f32.mrf.mxu3  ;;  %v8989_v31 = vadd.f32 %v4829_v5, %v8763_v48 }
 0x2bb   : > { %4868 = vmatmul.bf16.gmra.mxu0 %v7365_v24 }
 0x2bc   : > { %v3254_v57 = vpop.f32.mrf.mxu1 }
 0x2bd   : > { %v3307_v2 = vadd.f32 %v3254_v57, %v8720_v54  ;;  %v7422_v54 = vld [vmem:[%s9415_s7 + $0x10] sm:$0xff]  ;;  %v5390_v57 = vunpack.c.l.b16 %v5055_v50 }
 0x2be   : > { %v3931_v15 = vpop.f32.mrf.mxu2  ;;  %6056 = vmatpush.bf16.msra.mxu3 %v7422_v54 }
 0x2bf   : > { %v3987_v25 = vadd.f32 %v3931_v15, %v3305_v46  ;;  %5510 = vmatmul.bf16.gmra.mxu1 %v5418_v34  ;;  %v5039_v46 = vor.u32 %v5038_v16, %v5035_v32  ;;  %v5068_v34 = vrot.slane %v5066_v0, 5  ;;  %v4947_v16 = vld [vmem:[#allocation2 + $0x5c] sm:$0x1] }
 0x2c0   : > { %v4831_v45 = vpop.f32.mrf.mxu0  ;;  %v5076_v49 = vshll.u32 %v4947_v16, 16  ;;  %v7367_v16 = vld [vmem:[#allocation2 + $0xd4] sm:$0xff] }
 0x2c1   : > { %v4582_v48 = vpop.f32.mrf.mxu3  ;;  %v9000_v14 = vadd.f32 %v4831_v45, %v8786_v9  ;;  %v5040_v9 = vrot.slane %v5039_v46, 4 }
 0x2c2   : > { %v8994_v36 = vadd.f32 %v4582_v48, %v3987_v25  ;;  %v5060_v25 = vshll.u32 %v4945_v43, 16  ;;  %v5072_v48 = vrot.slane %v5070_v8, 4  ;;  %v5078_v8 = vrot.slane %v5076_v49, 5 }
 0x2c3   : > { %v5045_v15 = vsel %vm7737_vm10, %v5040_v9, %v5044_v6 }
 0x2c4   : > { %v3256_v5 = vpop.f32.mrf.mxu1  ;;  %v5389_v32 = vunpack.c.l.b16 %v5045_v15  ;;  %v5062_v17 = vrot.slane %v5060_v25, 5  ;;  %v5073_v21 = vor.u32 %v5072_v48, %v5068_v34  ;;  %v4948_v48 = vld [vmem:[#allocation2 + $0x64] sm:$0xf] }
 0x2c5   : > { %v9008_v13 = vadd.f32 %v3256_v5, %v8733_v56  ;;  %v5057_v56 = vshrl.u32 %v4945_v43, 16 }
 0x2c6   : > { %v9005_v39 = vpop.f32.mrf.mxu2  ;;  %v5419_v54 = vpack.c.b16 %v5390_v57, %v5389_v32  ;;  %v5074_v0 = vrot.slane %v5073_v21, 4 }
 0x2c7   : > { %v5059_v46 = vrot.slane %v5057_v56, 4 }
 0x2c8   : > { %v4834_v40 = vpop.f32.mrf.mxu0  ;;  %v5079_v57 = vsel %vm7737_vm10, %v5074_v0, %v5078_v8 }
 0x2c9   : > { %v9010_v24 = vpop.f32.mrf.mxu3  ;;  %v9015_v22 = vadd.f32 %v4834_v40, %v8796_v51  ;;  %v5063_v50 = vor.u32 %v5062_v17, %v5059_v46  ;;  %v4949_v40 = vld [vmem:[#allocation2 + $0x68] sm:$0xf]  ;;  %v4950_v17 = vld [vmem:[#allocation2 + $0x6c] sm:$0x1] }
 0x2ca   : > { %v5090_v56 = vshll.u32 %v4949_v40, 16  ;;  %v5094_v25 = vshrl.u32 %v4949_v40, 16 }
 0x2cb   : > { %4873 = vmatmul.bf16.gmra.mxu0 %v7366_v35  ;;  %v5064_v15 = vrot.slane %v5063_v50, 4 }
 0x2cc   : > { %v3259_v3 = vpop.f32.mrf.mxu1 }
 0x2cd   : > { %v3309_v53 = vadd.f32 %v3259_v3, %v8756_v62  ;;  %v5392_v3 = vunpack.c.l.b16 %v5079_v57  ;;  %v7397_v57 = vld [vmem:[%s9413_s5 + $0x8] sm:$0xff] }
 0x2ce   : > { %v3936_v63 = vpop.f32.mrf.mxu2  ;;  %5776 = vmatpush.bf16.msra.mxu2 %v7397_v57 }
 0x2cf   : > { %v3989_v45 = vadd.f32 %v3936_v63, %v3307_v2  ;;  %5515 = vmatmul.bf16.gmra.mxu1 %v5419_v54  ;;  %v5069_v63 = vsel %vm7737_vm10, %v5064_v15, %v5068_v34  ;;  %v5092_v54 = vrot.slane %v5090_v56, 5 }
 0x2d0   : > { %v4836_v5 = vpop.f32.mrf.mxu0  ;;  %v5391_v46 = vunpack.c.l.b16 %v5069_v63 }
 0x2d1   : > { %v4587_v51 = vpop.f32.mrf.mxu3  ;;  %v9023_v9 = vadd.f32 %v4836_v5, %v8822_v18 }
 0x2d2   : > { %v9020_v6 = vadd.f32 %v4587_v51, %v3989_v45  ;;  %v5084_v45 = vshll.u32 %v4948_v48, 16  ;;  %v5096_v51 = vrot.slane %v5094_v25, 4  ;;  %v5420_v0 = vpack.c.b16 %v5392_v3, %v5391_v46 }
 0x2d4   : > { %v3261_v62 = vpop.f32.mrf.mxu1  ;;  %v5086_v40 = vrot.slane %v5084_v45, 5 }
 0x2d5   : > { %v9028_v43 = vadd.f32 %v3261_v62, %v8766_v12  ;;  %v5081_v12 = vshrl.u32 %v4948_v48, 16  ;;  %v5097_v62 = vor.u32 %v5096_v51, %v5092_v54 }
 0x2d6   : > { %v9025_v2 = vpop.f32.mrf.mxu2 }
 0x2d7   : > { %v5083_v8 = vrot.slane %v5081_v12, 4  ;;  %v5098_v25 = vrot.slane %v5097_v62, 4 }
 0x2d8   : > { %v4839_v18 = vpop.f32.mrf.mxu0 }
 0x2d9   : > { %v9030_v35 = vpop.f32.mrf.mxu3  ;;  %v9035_v32 = vadd.f32 %v4839_v18, %v8832_v60  ;;  %v5100_v18 = vshll.u32 %v4950_v17, 16 }
 0x2db   : > { %4878 = vmatmul.bf16.gmra.mxu0 %v7367_v16  ;;  %v5102_v48 = vrot.slane %v5100_v18, 5  ;;  %v4952_v16 = vld [vmem:[#allocation2 + $0x78] sm:$0xf]  ;;  %v4953_v18 = vld [vmem:[#allocation2 + $0x7c] sm:$0x1] }
 0x2dc   : > { %v3264_v49 = vpop.f32.mrf.mxu1  ;;  %v5114_v46 = vshll.u32 %v4952_v16, 16  ;;  %v5118_v17 = vshrl.u32 %v4952_v16, 16 }
 0x2dd   : > { %v3311_v50 = vadd.f32 %v3264_v49, %v8790_v37  ;;  %v7421_v37 = vld [vmem:[%s9415_s7 + $0x8] sm:$0xff]  ;;  %v5103_v51 = vsel %vm7737_vm10, %v5098_v25, %v5102_v48 }
 0x2de   : > { %v3941_v21 = vpop.f32.mrf.mxu2  ;;  %6057 = vmatpush.bf16.msra.mxu3 %v7421_v37  ;;  %v7368_v49 = vld [vmem:[#allocation2 + $0xe4] sm:$0xff] }
 0x2df   : > { %v3991_v5 = vadd.f32 %v3941_v21, %v3309_v53  ;;  %5520 = vmatmul.bf16.gmra.mxu1 %v5420_v0  ;;  %v5087_v53 = vor.u32 %v5086_v40, %v5083_v8  ;;  %v4951_v21 = vld [vmem:[#allocation2 + $0x74] sm:$0xf]  ;;  %v5394_v0 = vunpack.c.l.b16 %v5103_v51  ;;  %v5116_v40 = vrot.slane %v5114_v46, 5 }
 0x2e0   : > { %v4841_v15 = vpop.f32.mrf.mxu0  ;;  %v5108_v8 = vshll.u32 %v4951_v21, 16 }
 0x2e1   : > { %v4592_v60 = vpop.f32.mrf.mxu3  ;;  %v9046_v56 = vadd.f32 %v4841_v15, %v8855_v11  ;;  %v5088_v11 = vrot.slane %v5087_v53, 4 }
 0x2e2   : > { %v9040_v34 = vadd.f32 %v4592_v60, %v3991_v5  ;;  %v5105_v60 = vshrl.u32 %v4951_v21, 16 }
 0x2e3   : > { %v5093_v5 = vsel %vm7737_vm10, %v5088_v11, %v5092_v54 }
 0x2e4   : > { %v3266_v3 = vpop.f32.mrf.mxu1  ;;  %v5393_v62 = vunpack.c.l.b16 %v5093_v5  ;;  %v5107_v16 = vrot.slane %v5105_v60, 4 }
 0x2e5   : > { %v9054_v12 = vadd.f32 %v3266_v3, %v8804_v58  ;;  %v5120_v58 = vrot.slane %v5118_v17, 4  ;;  %v5110_v3 = vrot.slane %v5108_v8, 5  ;;  %v4955_v17 = vld [vmem:[#allocation2 + $0x88] sm:$0xf] }
 0x2e6   : > { %v9051_v63 = vpop.f32.mrf.mxu2  ;;  %v5421_v25 = vpack.c.b16 %v5394_v0, %v5393_v62  ;;  %v5138_v60 = vshll.u32 %v4955_v17, 16  ;;  %v5142_v8 = vshrl.u32 %v4955_v17, 16  ;;  %v7369_v62 = vld [vmem:[#allocation2 + $0xf4] sm:$0xff] }
 0x2e7   : > { %9447 = vst [vmem:[#allocation10_spill] sm:$0xff] %v9054_v12  ;;  %v5121_v12 = vor.u32 %v5120_v58, %v5116_v40  ;;  %v5111_v11 = vor.u32 %v5110_v3, %v5107_v16  ;;  %v4954_v58 = vld [vmem:[#allocation2 + $0x84] sm:$0xf] }
 0x2e9   : > { %v9056_v45 = vpop.f32.mrf.mxu3  ;;  %v5122_v51 = vrot.slane %v5121_v12, 4  ;;  %v5112_v5 = vrot.slane %v5111_v11, 4 }
 0x2ea   : > { %9448 = vst [vmem:[#allocation11_spill] sm:$0xff] %v9056_v45  ;;  %v5124_v45 = vshll.u32 %v4953_v18, 16  ;;  %v5129_v18 = vshrl.u32 %v4954_v58, 16 }
 0x2eb   : > { %4883 = vmatmul.bf16.gmra.mxu0 %v7368_v49  ;;  %v5117_v12 = vsel %vm7737_vm10, %v5112_v5, %v5116_v40  ;;  %v7396_v5 = vld [vmem:[%s9413_s5] sm:$0xff] }
 0x2ec   : > { %v3269_v57 = vpop.f32.mrf.mxu1  ;;  %v5126_v46 = vrot.slane %v5124_v45, 5  ;;  %v5131_v17 = vrot.slane %v5129_v18, 4  ;;  %5777 = vmatpush.bf16.msra.mxu2 %v7396_v5 }
 0x2ed   : > { %v3313_v53 = vadd.f32 %v3269_v57, %v8826_v23  ;;  %v5140_v57 = vrot.slane %v5138_v60, 5 }
 0x2ee   : > { %v3946_v15 = vpop.f32.mrf.mxu2  ;;  %v5127_v0 = vsel %vm7737_vm10, %v5122_v51, %v5126_v46 }
 0x2ef   : > { %v3993_v37 = vadd.f32 %v3946_v15, %v3311_v50  ;;  %5525 = vmatmul.bf16.gmra.mxu1 %v5421_v25  ;;  %v5396_v45 = vunpack.c.l.b16 %v5127_v0  ;;  %v5132_v15 = vshll.u32 %v4954_v58, 16  ;;  %v4956_v25 = vld [vmem:[#allocation2 + $0x8c] sm:$0x1]  ;;  %v7420_v0 = vld [vmem:[%s9415_s7] sm:$0xff] }
 0x2f0   : > { %6058 = vmatpush.bf16.msra.mxu3 %v7420_v0 }
 0x2f1   : > { %v4597_v48 = vpop.f32.mrf.mxu3 }
 0x2f2   : > { %v9063_v54 = vadd.f32 %v4597_v48, %v3993_v37  ;;  %v5395_v37 = vunpack.c.l.b16 %v5117_v12 }
 0x2f4   : > { %v3271_v49 = vpop.f32.mrf.mxu1  ;;  %v5422_v51 = vpack.c.b16 %v5396_v45, %v5395_v37 }
 0x2f5   : > { %v9068_v50 = vadd.f32 %v3271_v49, %v8837_v4  ;;  %v5144_v4 = vrot.slane %v5142_v8, 4  ;;  %v5134_v49 = vrot.slane %v5132_v15, 5  ;;  %v4958_v8 = vld [vmem:[#allocation2 + $0x98] sm:$0xf] }
 0x2f6   : > { %v9065_v21 = vpop.f32.mrf.mxu2  ;;  %v5166_v37 = vshrl.u32 %v4958_v8, 16 }
 0x2f7   : > { %9449 = vst [vmem:[#allocation12_spill] sm:$0xff] %v9068_v50  ;;  %v5145_v50 = vor.u32 %v5144_v4, %v5140_v57  ;;  %v5162_v4 = vshll.u32 %v4958_v8, 16 }
 0x2f9   : > { %v9070_v23 = vpop.f32.mrf.mxu3 }
 0x2fa   : > { %9450 = vst [vmem:[#allocation13_spill] sm:$0xff] %v9070_v23  ;;  %v5148_v23 = vshll.u32 %v4956_v25, 16  ;;  %v4957_v25 = vld [vmem:[#allocation2 + $0x94] sm:$0xf] }
 0x2fb   : > { %4888 = vmatmul.bf16.gmra.mxu0 %v7369_v62 }
 0x2fc   : > { %v3274_v16 = vpop.f32.mrf.mxu1  ;;  %v5150_v60 = vrot.slane %v5148_v23, 5 }
 0x2fd   : > { %v3315_v11 = vadd.f32 %v3274_v16, %v8858_v42  ;;  %v5146_v42 = vrot.slane %v5145_v50, 4  ;;  %v5153_v16 = vshrl.u32 %v4957_v25, 16 }
 0x2fe   : > { %v3951_v48 = vpop.f32.mrf.mxu2 }
 0x2ff   : > { %v3995_v3 = vadd.f32 %v3951_v48, %v3313_v53  ;;  %5530 = vmatmul.bf16.gmra.mxu1 %v5422_v51  ;;  %v5135_v53 = vor.u32 %v5134_v49, %v5131_v17  ;;  %v5151_v15 = vsel %vm7737_vm10, %v5146_v42, %v5150_v60  ;;  %v7370_v48 = vld [vmem:[#allocation2 + $0x104] sm:$0xff]  ;;  %v5164_v51 = vrot.slane %v5162_v4, 5  ;;  %v4959_v17 = vld [vmem:[#allocation2 + $0x9c] sm:$0x1] }
 0x300   : > { %v5398_v23 = vunpack.c.l.b16 %v5151_v15  ;;  %v5155_v8 = vrot.slane %v5153_v16, 4 }
 0x301   : > { %v4602_v46 = vpop.f32.mrf.mxu3  ;;  %v5136_v18 = vrot.slane %v5135_v53, 4 }
 0x302   : > { %v9077_v40 = vadd.f32 %v4602_v46, %v3995_v3  ;;  %v5156_v3 = vshll.u32 %v4957_v25, 16 }
 0x303   : > { %v5141_v50 = vsel %vm7737_vm10, %v5136_v18, %v5140_v57 }
 0x304   : > { %v3276_v62 = vpop.f32.mrf.mxu1  ;;  %v5397_v46 = vunpack.c.l.b16 %v5141_v50  ;;  %v7371_v50 = vld [vmem:[#allocation2 + $0x114] sm:$0xff] }
 0x305   : > { %v9088_v12 = vadd.f32 %v3276_v62, %v8871_v38  ;;  %v5168_v38 = vrot.slane %v5166_v37, 4  ;;  %v5158_v62 = vrot.slane %v5156_v3, 5  ;;  %v4961_v37 = vld [vmem:[#allocation2 + $0xa8] sm:$0xf] }
 0x306   : > { %v9085_v58 = vpop.f32.mrf.mxu2  ;;  %v5423_v42 = vpack.c.b16 %v5398_v23, %v5397_v46  ;;  %v5186_v3 = vshll.u32 %v4961_v37, 16  ;;  %v4960_v46 = vld [vmem:[#allocation2 + $0xa4] sm:$0xf] }
 0x307   : > { %9451 = vst [vmem:[#allocation14_spill] sm:$0xff] %v9088_v12  ;;  %v5169_v12 = vor.u32 %v5168_v38, %v5164_v51  ;;  %v5159_v18 = vor.u32 %v5158_v62, %v5155_v8  ;;  %v5190_v38 = vshrl.u32 %v4961_v37, 16 }
 0x309   : > { %v9090_v45 = vpop.f32.mrf.mxu3  ;;  %v5170_v15 = vrot.slane %v5169_v12, 4  ;;  %v5160_v23 = vrot.slane %v5159_v18, 4 }
 0x30a   : > { %9452 = vst [vmem:[#allocation15_spill] sm:$0xff] %v9090_v45  ;;  %v5172_v45 = vshll.u32 %v4959_v17, 16  ;;  %v5177_v17 = vshrl.u32 %v4960_v46, 16 }
 0x30b   : > { %4893 = vmatmul.bf16.gmra.mxu0 %v7370_v48  ;;  %v5165_v12 = vsel %vm7737_vm10, %v5160_v23, %v5164_v51 }
 0x30c   : > { %v3279_v5 = vpop.f32.mrf.mxu1  ;;  %v5174_v4 = vrot.slane %v5172_v45, 5 }
 0x30d   : > { %v3317_v53 = vadd.f32 %v3279_v5, %v8896_v29  ;;  %v5192_v5 = vrot.slane %v5190_v38, 4 }
 0x30e   : > { %v3956_v49 = vpop.f32.mrf.mxu2  ;;  %v5175_v16 = vsel %vm7737_vm10, %v5170_v15, %v5174_v4 }
 0x30f   : > { %v3997_v0 = vadd.f32 %v3956_v49, %v3315_v11  ;;  %5535 = vmatmul.bf16.gmra.mxu1 %v5423_v42  ;;  %v5400_v45 = vunpack.c.l.b16 %v5175_v16  ;;  %v5180_v49 = vshll.u32 %v4960_v46, 16  ;;  %v4962_v42 = vld [vmem:[#allocation2 + $0xac] sm:$0x1]  ;;  %v4964_v46 = vld [vmem:[#allocation2 + $0xb8] sm:$0xf] }
 0x310   : > { %v5196_v23 = vshll.u32 %v4962_v42, 16  ;;  %v4963_v42 = vld [vmem:[#allocation2 + $0xb4] sm:$0xf] }
 0x311   : > { %v4607_v60 = vpop.f32.mrf.mxu3 }
 0x312   : > { %v9097_v57 = vadd.f32 %v4607_v60, %v3997_v0  ;;  %v5399_v0 = vunpack.c.l.b16 %v5165_v12  ;;  %v7404_v60 = vld [vmem:[%s7637_s11] sm:$0xff]  ;;  %v5198_v38 = vrot.slane %v5196_v23, 5 }
 0x313   : > { %6059 = vmatmul.bf16.vlgmr.msra.gmra.mxu3 %v7404_v60 }
 0x314   : > { %v3281_v48 = vpop.f32.mrf.mxu1  ;;  %v5424_v4 = vpack.c.b16 %v5400_v45, %v5399_v0  ;;  %v5214_v0 = vshrl.u32 %v4964_v46, 16 }
 0x315   : > { %v9102_v11 = vadd.f32 %v3281_v48, %v8911_v30  ;;  %v5188_v30 = vrot.slane %v5186_v3, 5  ;;  %v5179_v48 = vrot.slane %v5177_v17, 4 }
 0x316   : > { %v9099_v25 = vpop.f32.mrf.mxu2 }
 0x317   : > { %9453 = vst [vmem:[#allocation16_spill] sm:$0xff] %v9102_v11  ;;  %v5182_v11 = vrot.slane %v5180_v49, 5  ;;  %v5193_v51 = vor.u32 %v5192_v5, %v5188_v30  ;;  %v5210_v5 = vshll.u32 %v4964_v46, 16 }
 0x319   : > { %v9104_v29 = vpop.f32.mrf.mxu3  ;;  %v5183_v16 = vor.u32 %v5182_v11, %v5179_v48  ;;  %v5194_v3 = vrot.slane %v5193_v51, 4  ;;  %v4965_v48 = vld [vmem:[#allocation2 + $0xbc] sm:$0x1] }
 0x31b   : > { %4898 = vmatmul.bf16.gmra.mxu0 %v7371_v50  ;;  %v5184_v17 = vrot.slane %v5183_v16, 4  ;;  %v5199_v49 = vsel %vm7737_vm10, %v5194_v3, %v5198_v38 }
 0x31c   : > { %v3284_v62 = vpop.f32.mrf.mxu1  ;;  %v5402_v60 = vunpack.c.l.b16 %v5199_v49 }
 0x31d   : > { %v3319_v15 = vadd.f32 %v3284_v62, %v8931_v33  ;;  %v5189_v11 = vsel %vm7737_vm10, %v5184_v17, %v5188_v30  ;;  %v5201_v62 = vshrl.u32 %v4963_v42, 16  ;;  %v9132_v17 = vld [vmem:[%s9412_s4] ss:$0 sm:$0xff] }
 0x31e   : > { %v3961_v8 = vpop.f32.mrf.mxu2 }
 0x31f   : > { %v3999_v18 = vadd.f32 %v3961_v8, %v3317_v53  ;;  %5540 = vmatmul.bf16.gmra.mxu1 %v5424_v4  ;;  %v7405_v8 = vld [vmem:[%s7637_s11 + $0x8] sm:$0xff]  ;;  %v5212_v4 = vrot.slane %v5210_v5, 5  ;;  %v5203_v38 = vrot.slane %v5201_v62, 4 }
 0x321   : > { %v4612_v37 = vpop.f32.mrf.mxu3 }
 0x322   : > { %v9112_v50 = vadd.f32 %v4612_v37, %v3999_v18  ;;  %v5204_v18 = vshll.u32 %v4963_v42, 16  ;;  %v5216_v37 = vrot.slane %v5214_v0, 4  ;;  %v4967_v0 = vld [vmem:[#allocation2 + $0xc8] sm:$0xf] }
 0x323   : > { %6064 = vmatmul.bf16.gmra.mxu3 %v7405_v8 }
 0x324   : > { %9454 = vst [vmem:[#allocation17_spill] sm:$0xff] %v9112_v50  ;;  %v3286_v53 = vpop.f32.mrf.mxu1  ;;  %v5206_v46 = vrot.slane %v5204_v18, 5  ;;  %v5238_v18 = vshrl.u32 %v4967_v0, 16 }
 0x325   : > { %v9117_v33 = vadd.f32 %v3286_v53, %v8947_v52  ;;  %v5401_v52 = vunpack.c.l.b16 %v5189_v11 }
 0x326   : > { %v9114_v12 = vpop.f32.mrf.mxu2  ;;  %v5207_v49 = vor.u32 %v5206_v46, %v5203_v38  ;;  %v5240_v38 = vrot.slane %v5238_v18, 4 }
 0x327   : > { %9455 = vst [vmem:[#allocation18_spill] sm:$0xff] %v9117_v33  ;;  %v5425_v53 = vpack.c.b16 %v5402_v60, %v5401_v52  ;;  %v5217_v33 = vor.u32 %v5216_v37, %v5212_v4  ;;  %v4966_v52 = vld [vmem:[#allocation2 + $0xc4] sm:$0xf] }
 0x328   : > { %v5208_v8 = vrot.slane %v5207_v49, 4  ;;  %v4968_v49 = vld [vmem:[#allocation2 + $0xcc] sm:$0x1] }
 0x329   : > { %v9119_v45 = vpop.f32.mrf.mxu3  ;;  %v5218_v5 = vrot.slane %v5217_v33, 4 }
 0x32a   : > { %9456 = vst [vmem:[#allocation19_spill] sm:$0xff] %v9119_v45  ;;  %v5220_v45 = vshll.u32 %v4965_v48, 16  ;;  %v5213_v33 = vsel %vm7737_vm10, %v5208_v8, %v5212_v4 }
 0x32c   : > { %v5506_v23 = vpop.f32.mrf.mxu1 }
 0x32d   : > { %v5586_v30 = vadd.f32 %v5506_v23, %v8968_v61  ;;  %v5234_v61 = vshll.u32 %v4967_v0, 16  ;;  %v7406_v23 = vld [vmem:[%s7637_s11 + $0x10] sm:$0xff] }
 0x32e   : > { %v3966_v51 = vpop.f32.mrf.mxu2 }
 0x32f   : > { %v4001_v16 = vadd.f32 %v3966_v51, %v3319_v15  ;;  %5545 = vmatmul.bf16.gmra.mxu1 %v5425_v53  ;;  %v5222_v15 = vrot.slane %v5220_v45, 5  ;;  %v5622_v11 = vadd.f32 %v9132_v17, %v5586_v30  ;;  %v5225_v53 = vshrl.u32 %v4966_v52, 16 }
 0x330   : > { %v5403_v30 = vunpack.c.l.b16 %v5213_v33 }
 0x331   : > { %v4617_v3 = vpop.f32.mrf.mxu3  ;;  %v5223_v62 = vsel %vm7737_vm10, %v5218_v5, %v5222_v15  ;;  %v5654_v48 = vmax.f32 %v5622_v11, 0.0  ;;  %v5227_v0 = vrot.slane %v5225_v53, 4  ;;  %v5244_v11 = vshll.u32 %v4968_v49, 16 }
 0x332   : > { %v9126_v50 = vadd.f32 %v4617_v3, %v4001_v16  ;;  %v5404_v51 = vunpack.c.l.b16 %v5223_v62  ;;  %v9142_v16 = vpop.f32.mrf.mxu0  ;;  %v5236_v3 = vrot.slane %v5234_v61, 5  ;;  %v4970_v61 = vld [vmem:[#allocation2 + $0xd8] sm:$0xf] }
 0x333   : > { %6069 = vmatmul.bf16.gmra.mxu3 %v7406_v23  ;;  %v5258_v23 = vshll.u32 %v4970_v61, 16  ;;  %v5262_v53 = vshrl.u32 %v4970_v61, 16 }
 0x334   : > { %v5508_v42 = vpop.f32.mrf.mxu1  ;;  %v5426_v15 = vpack.c.b16 %v5404_v51, %v5403_v30  ;;  %v5241_v4 = vor.u32 %v5240_v38, %v5236_v3 }
 0x335   : > { %v5587_v60 = vadd.f32 %v5508_v42, %v8977_v55  ;;  %v5228_v55 = vshll.u32 %v4966_v52, 16 }
 0x336   : > { %v5242_v62 = vrot.slane %v5241_v4, 4 }
 0x337   : > { %v5623_v37 = vadd.f32 %v9132_v17, %v5587_v60  ;;  %v5230_v42 = vrot.slane %v5228_v55, 5  ;;  %v4969_v55 = vld [vmem:[#allocation2 + $0xd4] sm:$0xf] }
 0x339   : > { %v5655_v45 = vmax.f32 %v5623_v37, 0.0  ;;  %v5231_v8 = vor.u32 %v5230_v42, %v5227_v0  ;;  %v5246_v37 = vrot.slane %v5244_v11, 5  ;;  %v5252_v0 = vshll.u32 %v4969_v55, 16 }
 0x33a   : > { %v9145_v18 = vpop.f32.mrf.mxu0  ;;  %v5260_v42 = vrot.slane %v5258_v23, 5 }
 0x33b   : > { %v5686_v46 = vpack.c.bf16 %v5655_v45, %v5654_v48  ;;  %v5232_v45 = vrot.slane %v5231_v8, 4  ;;  %v5247_v51 = vsel %vm7737_vm10, %v5242_v62, %v5246_v37 }
 0x33c   : > { %v5511_v5 = vpop.f32.mrf.mxu1  ;;  %v5406_v49 = vunpack.c.l.b16 %v5247_v51 }
 0x33d   : > { %5778 = vmatmul.bf16.vlgmr.msra.gmra.mxu2 %v5686_v46  ;;  %v5588_v60 = vadd.f32 %v5511_v5, %v8989_v31  ;;  %v5237_v38 = vsel %vm7737_vm10, %v5232_v45, %v5236_v3  ;;  %v7407_v5 = vld [vmem:[%s7637_s11 + $0x18] sm:$0xff]  ;;  %v4973_v45 = vld [vmem:[#allocation2 + $0xe8] sm:$0xf] }
 0x33e   : > { %v5405_v11 = vunpack.c.l.b16 %v5237_v38  ;;  %v5286_v38 = vshrl.u32 %v4973_v45, 16 }
 0x33f   : > { %5550 = vmatmul.bf16.gmra.mxu1 %v5426_v15  ;;  %v5624_v33 = vadd.f32 %v9132_v17, %v5588_v60  ;;  %v5249_v15 = vshrl.u32 %v4969_v55, 16  ;;  %v4971_v60 = vld [vmem:[#allocation2 + $0xdc] sm:$0x1]  ;;  %v5282_v55 = vshll.u32 %v4973_v45, 16 }
 0x340   : > { %v5427_v62 = vpack.c.b16 %v5406_v49, %v5405_v11  ;;  %v5288_v11 = vrot.slane %v5286_v38, 4 }
 0x341   : > { %v5656_v46 = vmax.f32 %v5624_v33, 0.0  ;;  %v5251_v61 = vrot.slane %v5249_v15, 4  ;;  %v5268_v33 = vshll.u32 %v4971_v60, 16 }
 0x342   : > { %v9155_v37 = vpop.f32.mrf.mxu0 }
 0x343   : > { %6074 = vmatmul.bf16.gmra.mxu3 %v7407_v5 }
 0x344   : > { %v5513_v52 = vpop.f32.mrf.mxu1 }
 0x345   : > { %v5589_v48 = vadd.f32 %v5513_v52, %v9000_v14  ;;  %v5264_v14 = vrot.slane %v5262_v53, 4  ;;  %v5254_v52 = vrot.slane %v5252_v0, 5  ;;  %v5270_v53 = vrot.slane %v5268_v33, 5  ;;  %v4972_v0 = vld [vmem:[#allocation2 + $0xe4] sm:$0xf] }
 0x347   : > { %v5625_v31 = vadd.f32 %v9132_v17, %v5589_v48  ;;  %v5265_v3 = vor.u32 %v5264_v14, %v5260_v42  ;;  %v5255_v51 = vor.u32 %v5254_v52, %v5251_v61  ;;  %v4974_v61 = vld [vmem:[#allocation2 + $0xec] sm:$0x1]  ;;  %v7408_v52 = vld [vmem:[%s7637_s11 + $0x20] sm:$0xff] }
 0x349   : > { %v5657_v30 = vmax.f32 %v5625_v31, 0.0  ;;  %v5266_v23 = vrot.slane %v5265_v3, 4  ;;  %v5256_v49 = vrot.slane %v5255_v51, 4  ;;  %v5276_v3 = vshll.u32 %v4972_v0, 16 }
 0x34b   : > { %v5687_v4 = vpack.c.bf16 %v5657_v30, %v5656_v46  ;;  %v5271_v5 = vsel %vm7737_vm10, %v5266_v23, %v5270_v53  ;;  %v5261_v14 = vsel %vm7737_vm10, %v5256_v49, %v5260_v42  ;;  %v5292_v23 = vshll.u32 %v4974_v61, 16 }
 0x34c   : > { %v5516_v8 = vpop.f32.mrf.mxu1 }
 0x34d   : > { %5783 = vmatmul.bf16.gmra.mxu2 %v5687_v4  ;;  %v5590_v48 = vadd.f32 %v5516_v8, %v9015_v22  ;;  %v9163_v22 = vpop.f32.mrf.mxu0  ;;  %v5284_v4 = vrot.slane %v5282_v55, 5  ;;  %v5294_v55 = vrot.slane %v5292_v23, 5 }
 0x34f   : > { %5555 = vmatmul.bf16.gmra.mxu1 %v5427_v62  ;;  %v5626_v46 = vadd.f32 %v9132_v17, %v5590_v48  ;;  %v5408_v62 = vunpack.c.l.b16 %v5271_v5  ;;  %v5407_v48 = vunpack.c.l.b16 %v5261_v14  ;;  %v5289_v51 = vor.u32 %v5288_v11, %v5284_v4  ;;  %v4976_v5 = vld [vmem:[#allocation2 + $0xf8] sm:$0xf] }
 0x351   : > { %v5658_v60 = vmax.f32 %v5626_v46, 0.0  ;;  %v5428_v53 = vpack.c.b16 %v5408_v62, %v5407_v48  ;;  %v5290_v42 = vrot.slane %v5289_v51, 4  ;;  %v5310_v62 = vshrl.u32 %v4976_v5, 16 }
 0x353   : > { %6079 = vmatmul.bf16.gmra.mxu3 %v7408_v52  ;;  %v5312_v23 = vrot.slane %v5310_v62, 4 }
 0x354   : > { %v5518_v31 = vpop.f32.mrf.mxu1 }
 0x355   : > { %v5591_v30 = vadd.f32 %v5518_v31, %v9023_v9  ;;  %v5273_v9 = vshrl.u32 %v4972_v0, 16  ;;  %v9169_v46 = vpop.f32.mrf.mxu0  ;;  %v5295_v0 = vsel %vm7737_vm10, %v5290_v42, %v5294_v55  ;;  %v3980_v42 = vadd.f32 %v8887_v47, %v8853_v41 }
 0x357   : > { %v5627_v15 = vadd.f32 %v9132_v17, %v5591_v30  ;;  %v5275_v31 = vrot.slane %v5273_v9, 4  ;;  %v5278_v30 = vrot.slane %v5276_v3, 5  ;;  %v5410_v9 = vunpack.c.l.b16 %v5295_v0 }
 0x359   : > { %v5659_v8 = vmax.f32 %v5627_v15, 0.0  ;;  %v5279_v49 = vor.u32 %v5278_v30, %v5275_v31  ;;  %v4977_v31 = vld [vmem:[#allocation2 + $0xfc] sm:$0x1] }
 0x35a   : > { %v5316_v0 = vshll.u32 %v4977_v31, 16 }
 0x35b   : > { %v5688_v33 = vpack.c.bf16 %v5659_v8, %v5658_v60  ;;  %v4975_v60 = vld [vmem:[#allocation2 + $0xf4] sm:$0xf]  ;;  %v5306_v8 = vshll.u32 %v4976_v5, 16  ;;  %v5280_v61 = vrot.slane %v5279_v49, 4 }
 0x35c   : > { %v5521_v45 = vpop.f32.mrf.mxu1  ;;  %v5297_v3 = vshrl.u32 %v4975_v60, 16  ;;  %v5318_v41 = vrot.slane %v5316_v0, 5 }
 0x35d   : > { %5788 = vmatmul.bf16.gmra.mxu2 %v5688_v33  ;;  %v5592_v38 = vadd.f32 %v5521_v45, %v9035_v32  ;;  %v5285_v32 = vsel %vm7737_vm10, %v5280_v61, %v5284_v4  ;;  %v5300_v33 = vshll.u32 %v4975_v60, 16  ;;  %v5308_v51 = vrot.slane %v5306_v8, 5  ;;  %v9181_v55 = vpop.f32.mrf.mxu0 }
 0x35e   : > { %v5299_v49 = vrot.slane %v5297_v3, 4 }
 0x35f   : > { %5560 = vmatmul.bf16.gmra.mxu1 %v5428_v53  ;;  %v5628_v14 = vadd.f32 %v9132_v17, %v5592_v38  ;;  %v7409_v53 = vld [vmem:[%s7637_s11 + $0x28] sm:$0xff]  ;;  %v5302_v5 = vrot.slane %v5300_v33, 5 }
 0x361   : > { %v5660_v48 = vmax.f32 %v5628_v14, 0.0  ;;  %v4912_v14 = vadd.f32 %v9142_v16, %v8865_v28  ;;  %v5303_v62 = vor.u32 %v5302_v5, %v5299_v49  ;;  %v7410_v49 = vld [vmem:[%s7637_s11 + $0x30] sm:$0xff] }
 0x363   : > { %6084 = vmatmul.bf16.gmra.mxu3 %v7409_v53 }
 0x364   : > { %v5523_v15 = vpop.f32.mrf.mxu1 }
 0x365   : > { %v5593_v11 = vadd.f32 %v5523_v15, %v9046_v56  ;;  %v5409_v56 = vunpack.c.l.b16 %v5285_v32  ;;  %v5313_v15 = vor.u32 %v5312_v23, %v5308_v51  ;;  %v4979_v32 = vld [vmem:[#allocation2 + $0x108] sm:$0xf]  ;;  %v9190_v16 = vpop.f32.mrf.mxu0 }
 0x366   : > { %v5330_v53 = vshll.u32 %v4979_v32, 16  ;;  %v5334_v31 = vshrl.u32 %v4979_v32, 16 }
 0x367   : > { %v5629_v52 = vadd.f32 %v9132_v17, %v5593_v11  ;;  %v5429_v4 = vpack.c.b16 %v5410_v9, %v5409_v56  ;;  %v9457_v11 = vld [vmem:[#allocation6_spill] sm:$0xff]  ;;  %v5314_v61 = vrot.slane %v5313_v15, 4 }
 0x368   : > { %v4631_v60 = vadd.f32 %v9457_v11, %v3980_v42  ;;  %v5332_v15 = vrot.slane %v5330_v53, 5  ;;  %v5336_v0 = vrot.slane %v5334_v31, 4  ;;  %v4981_v53 = vld [vmem:[#allocation2 + $0x114] sm:$0xf] }
 0x369   : > { %v5661_v45 = vmax.f32 %v5629_v52, 0.0  ;;  %v4978_v52 = vld [vmem:[#allocation2 + $0x104] sm:$0xf]  ;;  %v5319_v28 = vsel %vm7737_vm10, %v5314_v61, %v5318_v41  ;;  %v9459_v61 = vld [vmem:[#allocation8_spill] sm:$0xff] }
 0x36a   : > { %v4913_v47 = vadd.f32 %v9145_v18, %v4631_v60  ;;  %v5324_v23 = vshll.u32 %v4978_v52, 16  ;;  %v4980_v60 = vld [vmem:[#allocation2 + $0x10c] sm:$0x1] }
 0x36b   : > { %v5689_v30 = vpack.c.bf16 %v5661_v45, %v5660_v48  ;;  %v5304_v48 = vrot.slane %v5303_v62, 4  ;;  %v5321_v45 = vshrl.u32 %v4978_v52, 16  ;;  %v9458_v62 = vld [vmem:[#allocation5_spill] sm:$0xff]  ;;  %v5340_v32 = vshll.u32 %v4980_v60, 16 }
 0x36c   : > { %v5526_v38 = vpop.f32.mrf.mxu1  ;;  %v5326_v5 = vrot.slane %v5324_v23, 5  ;;  %v3982_v41 = vadd.f32 %v9459_v61, %v9458_v62  ;;  %v703_v23 = vld [vmem:[#allocation2 + $0x11c] sm:$0x1] }
 0x36d   : > { %5793 = vmatmul.bf16.gmra.mxu2 %v5689_v30  ;;  %v5594_v8 = vadd.f32 %v5526_v38, %v4912_v14  ;;  %v5309_v18 = vsel %vm7737_vm10, %v5304_v48, %v5308_v51  ;;  %v5412_v38 = vunpack.c.l.b16 %v5319_v28  ;;  %v5337_v51 = vor.u32 %v5336_v0, %v5332_v15  ;;  %v9461_v48 = vld [vmem:[#allocation9_spill] sm:$0xff] }
 0x36e   : > { %v5411_v11 = vunpack.c.l.b16 %v5309_v18  ;;  %v4633_v28 = vadd.f32 %v9461_v48, %v3982_v41  ;;  %v5342_v18 = vrot.slane %v5340_v32, 5  ;;  %v7411_v48 = vld [vmem:[%s7637_s11 + $0x38] sm:$0xff] }
 0x36f   : > { %5565 = vmatmul.bf16.gmra.mxu1 %v5429_v4  ;;  %v5630_v3 = vadd.f32 %v9132_v17, %v5594_v8  ;;  %v5323_v4 = vrot.slane %v5321_v45, 4 }
 0x371   : > { %v5662_v56 = vmax.f32 %v5630_v3, 0.0  ;;  %v5327_v52 = vor.u32 %v5326_v5, %v5323_v4  ;;  %v5348_v5 = vshll.u32 %v4981_v53, 16 }
 0x373   : > { %6089 = vmatmul.bf16.gmra.mxu3 %v7410_v49  ;;  %v5328_v31 = vrot.slane %v5327_v52, 4  ;;  %v4915_v49 = vadd.f32 %v9163_v22, %v4633_v28  ;;  %v5350_v22 = vrot.slane %v5348_v5, 5 }
 0x374   : > { %v5528_v9 = vpop.f32.mrf.mxu1 }
 0x375   : > { %v5595_v33 = vadd.f32 %v5528_v9, %v4913_v47  ;;  %v5430_v47 = vpack.c.b16 %v5412_v38, %v5411_v11  ;;  %v9460_v9 = vld [vmem:[#allocation7_spill] sm:$0xff]  ;;  %v4982_v38 = vld [vmem:[#allocation2 + $0x118] sm:$0xf] }
 0x376   : > { %v4914_v3 = vadd.f32 %v9155_v37, %v9460_v9  ;;  %v5345_v37 = vshrl.u32 %v4981_v53, 16  ;;  %v5354_v0 = vshll.u32 %v4982_v38, 16 }
 0x377   : > { %v5631_v30 = vadd.f32 %v9132_v17, %v5595_v33  ;;  %v9200_v33 = vpop.f32.mrf.mxu0 }
 0x378   : > { %v5347_v41 = vrot.slane %v5345_v37, 4 }
 0x379   : > { %v5663_v42 = vmax.f32 %v5631_v30, 0.0  ;;  %v5338_v30 = vrot.slane %v5337_v51, 4 }
 0x37b   : > { %v5690_v14 = vpack.c.bf16 %v5663_v42, %v5662_v56  ;;  %v704_v42 = vsel %vm7693_vm5, 0, %v703_v23  ;;  %v5343_v62 = vsel %vm7737_vm10, %v5338_v30, %v5342_v18  ;;  %v5351_v56 = vor.u32 %v5350_v22, %v5347_v41  ;;  %v9225_v22 = vpop.f32.mrf.mxu3 }
 0x37c   : > { %v5531_v8 = vpop.f32.mrf.mxu1  ;;  %705 = vst [vmem:[#allocation2 + $0x11c] sm:$0x1] %v704_v42  ;;  %v9463_v42 = vld [vmem:[#allocation3_spill] sm:$0xff] }
 0x37d   : > { %5798 = vmatmul.bf16.gmra.mxu2 %v5690_v14  ;;  %v5596_v45 = vadd.f32 %v5531_v8, %v4914_v3  ;;  %v5358_v14 = vshrl.u32 %v4982_v38, 16  ;;  %v5333_v8 = vsel %vm7737_vm10, %v5328_v31, %v5332_v15  ;;  %v5414_v3 = vunpack.c.l.b16 %v5343_v62 }
 0x37e   : > { %v5413_v9 = vunpack.c.l.b16 %v5333_v8  ;;  %v3984_v30 = vadd.f32 %v8958_v20, %v9463_v42  ;;  %v4916_v38 = vadd.f32 %v9169_v46, %v8938_v1 }
 0x37f   : > { %5570 = vmatmul.bf16.gmra.mxu1 %v5430_v47  ;;  %v5632_v11 = vadd.f32 %v9132_v17, %v5596_v45  ;;  %v5356_v47 = vrot.slane %v5354_v0, 5  ;;  %v5360_v52 = vrot.slane %v5358_v14, 4  ;;  %v4864_v28 = vpop.f32.mrf.mxu0 }
 0x380   : > { %v5431_v18 = vpack.c.b16 %v5414_v3, %v5413_v9  ;;  %v4635_v5 = vadd.f32 %v8963_v44, %v3984_v30  ;;  %v4918_v3 = vadd.f32 %v9190_v16, %v8974_v27  ;;  %v3988_v16 = vadd.f32 %v9005_v39, %v8982_v7 }
 0x381   : > { %v5664_v51 = vmax.f32 %v5632_v11, 0.0  ;;  %v5361_v15 = vor.u32 %v5360_v52, %v5356_v47 }
 0x382   : > { %v4917_v14 = vadd.f32 %v9181_v55, %v4635_v5  ;;  %v7412_v55 = vld [vmem:[%s7637_s11 + $0x40] sm:$0xff] }
 0x383   : > { %v4983_v45 = vld [vmem:[#allocation2 + $0x11c] sm:$0x1]  ;;  %6094 = vmatmul.bf16.gmra.mxu3 %v7411_v48 }
 0x384   : > { %v5533_v4 = vpop.f32.mrf.mxu1  ;;  %v5364_v31 = vshll.u32 %v4983_v45, 16 }
 0x385   : > { %v5597_v60 = vadd.f32 %v5533_v4, %v4915_v49  ;;  %v5352_v49 = vrot.slane %v5351_v56, 4  ;;  %v5362_v4 = vrot.slane %v5361_v15, 4 }
 0x386   : > { %v5366_v37 = vrot.slane %v5364_v31, 5 }
 0x387   : > { %v5633_v61 = vadd.f32 %v9132_v17, %v5597_v60  ;;  %v4866_v11 = vpop.f32.mrf.mxu0  ;;  %v5357_v20 = vsel %vm7737_vm10, %v5352_v49, %v5356_v47  ;;  %v3986_v47 = vadd.f32 %v8979_v19, %v8961_v59 }
 0x388   : > { %v5367_v8 = vsel %vm7737_vm10, %v5362_v4, %v5366_v37 }
 0x389   : > { %v5665_v32 = vmax.f32 %v5633_v61, 0.0  ;;  %v5415_v61 = vunpack.c.l.b16 %v5357_v20  ;;  %v5416_v41 = vunpack.c.l.b16 %v5367_v8  ;;  %v4637_v45 = vadd.f32 %v8984_v26, %v3986_v47 }
 0x38a   : > { %v4920_v26 = vadd.f32 %v4864_v28, %v8994_v36 }
 0x38b   : > { %v5691_v23 = vpack.c.bf16 %v5665_v32, %v5664_v51  ;;  %v5432_v32 = vpack.c.b16 %v5416_v41, %v5415_v61  ;;  %v9252_v41 = vld [vmem:[%s9414_s6] ss:$0 sm:$0xff] }
 0x38c   : > { %v5536_v53 = vpop.f32.mrf.mxu1 }
 0x38d   : > { %5803 = vmatmul.bf16.gmra.mxu2 %v5691_v23  ;;  %v5598_v0 = vadd.f32 %v5536_v53, %v4916_v38  ;;  %v4919_v53 = vadd.f32 %v9200_v33, %v4637_v45  ;;  %v7413_v38 = vld [vmem:[%s7637_s11 + $0x48] sm:$0xff]  ;;  %v4639_v33 = vadd.f32 %v9010_v24, %v3988_v16  ;;  %v3990_v24 = vadd.f32 %v9025_v2, %v9008_v13 }
 0x38f   : > { %5575 = vmatmul.bf16.gmra.mxu1 %v5431_v18  ;;  %v5634_v1 = vadd.f32 %v9132_v17, %v5598_v0  ;;  %v4869_v10 = vpop.f32.mrf.mxu0  ;;  %v4921_v5 = vadd.f32 %v4866_v11, %v4639_v33  ;;  %v9464_v33 = vld [vmem:[#allocation11_spill] sm:$0xff] }
 0x390   : > { %v4922_v11 = vadd.f32 %v4869_v10, %v9020_v6 }
 0x391   : > { %v5666_v44 = vmax.f32 %v5634_v1, 0.0  ;;  %v9243_v1 = vpop.f32.mrf.mxu2 }
 0x393   : > { %6099 = vmatmul.bf16.gmra.mxu3 %v7412_v55 }
 0x394   : > { %v5538_v60 = vpop.f32.mrf.mxu1 }
 0x395   : > { %v5599_v46 = vadd.f32 %v5538_v60, %v4917_v14 }
 0x396   : > { %v6060_v48 = vpop.f32.mrf.mxu3 }
 0x397   : > { %v5635_v62 = vadd.f32 %v9132_v17, %v5599_v46  ;;  %v4871_v19 = vpop.f32.mrf.mxu0  ;;  %v7414_v46 = vld [vmem:[%s7637_s11 + $0x50] sm:$0xff] }
 0x399   : > { %v5667_v52 = vmax.f32 %v5635_v62, 0.0 }
 0x39b   : > { %v5692_v51 = vpack.c.bf16 %v5667_v52, %v5666_v44  ;;  %v4641_v52 = vadd.f32 %v9030_v35, %v3990_v24  ;;  %v7416_v24 = vld [vmem:[%s7637_s11 + $0x60] sm:$0xff] }
 0x39c   : > { %v5541_v9 = vpop.f32.mrf.mxu1 }
 0x39d   : > { %5808 = vmatmul.bf16.gmra.mxu2 %v5692_v51  ;;  %v5600_v23 = vadd.f32 %v5541_v9, %v4918_v3  ;;  %v4923_v51 = vadd.f32 %v4871_v19, %v4641_v52  ;;  %v9262_v3 = vld [vmem:[%s9416_s8] ss:$0 sm:$0xff] }
 0x39e   : > { %v6062_v18 = vpop.f32.mrf.mxu3 }
 0x39f   : > { %5580 = vmatmul.bf16.gmra.mxu1 %v5432_v32  ;;  %v5636_v15 = vadd.f32 %v9132_v17, %v5600_v23  ;;  %v4874_v37 = vpop.f32.mrf.mxu0 }
 0x3a1   : > { %v5668_v42 = vmax.f32 %v5636_v15, 0.0  ;;  %v7415_v15 = vld [vmem:[%s7637_s11 + $0x58] sm:$0xff] }
 0x3a3   : > { %6104 = vmatmul.bf16.gmra.mxu3 %v7413_v38 }
 0x3a4   : > { %v5543_v56 = vpop.f32.mrf.mxu1 }
 0x3a5   : > { %v5601_v31 = vadd.f32 %v5543_v56, %v4919_v53 }
 0x3a6   : > { %v6065_v0 = vpop.f32.mrf.mxu3 }
 0x3a7   : > { %v5637_v59 = vadd.f32 %v9132_v17, %v5601_v31  ;;  %v4876_v36 = vpop.f32.mrf.mxu0 }
 0x3a9   : > { %v5669_v30 = vmax.f32 %v5637_v59, 0.0 }
 0x3ab   : > { %v5693_v49 = vpack.c.bf16 %v5669_v30, %v5668_v42  ;;  %v3992_v30 = vadd.f32 %v9051_v63, %v9028_v43 }
 0x3ac   : > { %v5546_v27 = vpop.f32.mrf.mxu1 }
 0x3ad   : > { %5813 = vmatmul.bf16.gmra.mxu2 %v5693_v49  ;;  %v5602_v4 = vadd.f32 %v5546_v27, %v4920_v26  ;;  %v4924_v49 = vadd.f32 %v4874_v37, %v9040_v34 }
 0x3ae   : > { %v6067_v61 = vpop.f32.mrf.mxu3 }
 0x3af   : > { %v5638_v60 = vadd.f32 %v9132_v17, %v5602_v4  ;;  %v4879_v6 = vpop.f32.mrf.mxu0  ;;  %v4643_v4 = vadd.f32 %v9464_v33, %v3992_v30 }
 0x3b1   : > { %v5670_v7 = vmax.f32 %v5638_v60, 0.0 }
 0x3b3   : > { %6109 = vmatmul.bf16.gmra.mxu3 %v7414_v46 }
 0x3b4   : > { %v5548_v14 = vpop.f32.mrf.mxu1 }
 0x3b5   : > { %v5603_v20 = vadd.f32 %v5548_v14, %v4921_v5  ;;  %v4925_v5 = vadd.f32 %v4876_v36, %v4643_v4 }
 0x3b6   : > { %v9256_v9 = vpop.f32.mrf.mxu3 }
 0x3b7   : > { %v5639_v8 = vadd.f32 %v9132_v17, %v5603_v20  ;;  %v4881_v26 = vpop.f32.mrf.mxu0 }
 0x3b9   : > { %v5671_v39 = vmax.f32 %v5639_v8, 0.0 }
 0x3bb   : > { %v5694_v62 = vpack.c.bf16 %v5671_v39, %v5670_v7 }
 0x3bc   : > { %v5551_v28 = vpop.f32.mrf.mxu1 }
 0x3bd   : > { %5818 = vmatmul.bf16.gmra.mxu2 %v5694_v62  ;;  %v5604_v55 = vadd.f32 %v5551_v28, %v4922_v11 }
 0x3be   : > { %v6072_v42 = vpop.f32.mrf.mxu3 }
 0x3bf   : > { %v5640_v2 = vadd.f32 %v9132_v17, %v5604_v55  ;;  %v4884_v11 = vpop.f32.mrf.mxu0 }
 0x3c0   : > { %v5779_v44 = vpop.f32.mrf.mxu2 }
 0x3c1   : > { %v5780_v32 = vadd.f32 %v9252_v41, %v5779_v44  ;;  %v5672_v23 = vmax.f32 %v5640_v2, 0.0  ;;  %v4926_v2 = vadd.f32 %v4879_v6, %v9063_v54 }
 0x3c3   : > { %v6140_v10 = vadd.f32 %v6060_v48, %v5780_v32  ;;  %6114 = vmatmul.bf16.gmra.mxu3 %v7415_v15  ;;  %v9465_v32 = vld [vmem:[#allocation10_spill] sm:$0xff] }
 0x3c4   : > { %v5553_v13 = vpop.f32.mrf.mxu1 }
 0x3c5   : > { %v5605_v47 = vadd.f32 %v5553_v13, %v4923_v51  ;;  %v6176_v31 = vadd.f32 %v9262_v3, %v6140_v10  ;;  %v3994_v13 = vadd.f32 %v9065_v21, %v9465_v32 }
 0x3c6   : > { %v9282_v37 = vpop.f32.mrf.mxu3 }
 0x3c7   : > { %v5641_v35 = vadd.f32 %v9132_v17, %v5605_v47  ;;  %v6208_v27 = vmax.f32 %v6176_v31, 0.0  ;;  %v4886_v21 = vpop.f32.mrf.mxu0 }
 0x3c8   : > { %v5781_v45 = vpop.f32.mrf.mxu2 }
 0x3c9   : > { %v5673_v53 = vmax.f32 %v5641_v35, 0.0  ;;  %v5782_v56 = vadd.f32 %v9252_v41, %v5781_v45  ;;  %v9466_v45 = vld [vmem:[#allocation13_spill] sm:$0xff] }
 0x3cb   : > { %v6141_v59 = vadd.f32 %v6062_v18, %v5782_v56  ;;  %v5695_v19 = vpack.c.bf16 %v5673_v53, %v5672_v23  ;;  %v4645_v23 = vadd.f32 %v9466_v45, %v3994_v13 }
 0x3cc   : > { %v5556_v48 = vpop.f32.mrf.mxu1 }
 0x3cd   : > { %v6177_v38 = vadd.f32 %v9262_v3, %v6141_v59  ;;  %5823 = vmatmul.bf16.gmra.mxu2 %v5695_v19  ;;  %v5606_v63 = vadd.f32 %v5556_v48, %v4924_v49  ;;  %v4927_v56 = vadd.f32 %v4881_v26, %v4645_v23 }
 0x3ce   : > { %v6077_v55 = vpop.f32.mrf.mxu3 }
 0x3cf   : > { %v6209_v16 = vmax.f32 %v6177_v38, 0.0  ;;  %v5642_v60 = vadd.f32 %v9132_v17, %v5606_v63  ;;  %v9467_v63 = vld [vmem:[#allocation12_spill] sm:$0xff] }
 0x3d0   : > { %v5784_v18 = vpop.f32.mrf.mxu2 }
 0x3d1   : > { %v7431_v43 = vpack.c.bf16 %v6209_v16, %v6208_v27  ;;  %v5785_v34 = vadd.f32 %v9252_v41, %v5784_v18  ;;  %v5674_v46 = vmax.f32 %v5642_v60, 0.0  ;;  %v7417_v16 = vld [vmem:[%s7637_s11 + $0x68] sm:$0xff] }
 0x3d3   : > { %7432 = vst [vmem:[%s9277_s15] sm:$0xff] %v7431_v43   ;;  %v6142_v8 = vadd.f32 %v6065_v0, %v5785_v34  ;;  %6119 = vmatmul.bf16.gmra.mxu3 %v7416_v24  ;;  %v4889_v34 = vpop.f32.mrf.mxu0 }
 0x3d4   : > { %v5558_v14 = vpop.f32.mrf.mxu1 }
 0x3d5   : > { %v5607_v20 = vadd.f32 %v5558_v14, %v4925_v5  ;;  %v6178_v36 = vadd.f32 %v9262_v3, %v6142_v8  ;;  %v3996_v5 = vadd.f32 %v9085_v58, %v9467_v63  ;;  %v4928_v14 = vadd.f32 %v4884_v11, %v9077_v40 }
 0x3d6   : > { %v9296_v31 = vpop.f32.mrf.mxu3 }
 0x3d7   : > { %v5643_v7 = vadd.f32 %v9132_v17, %v5607_v20  ;;  %v6210_v47 = vmax.f32 %v6178_v36, 0.0 }
 0x3d8   : > { %v5786_v39 = vpop.f32.mrf.mxu2 }
 0x3d9   : > { %v5675_v62 = vmax.f32 %v5643_v7, 0.0  ;;  %v5787_v28 = vadd.f32 %v9252_v41, %v5786_v39  ;;  %v9468_v7 = vld [vmem:[#allocation15_spill] sm:$0xff] }
 0x3da   : > { %v4647_v39 = vadd.f32 %v9468_v7, %v3996_v5  ;;  %v9471_v7 = vld [vmem:[#allocation17_spill] sm:$0xff] }
 0x3db   : > { %v6143_v44 = vadd.f32 %v6067_v61, %v5787_v28  ;;  %v5696_v52 = vpack.c.bf16 %v5675_v62, %v5674_v46 }
 0x3dc   : > { %v5561_v51 = vpop.f32.mrf.mxu1  ;;  %v4929_v62 = vadd.f32 %v4886_v21, %v4647_v39 }
 0x3dd   : > { %v6179_v0 = vadd.f32 %v9262_v3, %v6143_v44  ;;  %5828 = vmatmul.bf16.gmra.mxu2 %v5696_v52  ;;  %v5608_v61 = vadd.f32 %v5561_v51, %v4926_v2  ;;  %v4891_v52 = vpop.f32.mrf.mxu0  ;;  %v7418_v2 = vld [vmem:[%s7637_s11 + $0x70] sm:$0xff] }
 0x3de   : > { %v6082_v4 = vpop.f32.mrf.mxu3 }
 0x3df   : > { %v6211_v10 = vmax.f32 %v6179_v0, 0.0  ;;  %v5644_v19 = vadd.f32 %v9132_v17, %v5608_v61 }
 0x3e0   : > { %v5789_v35 = vpop.f32.mrf.mxu2 }
 0x3e1   : > { %v7436_v53 = vpack.c.bf16 %v6211_v10, %v6210_v47  ;;  %v5790_v15 = vadd.f32 %v9252_v41, %v5789_v35  ;;  %v5676_v38 = vmax.f32 %v5644_v19, 0.0 }
 0x3e3   : > { %7508 = vst [vmem:[%s9277_s15 + $0x8] sm:$0xff] %v7436_v53   ;;  %v6144_v54 = vadd.f32 %v9256_v9, %v5790_v15  ;;  %6124 = vmatmul.bf16.gmra.mxu3 %v7417_v16  ;;  %v9469_v53 = vld [vmem:[#allocation14_spill] sm:$0xff] }
 0x3e4   : > { %v5563_v59 = vpop.f32.mrf.mxu1  ;;  %v3998_v61 = vadd.f32 %v9099_v25, %v9469_v53 }
 0x3e5   : > { %v5609_v48 = vadd.f32 %v5563_v59, %v4927_v56  ;;  %v6180_v26 = vadd.f32 %v9262_v3, %v6144_v54  ;;  %v4930_v56 = vadd.f32 %v4889_v34, %v9097_v57  ;;  %v4894_v54 = vpop.f32.mrf.mxu0 }
 0x3e6   : > { %v9311_v58 = vpop.f32.mrf.mxu3  ;;  %v4649_v19 = vadd.f32 %v9104_v29, %v3998_v61  ;;  %v4932_v39 = vadd.f32 %v4894_v54, %v9471_v7 }
 0x3e7   : > { %v5645_v6 = vadd.f32 %v9132_v17, %v5609_v48  ;;  %v6212_v60 = vmax.f32 %v6180_v26, 0.0 }
 0x3e8   : > { %v5791_v30 = vpop.f32.mrf.mxu2 }
 0x3e9   : > { %v5677_v49 = vmax.f32 %v5645_v6, 0.0  ;;  %v5792_v27 = vadd.f32 %v9252_v41, %v5791_v30  ;;  %v4931_v6 = vadd.f32 %v4891_v52, %v4649_v19 }
 0x3eb   : > { %v6145_v18 = vadd.f32 %v6072_v42, %v5792_v27  ;;  %v5697_v33 = vpack.c.bf16 %v5677_v49, %v5676_v38 }
 0x3ec   : > { %v5566_v43 = vpop.f32.mrf.mxu1 }
 0x3ed   : > { %v6181_v9 = vadd.f32 %v9262_v3, %v6145_v18  ;;  %5833 = vmatmul.bf16.gmra.mxu2 %v5697_v33  ;;  %v5610_v46 = vadd.f32 %v5566_v43, %v4928_v14  ;;  %v7419_v43 = vld [vmem:[%s7637_s11 + $0x78] sm:$0xff]  ;;  %v4896_v14 = vpop.f32.mrf.mxu0 }
 0x3ee   : > { %v6087_v45 = vpop.f32.mrf.mxu3 }
 0x3ef   : > { %v6213_v20 = vmax.f32 %v6181_v9, 0.0  ;;  %v5646_v36 = vadd.f32 %v9132_v17, %v5610_v46 }
 0x3f0   : > { %v5794_v8 = vpop.f32.mrf.mxu2 }
 0x3f1   : > { %v7441_v42 = vpack.c.bf16 %v6213_v20, %v6212_v60  ;;  %v5795_v28 = vadd.f32 %v9252_v41, %v5794_v8  ;;  %v5678_v32 = vmax.f32 %v5646_v36, 0.0  ;;  %v9470_v20 = vld [vmem:[#allocation16_spill] sm:$0xff] }
 0x3f2   : > { %v4000_v8 = vadd.f32 %v9114_v12, %v9470_v20 }
 0x3f3   : > { %7509 = vst [vmem:[%s9277_s15 + $0x10] sm:$0xff] %v7441_v42   ;;  %v6146_v40 = vadd.f32 %v9282_v37, %v5795_v28  ;;  %6129 = vmatmul.bf16.gmra.mxu3 %v7418_v2  ;;  %v9472_v28 = vld [vmem:[#allocation19_spill] sm:$0xff] }
 0x3f4   : > { %v5568_v24 = vpop.f32.mrf.mxu1 }
 0x3f5   : > { %v5611_v44 = vadd.f32 %v5568_v24, %v4929_v62  ;;  %v6182_v47 = vadd.f32 %v9262_v3, %v6146_v40  ;;  %v4651_v24 = vadd.f32 %v9472_v28, %v4000_v8 }
 0x3f6   : > { %v9326_v25 = vpop.f32.mrf.mxu3 }
 0x3f7   : > { %v5647_v11 = vadd.f32 %v9132_v17, %v5611_v44  ;;  %v6214_v15 = vmax.f32 %v6182_v47, 0.0  ;;  %v4933_v44 = vadd.f32 %v4896_v14, %v4651_v24 }
 0x3f8   : > { %v5796_v51 = vpop.f32.mrf.mxu2 }
 0x3f9   : > { %v5679_v13 = vmax.f32 %v5647_v11, 0.0  ;;  %v5797_v0 = vadd.f32 %v9252_v41, %v5796_v51 }
 0x3fb   : > { %v6147_v10 = vadd.f32 %v6077_v55, %v5797_v0  ;;  %v5698_v35 = vpack.c.bf16 %v5679_v13, %v5678_v32  ;;  %v4899_v32 = vpop.f32.mrf.mxu0 }
 0x3fc   : > { %v5571_v23 = vpop.f32.mrf.mxu1 }
 0x3fd   : > { %v6183_v37 = vadd.f32 %v9262_v3, %v6147_v10  ;;  %5838 = vmatmul.bf16.gmra.mxu2 %v5698_v35  ;;  %v5612_v55 = vadd.f32 %v5571_v23, %v4930_v56 }
 0x3fe   : > { %v6092_v34 = vpop.f32.mrf.mxu3 }
 0x3ff   : > { %v6215_v21 = vmax.f32 %v6183_v37, 0.0  ;;  %v5648_v49 = vadd.f32 %v9132_v17, %v5612_v55 }
 0x400   : > { %v5799_v59 = vpop.f32.mrf.mxu2 }
 0x401   : > { %v7446_v48 = vpack.c.bf16 %v6215_v21, %v6214_v15  ;;  %v5800_v30 = vadd.f32 %v9252_v41, %v5799_v59  ;;  %v5680_v29 = vmax.f32 %v5648_v49, 0.0  ;;  %v9473_v15 = vld [vmem:[#allocation18_spill] sm:$0xff] }
 0x402   : > { %v4002_v21 = vadd.f32 %v9243_v1, %v9473_v15 }
 0x403   : > { %7510 = vst [vmem:[%s9277_s15 + $0x18] sm:$0xff] %v7446_v48   ;;  %v6148_v57 = vadd.f32 %v9296_v31, %v5800_v30  ;;  %6134 = vmatmul.bf16.gmra.mxu3 %v7419_v43  ;;  %v4901_v55 = vpop.f32.mrf.mxu0 }
 0x404   : > { %v5573_v38 = vpop.f32.mrf.mxu1 }
 0x405   : > { %v5613_v27 = vadd.f32 %v5573_v38, %v4931_v6  ;;  %v6184_v63 = vadd.f32 %v9262_v3, %v6148_v57  ;;  %v4653_v6 = vadd.f32 %v9225_v22, %v4002_v21 }
 0x406   : > { %v6095_v11 = vpop.f32.mrf.mxu3 }
 0x407   : > { %v5649_v16 = vadd.f32 %v9132_v17, %v5613_v27  ;;  %v6216_v42 = vmax.f32 %v6184_v63, 0.0  ;;  %v4935_v38 = vadd.f32 %v4901_v55, %v4653_v6 }
 0x408   : > { %v5801_v26 = vpop.f32.mrf.mxu2 }
 0x409   : > { %v5681_v18 = vmax.f32 %v5649_v16, 0.0  ;;  %v5802_v33 = vadd.f32 %v9252_v41, %v5801_v26 }
 0x40b   : > { %v6149_v5 = vadd.f32 %v6082_v4, %v5802_v33  ;;  %v5699_v9 = vpack.c.bf16 %v5681_v18, %v5680_v29 }
 0x40c   : > { %v5576_v60 = vpop.f32.mrf.mxu1 }
 0x40d   : > { %v6185_v31 = vadd.f32 %v9262_v3, %v6149_v5  ;;  %5843 = vmatmul.bf16.gmra.mxu2 %v5699_v9  ;;  %v5614_v36 = vadd.f32 %v5576_v60, %v4932_v39 }
 0x40e   : > { %v6097_v37 = vpop.f32.mrf.mxu3 }
 0x40f   : > { %v6217_v46 = vmax.f32 %v6185_v31, 0.0  ;;  %v5650_v12 = vadd.f32 %v9132_v17, %v5614_v36 }
 0x410   : > { %v5804_v62 = vpop.f32.mrf.mxu2 }
 0x411   : > { %v7451_v4 = vpack.c.bf16 %v6217_v46, %v6216_v42  ;;  %v5805_v40 = vadd.f32 %v9252_v41, %v5804_v62  ;;  %v5682_v47 = vmax.f32 %v5650_v12, 0.0 }
 0x413   : > { %7511 = vst [vmem:[%s9277_s15 + $0x20] sm:$0xff] %v7451_v4   ;;  %v6150_v13 = vadd.f32 %v9311_v58, %v5805_v40  ;;  %v4934_v58 = vadd.f32 %v4899_v32, %v9126_v50 }
 0x414   : > { %v5578_v52 = vpop.f32.mrf.mxu1 }
 0x415   : > { %v5615_v51 = vadd.f32 %v5578_v52, %v4933_v44  ;;  %v6186_v23 = vadd.f32 %v9262_v3, %v6150_v13 }
 0x416   : > { %v6100_v57 = vpop.f32.mrf.mxu3 }
 0x417   : > { %v5651_v0 = vadd.f32 %v9132_v17, %v5615_v51  ;;  %v6218_v19 = vmax.f32 %v6186_v23, 0.0 }
 0x418   : > { %v5806_v2 = vpop.f32.mrf.mxu2 }
 0x419   : > { %v5683_v10 = vmax.f32 %v5651_v0, 0.0  ;;  %v5807_v35 = vadd.f32 %v9252_v41, %v5806_v2 }
 0x41b   : > { %v6151_v53 = vadd.f32 %v6087_v45, %v5807_v35  ;;  %v5700_v61 = vpack.c.bf16 %v5683_v10, %v5682_v47 }
 0x41c   : > { %v5581_v56 = vpop.f32.mrf.mxu1 }
 0x41d   : > { %v6187_v59 = vadd.f32 %v9262_v3, %v6151_v53  ;;  %5848 = vmatmul.bf16.gmra.mxu2 %v5700_v61  ;;  %v5616_v45 = vadd.f32 %v5581_v56, %v4934_v58 }
 0x41e   : > { %v6102_v14 = vpop.f32.mrf.mxu3 }
 0x41f   : > { %v6219_v48 = vmax.f32 %v6187_v59, 0.0  ;;  %v5652_v1 = vadd.f32 %v9132_v17, %v5616_v45 }
 0x420   : > { %v5809_v54 = vpop.f32.mrf.mxu2 }
 0x421   : > { %v7456_v30 = vpack.c.bf16 %v6219_v48, %v6218_v19  ;;  %v5810_v49 = vadd.f32 %v9252_v41, %v5809_v54  ;;  %v5684_v18 = vmax.f32 %v5652_v1, 0.0 }
 0x423   : > { %7512 = vst [vmem:[%s9277_s15 + $0x28] sm:$0xff] %v7456_v30   ;;  %v6152_v26 = vadd.f32 %v9326_v25, %v5810_v49 }
 0x424   : > { %v5583_v27 = vpop.f32.mrf.mxu1 }
 0x425   : > { %v5617_v16 = vadd.f32 %v5583_v27, %v4935_v38  ;;  %v6188_v43 = vadd.f32 %v9262_v3, %v6152_v26 }
 0x426   : > { %v6105_v39 = vpop.f32.mrf.mxu3 }
 0x427   : > { %v5653_v50 = vadd.f32 %v9132_v17, %v5617_v16  ;;  %v6220_v60 = vmax.f32 %v6188_v43, 0.0 }
 0x428   : > { %v5811_v29 = vpop.f32.mrf.mxu2 }
 0x429   : > { %v5685_v33 = vmax.f32 %v5653_v50, 0.0  ;;  %v5812_v22 = vadd.f32 %v9252_v41, %v5811_v29 }
 0x42b   : > { %v6153_v63 = vadd.f32 %v6092_v34, %v5812_v22  ;;  %v5701_v5 = vpack.c.bf16 %v5685_v33, %v5684_v18 }
 0x42d   : > { %v6189_v9 = vadd.f32 %v9262_v3, %v6153_v63  ;;  %5853 = vmatmul.bf16.gmra.mxu2 %v5701_v5 }
 0x42e   : > { %v6107_v44 = vpop.f32.mrf.mxu3 }
 0x42f   : > { %v6221_v20 = vmax.f32 %v6189_v9, 0.0 }
 0x430   : > { %v5814_v8 = vpop.f32.mrf.mxu2 }
 0x431   : > { %v7461_v25 = vpack.c.bf16 %v6221_v20, %v6220_v60  ;;  %v5815_v17 = vadd.f32 %v9252_v41, %v5814_v8 }
 0x433   : > { %7513 = vst [vmem:[%s9277_s15 + $0x30] sm:$0xff] %v7461_v25   ;;  %v6154_v31 = vadd.f32 %v6095_v11, %v5815_v17 }
 0x435   : > { %v6190_v34 = vadd.f32 %v9262_v3, %v6154_v31 }
 0x436   : > { %v6110_v13 = vpop.f32.mrf.mxu3 }
 0x437   : > { %v6222_v28 = vmax.f32 %v6190_v34, 0.0 }
 0x438   : > { %v5816_v7 = vpop.f32.mrf.mxu2 }
 0x439   : > { %v5817_v42 = vadd.f32 %v9252_v41, %v5816_v7 }
 0x43b   : > { %v6155_v46 = vadd.f32 %v6097_v37, %v5817_v42 }
 0x43d   : > { %v6191_v62 = vadd.f32 %v9262_v3, %v6155_v46 }
 0x43e   : > { %v6112_v53 = vpop.f32.mrf.mxu3 }
 0x43f   : > { %v6223_v24 = vmax.f32 %v6191_v62, 0.0 }
 0x440   : > { %v5819_v4 = vpop.f32.mrf.mxu2 }
 0x441   : > { %v7466_v36 = vpack.c.bf16 %v6223_v24, %v6222_v28  ;;  %v5820_v40 = vadd.f32 %v9252_v41, %v5819_v4 }
 0x443   : > { %7514 = vst [vmem:[%s9277_s15 + $0x38] sm:$0xff] %v7466_v36   ;;  %v6156_v52 = vadd.f32 %v6100_v57, %v5820_v40 }
 0x445   : > { %v6192_v51 = vadd.f32 %v9262_v3, %v6156_v52 }
 0x446   : > { %v6115_v55 = vpop.f32.mrf.mxu3 }
 0x447   : > { %v6224_v2 = vmax.f32 %v6192_v51, 0.0 }
 0x448   : > { %v5821_v11 = vpop.f32.mrf.mxu2 }
 0x449   : > { %v5822_v12 = vadd.f32 %v9252_v41, %v5821_v11 }
 0x44b   : > { %v6157_v32 = vadd.f32 %v6102_v14, %v5822_v12 }
 0x44d   : > { %v6193_v0 = vadd.f32 %v9262_v3, %v6157_v32 }
 0x44e   : > { %v6117_v49 = vpop.f32.mrf.mxu3 }
 0x44f   : > { %v6225_v47 = vmax.f32 %v6193_v0, 0.0 }
 0x450   : > { %v5824_v10 = vpop.f32.mrf.mxu2 }
 0x451   : > { %v7471_v35 = vpack.c.bf16 %v6225_v47, %v6224_v2  ;;  %v5825_v23 = vadd.f32 %v9252_v41, %v5824_v10 }
 0x453   : > { %7515 = vst [vmem:[%s9277_s15 + $0x40] sm:$0xff] %v7471_v35   ;;  %v6158_v61 = vadd.f32 %v6105_v39, %v5825_v23 }
 0x455   : > { %v6194_v15 = vadd.f32 %v9262_v3, %v6158_v61 }
 0x456   : > { %v6120_v33 = vpop.f32.mrf.mxu3 }
 0x457   : > { %v6226_v58 = vmax.f32 %v6194_v15, 0.0 }
 0x458   : > { %v5826_v37 = vpop.f32.mrf.mxu2 }
 0x459   : > { %v5827_v56 = vadd.f32 %v9252_v41, %v5826_v37 }
 0x45b   : > { %v6159_v21 = vadd.f32 %v6107_v44, %v5827_v56 }
 0x45d   : > { %v6195_v59 = vadd.f32 %v9262_v3, %v6159_v21 }
 0x45e   : > { %v6122_v60 = vpop.f32.mrf.mxu3 }
 0x45f   : > { %v6227_v19 = vmax.f32 %v6195_v59, 0.0 }
 0x460   : > { %v5829_v48 = vpop.f32.mrf.mxu2 }
 0x461   : > { %v7476_v54 = vpack.c.bf16 %v6227_v19, %v6226_v58  ;;  %v5830_v6 = vadd.f32 %v9252_v41, %v5829_v48 }
 0x463   : > { %7516 = vst [vmem:[%s9277_s15 + $0x48] sm:$0xff] %v7476_v54   ;;  %v6160_v30 = vadd.f32 %v6110_v13, %v5830_v6 }
 0x465   : > { %v6196_v27 = vadd.f32 %v9262_v3, %v6160_v30 }
 0x466   : > { %v6125_v42 = vpop.f32.mrf.mxu3 }
 0x467   : > { %v6228_v16 = vmax.f32 %v6196_v27, 0.0 }
 0x468   : > { %v5831_v45 = vpop.f32.mrf.mxu2 }
 0x469   : > { %v5832_v38 = vadd.f32 %v9252_v41, %v5831_v45 }
 0x46b   : > { %v6161_v57 = vadd.f32 %v6112_v53, %v5832_v38 }
 0x46d   : > { %v6197_v1 = vadd.f32 %v9262_v3, %v6161_v57 }
 0x46e   : > { %v6127_v40 = vpop.f32.mrf.mxu3 }
 0x46f   : > { %v6229_v26 = vmax.f32 %v6197_v1, 0.0 }
 0x470   : > { %v5834_v50 = vpop.f32.mrf.mxu2 }
 0x471   : > { %v7481_v29 = vpack.c.bf16 %v6229_v26, %v6228_v16  ;;  %v5835_v18 = vadd.f32 %v9252_v41, %v5834_v50 }
 0x473   : > { %7517 = vst [vmem:[%s9277_s15 + $0x50] sm:$0xff] %v7481_v29   ;;  %v6162_v22 = vadd.f32 %v6115_v55, %v5835_v18 }
 0x475   : > { %v6198_v5 = vadd.f32 %v9262_v3, %v6162_v22 }
 0x476   : > { %v6130_v0 = vpop.f32.mrf.mxu3 }
 0x477   : > { %v6230_v20 = vmax.f32 %v6198_v5, 0.0 }
 0x478   : > { %v5836_v43 = vpop.f32.mrf.mxu2 }
 0x479   : > { %v5837_v63 = vadd.f32 %v9252_v41, %v5836_v43 }
 0x47b   : > { %v6163_v9 = vadd.f32 %v6117_v49, %v5837_v63 }
 0x47d   : > { %v6199_v14 = vadd.f32 %v9262_v3, %v6163_v9 }
 0x47e   : > { %v6132_v61 = vpop.f32.mrf.mxu3 }
 0x47f   : > { %v6231_v8 = vmax.f32 %v6199_v14, 0.0 }
 0x480   : > { %v5839_v25 = vpop.f32.mrf.mxu2 }
 0x481   : > { %v7486_v17 = vpack.c.bf16 %v6231_v8, %v6230_v20  ;;  %v5840_v31 = vadd.f32 %v9252_v41, %v5839_v25 }
 0x483   : > { %7518 = vst [vmem:[%s9277_s15 + $0x58] sm:$0xff] %v7486_v17   ;;  %v6164_v7 = vadd.f32 %v6120_v33, %v5840_v31 }
 0x485   : > { %v6200_v46 = vadd.f32 %v9262_v3, %v6164_v7 }
 0x486   : > { %v6135_v55 = vpop.f32.mrf.mxu3 }
 0x487   : > { %v6232_v24 = vmax.f32 %v6200_v46, 0.0 }
 0x488   : > { %v5841_v39 = vpop.f32.mrf.mxu2 }
 0x489   : > { %v5842_v34 = vadd.f32 %v9252_v41, %v5841_v39 }
 0x48b   : > { %v6165_v62 = vadd.f32 %v6122_v60, %v5842_v34 }
 0x48d   : > { %v6201_v28 = vadd.f32 %v9262_v3, %v6165_v62 }
 0x48e   : > { %v6137_v27 = vpop.f32.mrf.mxu3 }
 0x48f   : > { %v6233_v4 = vmax.f32 %v6201_v28, 0.0 }
 0x490   : > { %v5844_v36 = vpop.f32.mrf.mxu2 }
 0x491   : > { %v7491_v44 = vpack.c.bf16 %v6233_v4, %v6232_v24  ;;  %v5845_v52 = vadd.f32 %v9252_v41, %v5844_v36 }
 0x493   : > { %7519 = vst [vmem:[%s9277_s15 + $0x60] sm:$0xff] %v7491_v44   ;;  %v6166_v11 = vadd.f32 %v6125_v42, %v5845_v52 }
 0x495   : > { %v6202_v32 = vadd.f32 %v9262_v3, %v6166_v11 }
 0x497   : > { %v6234_v47 = vmax.f32 %v6202_v32, 0.0 }
 0x498   : > { %v5846_v12 = vpop.f32.mrf.mxu2 }
 0x499   : > { %v5847_v51 = vadd.f32 %v9252_v41, %v5846_v12 }
 0x49b   : > { %v6167_v13 = vadd.f32 %v6127_v40, %v5847_v51 }
 0x49d   : > { %v6203_v2 = vadd.f32 %v9262_v3, %v6167_v13 }
 0x49f   : > { %v6235_v10 = vmax.f32 %v6203_v2, 0.0 }
 0x4a0   : > { %v5849_v35 = vpop.f32.mrf.mxu2 }
 0x4a1   : > { %v7496_v23 = vpack.c.bf16 %v6235_v10, %v6234_v47  ;;  %v5850_v53 = vadd.f32 %v9252_v41, %v5849_v35 }
 0x4a3   : > { %7520 = vst [vmem:[%s9277_s15 + $0x68] sm:$0xff] %v7496_v23   ;;  %v6168_v37 = vadd.f32 %v6130_v0, %v5850_v53 }
 0x4a5   : > { %v6204_v21 = vadd.f32 %v9262_v3, %v6168_v37 }
 0x4a7   : > { %v6236_v19 = vmax.f32 %v6204_v21, 0.0 }
 0x4a8   : > { %v5851_v56 = vpop.f32.mrf.mxu2 }
 0x4a9   : > { %v5852_v15 = vadd.f32 %v9252_v41, %v5851_v56 }
 0x4ab   : > { %v6169_v59 = vadd.f32 %v6132_v61, %v5852_v15 }
 0x4ad   : > { %v6205_v58 = vadd.f32 %v9262_v3, %v6169_v59 }
 0x4af   : > { %v6237_v48 = vmax.f32 %v6205_v58, 0.0 }
 0x4b0   : > { %v5854_v54 = vpop.f32.mrf.mxu2 }
 0x4b1   : > { %v7501_v6 = vpack.c.bf16 %v6237_v48, %v6236_v19  ;;  %v5855_v30 = vadd.f32 %v9252_v41, %v5854_v54 }
 0x4b3   : > { %7521 = vst [vmem:[%s9277_s15 + $0x70] sm:$0xff] %v7501_v6   ;;  %v6170_v45 = vadd.f32 %v6135_v55, %v5855_v30 }
 0x4b5   : > { %v6206_v57 = vadd.f32 %v9262_v3, %v6170_v45 }
 0x4b7   : > { %v6238_v26 = vmax.f32 %v6206_v57, 0.0 }
 0x4b8   : > { %v5856_v38 = vpop.f32.mrf.mxu2 }
 0x4b9   : > { %v5857_v49 = vadd.f32 %v9252_v41, %v5856_v38 }
 0x4bb   : > { %v6171_v1 = vadd.f32 %v6137_v27, %v5857_v49 }
 0x4bd   : > { %v6207_v16 = vadd.f32 %v9262_v3, %v6171_v1 }
 0x4bf   : > { %v6239_v50 = vmax.f32 %v6207_v16, 0.0 }
 0x4c1   : > { %v7506_v29 = vpack.c.bf16 %v6239_v50, %v6238_v26 }
 0x4c3   : > { %7522 = vst [vmem:[%s9277_s15 + $0x78] sm:$0xff] %v7506_v29  }
 0x4c4 PF: > { %s19_s30 = sadd.s32 1, %s7544_s30  }
 0x4c5   : > { %p16_p4 = scmp.ge.s32.totalorder %s19_s30, 4  }
 0x4c7   :  { %18 = sbr.rel (!%p16_p4) target bundleno = 1 (0x1), region = 97 }

</bundles_post_ra>
